<compile_context>
chip_gen: v6e
topology: v6e:2x2x1
jax: 0.10.0
libtpu: 0.0.40
codegen_flags: <defaults>
</compile_context>

<pallas_src>
import jax
import jax.numpy as jnp
from jax.experimental import pallas as pl
from jax.experimental.pallas import tpu as pltpu


# ----------------------------------------------------------------------------
# Fused kernel. Gate order follows PyTorch: i, f, g, o.
# ----------------------------------------------------------------------------
def fused_lstm_classifier_kernel(
    x_ref,        # (T*B, F)  bf16, time-major rows [t*B + b]
    wih1_ref,     # (F, 8H)   bf16  [fwd 4H | bwd 4H], i/f/o columns pre-scaled 0.5
    whh1f_ref,    # (H, 4H)   bf16
    whh1b_ref,    # (H, 4H)   bf16
    b1_ref,       # (1, 8H)   f32
    wih2_ref,     # (2H, 8H)  bf16
    whh2f_ref,    # (H, 4H)   bf16
    b2_ref,       # (1, 8H)   f32
    fc1w_ref,     # (2H, 128) f32  (BatchNorm folded)
    fc1b_ref,     # (1, 128)  f32
    fc2w_ref,     # (128, C)  f32
    fc2b_ref,     # (1, C)    f32
    out_ref,      # (B, C)    f32
):
    f32 = jnp.float32
    bf16 = jnp.bfloat16
    B = out_ref.shape[0]
    H = whh1f_ref.shape[0]
    T = x_ref.shape[0] // B

    def gate_math(gates, c):
        # sigmoid(x) == 0.5 * tanh(x / 2) + 0.5 (exact identity). The /2 scaling of the
        # i/f/o pre-activations is folded into the weights/bias in the wrapper, so ONE
        # tanh pass over the whole (rows, 4H) gate slab serves all four gates.
        t = jnp.tanh(gates)
        i_g = 0.5 * t[:, 0 * H:1 * H] + 0.5
        f_g = 0.5 * t[:, 1 * H:2 * H] + 0.5
        g_g = t[:, 2 * H:3 * H]
        o_g = 0.5 * t[:, 3 * H:4 * H] + 0.5
        c_new = f_g * c + i_g * g_g
        h_new = o_g * jnp.tanh(c_new)
        return h_new, c_new

    # ---- Layer-1 input projections for ALL timesteps and BOTH directions:
    #      one well-shaped matmul (bias folded in), off the serial critical path. ----
    px1 = (jnp.dot(x_ref[...], wih1_ref[...], preferred_element_type=f32)
           + b1_ref[...])                                    # (T*B, 8H)

    zeros_2B = jnp.zeros((2 * B, H), f32)
    zeros_B = jnp.zeros((B, H), f32)

    # ---- Layer 1: fwd + bwd recurrences, gate math shared on a sublane-stacked
    #      (2B, 4H) slab; time loop fully unrolled (static slices). ----
    h12, c12 = zeros_2B, zeros_2B                # rows [0:B] = fwd, [B:2B] = bwd
    l1f = [None] * T
    l1b = [None] * T
    for s in range(T):
        tf, tb = s, T - 1 - s
        pf = px1[tf * B:(tf + 1) * B, 0:4 * H]
        pb = px1[tb * B:(tb + 1) * B, 4 * H:8 * H]
        if s == 0:                               # h == 0: recurrent matmul vanishes
            gates = jnp.concatenate([pf, pb], axis=0)
        else:
            gf = jnp.dot(h12[:B].astype(bf16), whh1f_ref[...],
                         preferred_element_type=f32)
            gb = jnp.dot(h12[B:].astype(bf16), whh1b_ref[...],
                         preferred_element_type=f32)
            gates = jnp.concatenate([gf + pf, gb + pb], axis=0)
        h12, c12 = gate_math(gates, c12)
        l1f[tf] = h12[:B]
        l1b[tb] = h12[B:]

    # ---- Layer-2 input projections for ALL timesteps and BOTH directions:
    #      one matmul over the assembled layer-1 output. ----
    l1_all = jnp.concatenate(
        [jnp.concatenate(l1f, axis=0), jnp.concatenate(l1b, axis=0)],
        axis=1)                                              # (T*B, 2H)
    px2 = (jnp.dot(l1_all.astype(bf16), wih2_ref[...], preferred_element_type=f32)
           + b2_ref[...])                                    # (T*B, 8H)

    # ---- Layer-2 backward: the head only reads lstm_out[:, -1, :], i.e. the backward
    # state after its FIRST reverse step from zero init, so h @ W_hh_bwd == 0 and all
    # later reverse steps are provably unused.  Issued BEFORE the forward chain so its
    # EUP/VPU work hides under the forward-recurrence dependency stalls. ----
    h2b, _ = gate_math(px2[(T - 1) * B:T * B, 4 * H:8 * H], zeros_B)

    # ---- Layer-2 forward recurrence (only the final hidden state is read). ----
    h2f, c2f = zeros_B, zeros_B
    for t in range(T):
        pf = px2[t * B:(t + 1) * B, 0:4 * H]
        if t == 0:
            gates = pf
        else:
            gates = (jnp.dot(h2f.astype(bf16), whh2f_ref[...],
                             preferred_element_type=f32) + pf)
        h2f, c2f = gate_math(gates, c2f)

    # ---- Head: fc1 (BatchNorm1d eval folded in) -> ReLU -> fc2, all f32. ----
    # TODO(synk): Dropout(p=0.4) is identity in eval mode; training-mode RNG masking
    # is not implemented.
    last = jnp.concatenate([h2f, h2b], axis=1)               # (B, 2H)
    z = jnp.dot(last, fc1w_ref[...], preferred_element_type=f32) + fc1b_ref[...]
    z = jnp.maximum(z, 0.0)
    out_ref[...] = (jnp.dot(z, fc2w_ref[...], preferred_element_type=f32)
                    + fc2b_ref[...])


# ----------------------------------------------------------------------------
# Wrapper: parameter repacking (transpose, direction concat, sigmoid->tanh
# scaling fold, BatchNorm fold, bf16 casts) + one grid-less pallas_call.
# ----------------------------------------------------------------------------
def _prep_direction(w_ih, w_hh, b_ih, b_hh):
    """Transpose PyTorch LSTM weights and fold the 0.5 (sigmoid->tanh identity)
    pre-activation scaling into the i/f/o gate columns (gate order i, f, g, o)."""
    H = w_hh.shape[1]
    scale = jnp.concatenate([
        jnp.full((H,), 0.5, jnp.float32), jnp.full((H,), 0.5, jnp.float32),
        jnp.ones((H,), jnp.float32), jnp.full((H,), 0.5, jnp.float32)])
    wih_t = w_ih.T * scale           # (Din, 4H)
    whh_t = w_hh.T * scale           # (H, 4H)
    b = (b_ih + b_hh) * scale        # (4H,)
    return wih_t, whh_t, b


def lstm_emotion_classifier(x_btf, params):
    """Eval-mode forward pass; x_btf is (B, T, input_size), batch_first like PyTorch.

    All repacking below is plain XLA outside the kernel; in deployment it would be
    done once at model-load time.
    """
    x = x_btf.astype(jnp.float32)
    B, T, F = x.shape
    l1, l2 = params["lstm"]
    H = l1["w_hh_fwd"].shape[1]
    C = params["fc2_w"].shape[0]
    bf16 = jnp.bfloat16

    wih1f, whh1f, b1f = _prep_direction(l1["w_ih_fwd"], l1["w_hh_fwd"],
                                        l1["b_ih_fwd"], l1["b_hh_fwd"])
    wih1b, whh1b, b1b = _prep_direction(l1["w_ih_bwd"], l1["w_hh_bwd"],
                                        l1["b_ih_bwd"], l1["b_hh_bwd"])
    wih2f, whh2f, b2f = _prep_direction(l2["w_ih_fwd"], l2["w_hh_fwd"],
                                        l2["b_ih_fwd"], l2["b_hh_fwd"])
    wih2b, _whh2b, b2b = _prep_direction(l2["w_ih_bwd"], l2["w_hh_bwd"],
                                         l2["b_ih_bwd"], l2["b_hh_bwd"])
    # _whh2b is never needed: the head only reads the layer-2 backward state after its
    # first reverse step (zero hidden init), so its recurrent matmul is identically 0.

    wih1_cat = jnp.concatenate([wih1f, wih1b], axis=1).astype(bf16)   # (F, 8H)
    wih2_cat = jnp.concatenate([wih2f, wih2b], axis=1).astype(bf16)   # (2H, 8H)
    b1_cat = jnp.concatenate([b1f, b1b]).reshape(1, 8 * H)
    b2_cat = jnp.concatenate([b2f, b2b]).reshape(1, 8 * H)

    # Fold BatchNorm1d (eval, running stats) into fc1 — exact algebraic fold.
    inv = params["bn_gamma"] * jax.lax.rsqrt(params["bn_var"] + 1e-5)
    fc1w = (params["fc1_w"].T * inv).astype(jnp.float32)              # (2H, 128)
    fc1b = ((params["fc1_b"] - params["bn_mean"]) * inv
            + params["bn_beta"]).reshape(1, -1)
    fc2w = params["fc2_w"].T.astype(jnp.float32)                      # (128, C)
    fc2b = params["fc2_b"].reshape(1, -1)

    # Time-major (T*B, F): lets the kernel do EVERY timestep's input projection in
    # one (T*B, F) x (F, 8H) matmul off the serial recurrence path.
    x_tb = jnp.transpose(x, (1, 0, 2)).reshape(T * B, F).astype(bf16)

    args = (x_tb, wih1_cat,
            whh1f.astype(bf16), whh1b.astype(bf16), b1_cat,
            wih2_cat, whh2f.astype(bf16), b2_cat,
            fc1w, fc1b, fc2w, fc2b)

    vmem = pl.BlockSpec(memory_space=pltpu.MemorySpace.VMEM)
    # TODO(synk): for large batches on v7x, add a batch-tiled grid with
    # dimension_semantics=("parallel",) so work shards across both TensorCores;
    # at B=2 a single grid-less invocation on one core is optimal.
    return pl.pallas_call(
        fused_lstm_classifier_kernel,
        out_shape=jax.ShapeDtypeStruct((B, C), jnp.float32),
        in_specs=[vmem] * len(args),
        out_specs=vmem,
    )(*args)


# ----------------------------------------------------------------------------
# Deterministic PyTorch-layout parameter construction.
# ----------------------------------------------------------------------------
def make_params(key, input_size, hidden_size, num_classes):
    H = hidden_size
    keys = iter(jax.random.split(key, 40))
    u = lambda shape, s: jax.random.uniform(next(keys), shape, jnp.float32, -s, s)

    k = 1.0 / (H ** 0.5)
    layers = []
    d_in = input_size
    for _ in range(2):                         # num_layers = 2, bidirectional
        layer = {}
        for tag in ("fwd", "bwd"):
            layer[f"w_ih_{tag}"] = u((4 * H, d_in), k)   # weight_ih_l{k}[_reverse]
            layer[f"w_hh_{tag}"] = u((4 * H, H), k)      # weight_hh_l{k}[_reverse]
            layer[f"b_ih_{tag}"] = u((4 * H,), k)
            layer[f"b_hh_{tag}"] = u((4 * H,), k)
        layers.append(layer)
        d_in = 2 * H

    k1 = 1.0 / ((2 * H) ** 0.5)
    k2 = 1.0 / (128.0 ** 0.5)
    return {
        "lstm": layers,
        "fc1_w": u((128, 2 * H), k1), "fc1_b": u((128,), k1),
        "bn_gamma": 1.0 + 0.1 * u((128,), 1.0),
        "bn_beta": 0.1 * u((128,), 1.0),
        "bn_mean": 0.1 * u((128,), 1.0),                  # BN running stats (eval)
        "bn_var": 1.0 + 0.1 * jnp.abs(u((128,), 1.0)),
        "fc2_w": u((num_classes, 128), k2), "fc2_b": u((num_classes,), k2),
    }


# ----------------------------------------------------------------------------
# Pure-JAX f32 reference (full recurrences, true sigmoid, unfolded BatchNorm).
# ----------------------------------------------------------------------------
def _ref_direction(x_btd, w_ih, w_hh, b_ih, b_hh, reverse):
    B, T, _ = x_btd.shape
    H = w_hh.shape[1]
    hi = jax.lax.Precision.HIGHEST
    wih_t, whh_t = w_ih.T, w_hh.T
    b = (b_ih + b_hh).reshape(1, -1)
    h = jnp.zeros((B, H), jnp.float32)
    c = jnp.zeros((B, H), jnp.float32)
    outs = [None] * T
    order = range(T - 1, -1, -1) if reverse else range(T)
    for t in order:
        g = (jnp.dot(x_btd[:, t, :], wih_t, precision=hi)
             + jnp.dot(h, whh_t, precision=hi) + b)
        i_g = jax.nn.sigmoid(g[:, 0 * H:1 * H])
        f_g = jax.nn.sigmoid(g[:, 1 * H:2 * H])
        g_g = jnp.tanh(g[:, 2 * H:3 * H])
        o_g = jax.nn.sigmoid(g[:, 3 * H:4 * H])
        c = f_g * c + i_g * g_g
        h = o_g * jnp.tanh(c)
        outs[t] = h
    return jnp.stack(outs, axis=1)


def reference_forward(x, params):
    hi = jax.lax.Precision.HIGHEST
    h_in = x.astype(jnp.float32)
    for layer in params["lstm"]:
        f = _ref_direction(h_in, layer["w_ih_fwd"], layer["w_hh_fwd"],
                           layer["b_ih_fwd"], layer["b_hh_fwd"], reverse=False)
        b = _ref_direction(h_in, layer["w_ih_bwd"], layer["w_hh_bwd"],
                           layer["b_ih_bwd"], layer["b_hh_bwd"], reverse=True)
        h_in = jnp.concatenate([f, b], axis=-1)
    last = h_in[:, -1, :]
    z = jnp.dot(last, params["fc1_w"].T, precision=hi) + params["fc1_b"]
    z = (z - params["bn_mean"]) * jax.lax.rsqrt(params["bn_var"] + 1e-5)
    z = z * params["bn_gamma"] + params["bn_beta"]
    z = jnp.maximum(z, 0.0)
    return jnp.dot(z, params["fc2_w"].T, precision=hi) + params["fc2_b"]


if __name__ == "__main__":
    B, T, input_size = 2, 8, 16
    hidden_size = 128          # matches the PyTorch module's hidden_size
    num_classes = 4

    key = jax.random.PRNGKey(0)
    k_x, k_p = jax.random.split(key)
    x = jax.random.normal(k_x, (B, T, input_size), jnp.float32)
    params = make_params(k_p, input_size, hidden_size, num_classes)

    fwd = jax.jit(lstm_emotion_classifier)
    logits = fwd(x, params)
    jax.block_until_ready(logits)
    assert logits.shape == (B, num_classes)

    ref = jax.jit(reference_forward)(x, params)
    jax.block_until_ready(ref)
    max_err = float(jnp.max(jnp.abs(logits - ref)))
    # Tolerance accounts for bf16 MXU operands (f32 accumulation and f32 c/h state)
    # vs. the pure-f32 reference; the sigmoid->tanh and BatchNorm folds are exact.
    assert max_err < 2e-2, f"kernel/reference mismatch, max abs err={max_err}"

    print("KERNEL_OK")
</pallas_src>

<mosaic_0001>
module attributes {stable_mosaic.version = 11 : i64} {
  func.func @fused_lstm_classifier_kernel(%arg0: memref<16x16xbf16, #tpu.memory_space<vmem>>, %arg1: memref<16x1024xbf16, #tpu.memory_space<vmem>>, %arg2: memref<128x512xbf16, #tpu.memory_space<vmem>>, %arg3: memref<128x512xbf16, #tpu.memory_space<vmem>>, %arg4: memref<1x1024xf32, #tpu.memory_space<vmem>>, %arg5: memref<256x1024xbf16, #tpu.memory_space<vmem>>, %arg6: memref<128x512xbf16, #tpu.memory_space<vmem>>, %arg7: memref<1x1024xf32, #tpu.memory_space<vmem>>, %arg8: memref<256x128xf32, #tpu.memory_space<vmem>>, %arg9: memref<1x128xf32, #tpu.memory_space<vmem>>, %arg10: memref<128x4xf32, #tpu.memory_space<vmem>>, %arg11: memref<1x4xf32, #tpu.memory_space<vmem>>, %arg12: memref<2x4xf32, #tpu.memory_space<vmem>>) attributes {dimension_semantics = [], scalar_prefetch = 0 : i64, scratch_operands = 0 : i64, tpu.core_type = #tpu.core_type<tc>} {
    %c0 = arith.constant 0 : index
    %c0_0 = arith.constant 0 : index
    %0 = vector.load %arg0[%c0, %c0_0] : memref<16x16xbf16, #tpu.memory_space<vmem>>, vector<16x16xbf16>
    %c0_1 = arith.constant 0 : index
    %c0_2 = arith.constant 0 : index
    %1 = vector.load %arg1[%c0_1, %c0_2] : memref<16x1024xbf16, #tpu.memory_space<vmem>>, vector<16x1024xbf16>
    %cst = arith.constant dense<0.000000e+00> : vector<16x1024xf32>
    %2 = tpu.matmul %0, %1, %cst {dimension_numbers = #tpu.dot_dimension_numbers<[1], [0], [0], [1], [0, 0, 1, 1], [], []>} : vector<16x16xbf16>, vector<16x1024xbf16>, vector<16x1024xf32> -> vector<16x1024xf32>
    %c0_3 = arith.constant 0 : index
    %c0_4 = arith.constant 0 : index
    %3 = vector.load %arg4[%c0_3, %c0_4] : memref<1x1024xf32, #tpu.memory_space<vmem>>, vector<1x1024xf32>
    %4 = vector.broadcast %3 : vector<1x1024xf32> to vector<16x1024xf32>
    %5 = arith.addf %2, %4 : vector<16x1024xf32>
    %cst_5 = arith.constant 0.000000e+00 : f32
    %6 = vector.broadcast %cst_5 : f32 to vector<4x128xf32>
    %cst_6 = arith.constant 0.000000e+00 : f32
    %7 = vector.broadcast %cst_6 : f32 to vector<2x128xf32>
    %8 = vector.extract_strided_slice %5 {offsets = [0, 0], sizes = [2, 512], strides = [1, 1]} : vector<16x1024xf32> to vector<2x512xf32>
    %9 = vector.extract_strided_slice %5 {offsets = [14, 512], sizes = [2, 512], strides = [1, 1]} : vector<16x1024xf32> to vector<2x512xf32>
    %10 = tpu.concatenate %8, %9 in 0 : vector<2x512xf32>, vector<2x512xf32> -> vector<4x512xf32>
    %11 = math.tanh %10 : vector<4x512xf32>
    %12 = vector.extract_strided_slice %11 {offsets = [0, 0], sizes = [4, 128], strides = [1, 1]} : vector<4x512xf32> to vector<4x128xf32>
    %cst_7 = arith.constant 5.000000e-01 : f32
    %13 = vector.broadcast %cst_7 : f32 to vector<4x128xf32>
    %14 = arith.mulf %13, %12 : vector<4x128xf32>
    %cst_8 = arith.constant 5.000000e-01 : f32
    %15 = vector.broadcast %cst_8 : f32 to vector<4x128xf32>
    %16 = arith.addf %14, %15 : vector<4x128xf32>
    %17 = vector.extract_strided_slice %11 {offsets = [0, 128], sizes = [4, 128], strides = [1, 1]} : vector<4x512xf32> to vector<4x128xf32>
    %cst_9 = arith.constant 5.000000e-01 : f32
    %18 = vector.broadcast %cst_9 : f32 to vector<4x128xf32>
    %19 = arith.mulf %18, %17 : vector<4x128xf32>
    %cst_10 = arith.constant 5.000000e-01 : f32
    %20 = vector.broadcast %cst_10 : f32 to vector<4x128xf32>
    %21 = arith.addf %19, %20 : vector<4x128xf32>
    %22 = vector.extract_strided_slice %11 {offsets = [0, 256], sizes = [4, 128], strides = [1, 1]} : vector<4x512xf32> to vector<4x128xf32>
    %23 = vector.extract_strided_slice %11 {offsets = [0, 384], sizes = [4, 128], strides = [1, 1]} : vector<4x512xf32> to vector<4x128xf32>
    %cst_11 = arith.constant 5.000000e-01 : f32
    %24 = vector.broadcast %cst_11 : f32 to vector<4x128xf32>
    %25 = arith.mulf %24, %23 : vector<4x128xf32>
    %cst_12 = arith.constant 5.000000e-01 : f32
    %26 = vector.broadcast %cst_12 : f32 to vector<4x128xf32>
    %27 = arith.addf %25, %26 : vector<4x128xf32>
    %28 = arith.mulf %21, %6 : vector<4x128xf32>
    %29 = arith.mulf %16, %22 : vector<4x128xf32>
    %30 = arith.addf %28, %29 : vector<4x128xf32>
    %31 = math.tanh %30 : vector<4x128xf32>
    %32 = arith.mulf %27, %31 : vector<4x128xf32>
    %33 = vector.extract_strided_slice %32 {offsets = [0, 0], sizes = [2, 128], strides = [1, 1]} : vector<4x128xf32> to vector<2x128xf32>
    %34 = vector.extract_strided_slice %32 {offsets = [2, 0], sizes = [2, 128], strides = [1, 1]} : vector<4x128xf32> to vector<2x128xf32>
    %35 = vector.extract_strided_slice %5 {offsets = [2, 0], sizes = [2, 512], strides = [1, 1]} : vector<16x1024xf32> to vector<2x512xf32>
    %36 = vector.extract_strided_slice %5 {offsets = [12, 512], sizes = [2, 512], strides = [1, 1]} : vector<16x1024xf32> to vector<2x512xf32>
    %37 = vector.extract_strided_slice %32 {offsets = [0, 0], sizes = [2, 128], strides = [1, 1]} : vector<4x128xf32> to vector<2x128xf32>
    %38 = arith.truncf %37 : vector<2x128xf32> to vector<2x128xbf16>
    %c0_13 = arith.constant 0 : index
    %c0_14 = arith.constant 0 : index
    %39 = vector.load %arg2[%c0_13, %c0_14] : memref<128x512xbf16, #tpu.memory_space<vmem>>, vector<128x512xbf16>
    %cst_15 = arith.constant dense<0.000000e+00> : vector<2x512xf32>
    %40 = tpu.matmul %38, %39, %cst_15 {dimension_numbers = #tpu.dot_dimension_numbers<[1], [0], [0], [1], [0, 0, 1, 1], [], []>} : vector<2x128xbf16>, vector<128x512xbf16>, vector<2x512xf32> -> vector<2x512xf32>
    %41 = vector.extract_strided_slice %32 {offsets = [2, 0], sizes = [2, 128], strides = [1, 1]} : vector<4x128xf32> to vector<2x128xf32>
    %42 = arith.truncf %41 : vector<2x128xf32> to vector<2x128xbf16>
    %c0_16 = arith.constant 0 : index
    %c0_17 = arith.constant 0 : index
    %43 = vector.load %arg3[%c0_16, %c0_17] : memref<128x512xbf16, #tpu.memory_space<vmem>>, vector<128x512xbf16>
    %cst_18 = arith.constant dense<0.000000e+00> : vector<2x512xf32>
    %44 = tpu.matmul %42, %43, %cst_18 {dimension_numbers = #tpu.dot_dimension_numbers<[1], [0], [0], [1], [0, 0, 1, 1], [], []>} : vector<2x128xbf16>, vector<128x512xbf16>, vector<2x512xf32> -> vector<2x512xf32>
    %45 = arith.addf %40, %35 : vector<2x512xf32>
    %46 = arith.addf %44, %36 : vector<2x512xf32>
    %47 = tpu.concatenate %45, %46 in 0 : vector<2x512xf32>, vector<2x512xf32> -> vector<4x512xf32>
    %48 = math.tanh %47 : vector<4x512xf32>
    %49 = vector.extract_strided_slice %48 {offsets = [0, 0], sizes = [4, 128], strides = [1, 1]} : vector<4x512xf32> to vector<4x128xf32>
    %cst_19 = arith.constant 5.000000e-01 : f32
    %50 = vector.broadcast %cst_19 : f32 to vector<4x128xf32>
    %51 = arith.mulf %50, %49 : vector<4x128xf32>
    %cst_20 = arith.constant 5.000000e-01 : f32
    %52 = vector.broadcast %cst_20 : f32 to vector<4x128xf32>
    %53 = arith.addf %51, %52 : vector<4x128xf32>
    %54 = vector.extract_strided_slice %48 {offsets = [0, 128], sizes = [4, 128], strides = [1, 1]} : vector<4x512xf32> to vector<4x128xf32>
    %cst_21 = arith.constant 5.000000e-01 : f32
    %55 = vector.broadcast %cst_21 : f32 to vector<4x128xf32>
    %56 = arith.mulf %55, %54 : vector<4x128xf32>
    %cst_22 = arith.constant 5.000000e-01 : f32
    %57 = vector.broadcast %cst_22 : f32 to vector<4x128xf32>
    %58 = arith.addf %56, %57 : vector<4x128xf32>
    %59 = vector.extract_strided_slice %48 {offsets = [0, 256], sizes = [4, 128], strides = [1, 1]} : vector<4x512xf32> to vector<4x128xf32>
    %60 = vector.extract_strided_slice %48 {offsets = [0, 384], sizes = [4, 128], strides = [1, 1]} : vector<4x512xf32> to vector<4x128xf32>
    %cst_23 = arith.constant 5.000000e-01 : f32
    %61 = vector.broadcast %cst_23 : f32 to vector<4x128xf32>
    %62 = arith.mulf %61, %60 : vector<4x128xf32>
    %cst_24 = arith.constant 5.000000e-01 : f32
    %63 = vector.broadcast %cst_24 : f32 to vector<4x128xf32>
    %64 = arith.addf %62, %63 : vector<4x128xf32>
    %65 = arith.mulf %58, %30 : vector<4x128xf32>
    %66 = arith.mulf %53, %59 : vector<4x128xf32>
    %67 = arith.addf %65, %66 : vector<4x128xf32>
    %68 = math.tanh %67 : vector<4x128xf32>
    %69 = arith.mulf %64, %68 : vector<4x128xf32>
    %70 = vector.extract_strided_slice %69 {offsets = [0, 0], sizes = [2, 128], strides = [1, 1]} : vector<4x128xf32> to vector<2x128xf32>
    %71 = vector.extract_strided_slice %69 {offsets = [2, 0], sizes = [2, 128], strides = [1, 1]} : vector<4x128xf32> to vector<2x128xf32>
    %72 = vector.extract_strided_slice %5 {offsets = [4, 0], sizes = [2, 512], strides = [1, 1]} : vector<16x1024xf32> to vector<2x512xf32>
    %73 = vector.extract_strided_slice %5 {offsets = [10, 512], sizes = [2, 512], strides = [1, 1]} : vector<16x1024xf32> to vector<2x512xf32>
    %74 = vector.extract_strided_slice %69 {offsets = [0, 0], sizes = [2, 128], strides = [1, 1]} : vector<4x128xf32> to vector<2x128xf32>
    %75 = arith.truncf %74 : vector<2x128xf32> to vector<2x128xbf16>
    %c0_25 = arith.constant 0 : index
    %c0_26 = arith.constant 0 : index
    %76 = vector.load %arg2[%c0_25, %c0_26] : memref<128x512xbf16, #tpu.memory_space<vmem>>, vector<128x512xbf16>
    %cst_27 = arith.constant dense<0.000000e+00> : vector<2x512xf32>
    %77 = tpu.matmul %75, %76, %cst_27 {dimension_numbers = #tpu.dot_dimension_numbers<[1], [0], [0], [1], [0, 0, 1, 1], [], []>} : vector<2x128xbf16>, vector<128x512xbf16>, vector<2x512xf32> -> vector<2x512xf32>
    %78 = vector.extract_strided_slice %69 {offsets = [2, 0], sizes = [2, 128], strides = [1, 1]} : vector<4x128xf32> to vector<2x128xf32>
    %79 = arith.truncf %78 : vector<2x128xf32> to vector<2x128xbf16>
    %c0_28 = arith.constant 0 : index
    %c0_29 = arith.constant 0 : index
    %80 = vector.load %arg3[%c0_28, %c0_29] : memref<128x512xbf16, #tpu.memory_space<vmem>>, vector<128x512xbf16>
    %cst_30 = arith.constant dense<0.000000e+00> : vector<2x512xf32>
    %81 = tpu.matmul %79, %80, %cst_30 {dimension_numbers = #tpu.dot_dimension_numbers<[1], [0], [0], [1], [0, 0, 1, 1], [], []>} : vector<2x128xbf16>, vector<128x512xbf16>, vector<2x512xf32> -> vector<2x512xf32>
    %82 = arith.addf %77, %72 : vector<2x512xf32>
    %83 = arith.addf %81, %73 : vector<2x512xf32>
    %84 = tpu.concatenate %82, %83 in 0 : vector<2x512xf32>, vector<2x512xf32> -> vector<4x512xf32>
    %85 = math.tanh %84 : vector<4x512xf32>
    %86 = vector.extract_strided_slice %85 {offsets = [0, 0], sizes = [4, 128], strides = [1, 1]} : vector<4x512xf32> to vector<4x128xf32>
    %cst_31 = arith.constant 5.000000e-01 : f32
    %87 = vector.broadcast %cst_31 : f32 to vector<4x128xf32>
    %88 = arith.mulf %87, %86 : vector<4x128xf32>
    %cst_32 = arith.constant 5.000000e-01 : f32
    %89 = vector.broadcast %cst_32 : f32 to vector<4x128xf32>
    %90 = arith.addf %88, %89 : vector<4x128xf32>
    %91 = vector.extract_strided_slice %85 {offsets = [0, 128], sizes = [4, 128], strides = [1, 1]} : vector<4x512xf32> to vector<4x128xf32>
    %cst_33 = arith.constant 5.000000e-01 : f32
    %92 = vector.broadcast %cst_33 : f32 to vector<4x128xf32>
    %93 = arith.mulf %92, %91 : vector<4x128xf32>
    %cst_34 = arith.constant 5.000000e-01 : f32
    %94 = vector.broadcast %cst_34 : f32 to vector<4x128xf32>
    %95 = arith.addf %93, %94 : vector<4x128xf32>
    %96 = vector.extract_strided_slice %85 {offsets = [0, 256], sizes = [4, 128], strides = [1, 1]} : vector<4x512xf32> to vector<4x128xf32>
    %97 = vector.extract_strided_slice %85 {offsets = [0, 384], sizes = [4, 128], strides = [1, 1]} : vector<4x512xf32> to vector<4x128xf32>
    %cst_35 = arith.constant 5.000000e-01 : f32
    %98 = vector.broadcast %cst_35 : f32 to vector<4x128xf32>
    %99 = arith.mulf %98, %97 : vector<4x128xf32>
    %cst_36 = arith.constant 5.000000e-01 : f32
    %100 = vector.broadcast %cst_36 : f32 to vector<4x128xf32>
    %101 = arith.addf %99, %100 : vector<4x128xf32>
    %102 = arith.mulf %95, %67 : vector<4x128xf32>
    %103 = arith.mulf %90, %96 : vector<4x128xf32>
    %104 = arith.addf %102, %103 : vector<4x128xf32>
    %105 = math.tanh %104 : vector<4x128xf32>
    %106 = arith.mulf %101, %105 : vector<4x128xf32>
    %107 = vector.extract_strided_slice %106 {offsets = [0, 0], sizes = [2, 128], strides = [1, 1]} : vector<4x128xf32> to vector<2x128xf32>
    %108 = vector.extract_strided_slice %106 {offsets = [2, 0], sizes = [2, 128], strides = [1, 1]} : vector<4x128xf32> to vector<2x128xf32>
    %109 = vector.extract_strided_slice %5 {offsets = [6, 0], sizes = [2, 512], strides = [1, 1]} : vector<16x1024xf32> to vector<2x512xf32>
    %110 = vector.extract_strided_slice %5 {offsets = [8, 512], sizes = [2, 512], strides = [1, 1]} : vector<16x1024xf32> to vector<2x512xf32>
    %111 = vector.extract_strided_slice %106 {offsets = [0, 0], sizes = [2, 128], strides = [1, 1]} : vector<4x128xf32> to vector<2x128xf32>
    %112 = arith.truncf %111 : vector<2x128xf32> to vector<2x128xbf16>
    %c0_37 = arith.constant 0 : index
    %c0_38 = arith.constant 0 : index
    %113 = vector.load %arg2[%c0_37, %c0_38] : memref<128x512xbf16, #tpu.memory_space<vmem>>, vector<128x512xbf16>
    %cst_39 = arith.constant dense<0.000000e+00> : vector<2x512xf32>
    %114 = tpu.matmul %112, %113, %cst_39 {dimension_numbers = #tpu.dot_dimension_numbers<[1], [0], [0], [1], [0, 0, 1, 1], [], []>} : vector<2x128xbf16>, vector<128x512xbf16>, vector<2x512xf32> -> vector<2x512xf32>
    %115 = vector.extract_strided_slice %106 {offsets = [2, 0], sizes = [2, 128], strides = [1, 1]} : vector<4x128xf32> to vector<2x128xf32>
    %116 = arith.truncf %115 : vector<2x128xf32> to vector<2x128xbf16>
    %c0_40 = arith.constant 0 : index
    %c0_41 = arith.constant 0 : index
    %117 = vector.load %arg3[%c0_40, %c0_41] : memref<128x512xbf16, #tpu.memory_space<vmem>>, vector<128x512xbf16>
    %cst_42 = arith.constant dense<0.000000e+00> : vector<2x512xf32>
    %118 = tpu.matmul %116, %117, %cst_42 {dimension_numbers = #tpu.dot_dimension_numbers<[1], [0], [0], [1], [0, 0, 1, 1], [], []>} : vector<2x128xbf16>, vector<128x512xbf16>, vector<2x512xf32> -> vector<2x512xf32>
    %119 = arith.addf %114, %109 : vector<2x512xf32>
    %120 = arith.addf %118, %110 : vector<2x512xf32>
    %121 = tpu.concatenate %119, %120 in 0 : vector<2x512xf32>, vector<2x512xf32> -> vector<4x512xf32>
    %122 = math.tanh %121 : vector<4x512xf32>
    %123 = vector.extract_strided_slice %122 {offsets = [0, 0], sizes = [4, 128], strides = [1, 1]} : vector<4x512xf32> to vector<4x128xf32>
    %cst_43 = arith.constant 5.000000e-01 : f32
    %124 = vector.broadcast %cst_43 : f32 to vector<4x128xf32>
    %125 = arith.mulf %124, %123 : vector<4x128xf32>
    %cst_44 = arith.constant 5.000000e-01 : f32
    %126 = vector.broadcast %cst_44 : f32 to vector<4x128xf32>
    %127 = arith.addf %125, %126 : vector<4x128xf32>
    %128 = vector.extract_strided_slice %122 {offsets = [0, 128], sizes = [4, 128], strides = [1, 1]} : vector<4x512xf32> to vector<4x128xf32>
    %cst_45 = arith.constant 5.000000e-01 : f32
    %129 = vector.broadcast %cst_45 : f32 to vector<4x128xf32>
    %130 = arith.mulf %129, %128 : vector<4x128xf32>
    %cst_46 = arith.constant 5.000000e-01 : f32
    %131 = vector.broadcast %cst_46 : f32 to vector<4x128xf32>
    %132 = arith.addf %130, %131 : vector<4x128xf32>
    %133 = vector.extract_strided_slice %122 {offsets = [0, 256], sizes = [4, 128], strides = [1, 1]} : vector<4x512xf32> to vector<4x128xf32>
    %134 = vector.extract_strided_slice %122 {offsets = [0, 384], sizes = [4, 128], strides = [1, 1]} : vector<4x512xf32> to vector<4x128xf32>
    %cst_47 = arith.constant 5.000000e-01 : f32
    %135 = vector.broadcast %cst_47 : f32 to vector<4x128xf32>
    %136 = arith.mulf %135, %134 : vector<4x128xf32>
    %cst_48 = arith.constant 5.000000e-01 : f32
    %137 = vector.broadcast %cst_48 : f32 to vector<4x128xf32>
    %138 = arith.addf %136, %137 : vector<4x128xf32>
    %139 = arith.mulf %132, %104 : vector<4x128xf32>
    %140 = arith.mulf %127, %133 : vector<4x128xf32>
    %141 = arith.addf %139, %140 : vector<4x128xf32>
    %142 = math.tanh %141 : vector<4x128xf32>
    %143 = arith.mulf %138, %142 : vector<4x128xf32>
    %144 = vector.extract_strided_slice %143 {offsets = [0, 0], sizes = [2, 128], strides = [1, 1]} : vector<4x128xf32> to vector<2x128xf32>
    %145 = vector.extract_strided_slice %143 {offsets = [2, 0], sizes = [2, 128], strides = [1, 1]} : vector<4x128xf32> to vector<2x128xf32>
    %146 = vector.extract_strided_slice %5 {offsets = [8, 0], sizes = [2, 512], strides = [1, 1]} : vector<16x1024xf32> to vector<2x512xf32>
    %147 = vector.extract_strided_slice %5 {offsets = [6, 512], sizes = [2, 512], strides = [1, 1]} : vector<16x1024xf32> to vector<2x512xf32>
    %148 = vector.extract_strided_slice %143 {offsets = [0, 0], sizes = [2, 128], strides = [1, 1]} : vector<4x128xf32> to vector<2x128xf32>
    %149 = arith.truncf %148 : vector<2x128xf32> to vector<2x128xbf16>
    %c0_49 = arith.constant 0 : index
    %c0_50 = arith.constant 0 : index
    %150 = vector.load %arg2[%c0_49, %c0_50] : memref<128x512xbf16, #tpu.memory_space<vmem>>, vector<128x512xbf16>
    %cst_51 = arith.constant dense<0.000000e+00> : vector<2x512xf32>
    %151 = tpu.matmul %149, %150, %cst_51 {dimension_numbers = #tpu.dot_dimension_numbers<[1], [0], [0], [1], [0, 0, 1, 1], [], []>} : vector<2x128xbf16>, vector<128x512xbf16>, vector<2x512xf32> -> vector<2x512xf32>
    %152 = vector.extract_strided_slice %143 {offsets = [2, 0], sizes = [2, 128], strides = [1, 1]} : vector<4x128xf32> to vector<2x128xf32>
    %153 = arith.truncf %152 : vector<2x128xf32> to vector<2x128xbf16>
    %c0_52 = arith.constant 0 : index
    %c0_53 = arith.constant 0 : index
    %154 = vector.load %arg3[%c0_52, %c0_53] : memref<128x512xbf16, #tpu.memory_space<vmem>>, vector<128x512xbf16>
    %cst_54 = arith.constant dense<0.000000e+00> : vector<2x512xf32>
    %155 = tpu.matmul %153, %154, %cst_54 {dimension_numbers = #tpu.dot_dimension_numbers<[1], [0], [0], [1], [0, 0, 1, 1], [], []>} : vector<2x128xbf16>, vector<128x512xbf16>, vector<2x512xf32> -> vector<2x512xf32>
    %156 = arith.addf %151, %146 : vector<2x512xf32>
    %157 = arith.addf %155, %147 : vector<2x512xf32>
    %158 = tpu.concatenate %156, %157 in 0 : vector<2x512xf32>, vector<2x512xf32> -> vector<4x512xf32>
    %159 = math.tanh %158 : vector<4x512xf32>
    %160 = vector.extract_strided_slice %159 {offsets = [0, 0], sizes = [4, 128], strides = [1, 1]} : vector<4x512xf32> to vector<4x128xf32>
    %cst_55 = arith.constant 5.000000e-01 : f32
    %161 = vector.broadcast %cst_55 : f32 to vector<4x128xf32>
    %162 = arith.mulf %161, %160 : vector<4x128xf32>
    %cst_56 = arith.constant 5.000000e-01 : f32
    %163 = vector.broadcast %cst_56 : f32 to vector<4x128xf32>
    %164 = arith.addf %162, %163 : vector<4x128xf32>
    %165 = vector.extract_strided_slice %159 {offsets = [0, 128], sizes = [4, 128], strides = [1, 1]} : vector<4x512xf32> to vector<4x128xf32>
    %cst_57 = arith.constant 5.000000e-01 : f32
    %166 = vector.broadcast %cst_57 : f32 to vector<4x128xf32>
    %167 = arith.mulf %166, %165 : vector<4x128xf32>
    %cst_58 = arith.constant 5.000000e-01 : f32
    %168 = vector.broadcast %cst_58 : f32 to vector<4x128xf32>
    %169 = arith.addf %167, %168 : vector<4x128xf32>
    %170 = vector.extract_strided_slice %159 {offsets = [0, 256], sizes = [4, 128], strides = [1, 1]} : vector<4x512xf32> to vector<4x128xf32>
    %171 = vector.extract_strided_slice %159 {offsets = [0, 384], sizes = [4, 128], strides = [1, 1]} : vector<4x512xf32> to vector<4x128xf32>
    %cst_59 = arith.constant 5.000000e-01 : f32
    %172 = vector.broadcast %cst_59 : f32 to vector<4x128xf32>
    %173 = arith.mulf %172, %171 : vector<4x128xf32>
    %cst_60 = arith.constant 5.000000e-01 : f32
    %174 = vector.broadcast %cst_60 : f32 to vector<4x128xf32>
    %175 = arith.addf %173, %174 : vector<4x128xf32>
    %176 = arith.mulf %169, %141 : vector<4x128xf32>
    %177 = arith.mulf %164, %170 : vector<4x128xf32>
    %178 = arith.addf %176, %177 : vector<4x128xf32>
    %179 = math.tanh %178 : vector<4x128xf32>
    %180 = arith.mulf %175, %179 : vector<4x128xf32>
    %181 = vector.extract_strided_slice %180 {offsets = [0, 0], sizes = [2, 128], strides = [1, 1]} : vector<4x128xf32> to vector<2x128xf32>
    %182 = vector.extract_strided_slice %180 {offsets = [2, 0], sizes = [2, 128], strides = [1, 1]} : vector<4x128xf32> to vector<2x128xf32>
    %183 = vector.extract_strided_slice %5 {offsets = [10, 0], sizes = [2, 512], strides = [1, 1]} : vector<16x1024xf32> to vector<2x512xf32>
    %184 = vector.extract_strided_slice %5 {offsets = [4, 512], sizes = [2, 512], strides = [1, 1]} : vector<16x1024xf32> to vector<2x512xf32>
    %185 = vector.extract_strided_slice %180 {offsets = [0, 0], sizes = [2, 128], strides = [1, 1]} : vector<4x128xf32> to vector<2x128xf32>
    %186 = arith.truncf %185 : vector<2x128xf32> to vector<2x128xbf16>
    %c0_61 = arith.constant 0 : index
    %c0_62 = arith.constant 0 : index
    %187 = vector.load %arg2[%c0_61, %c0_62] : memref<128x512xbf16, #tpu.memory_space<vmem>>, vector<128x512xbf16>
    %cst_63 = arith.constant dense<0.000000e+00> : vector<2x512xf32>
    %188 = tpu.matmul %186, %187, %cst_63 {dimension_numbers = #tpu.dot_dimension_numbers<[1], [0], [0], [1], [0, 0, 1, 1], [], []>} : vector<2x128xbf16>, vector<128x512xbf16>, vector<2x512xf32> -> vector<2x512xf32>
    %189 = vector.extract_strided_slice %180 {offsets = [2, 0], sizes = [2, 128], strides = [1, 1]} : vector<4x128xf32> to vector<2x128xf32>
    %190 = arith.truncf %189 : vector<2x128xf32> to vector<2x128xbf16>
    %c0_64 = arith.constant 0 : index
    %c0_65 = arith.constant 0 : index
    %191 = vector.load %arg3[%c0_64, %c0_65] : memref<128x512xbf16, #tpu.memory_space<vmem>>, vector<128x512xbf16>
    %cst_66 = arith.constant dense<0.000000e+00> : vector<2x512xf32>
    %192 = tpu.matmul %190, %191, %cst_66 {dimension_numbers = #tpu.dot_dimension_numbers<[1], [0], [0], [1], [0, 0, 1, 1], [], []>} : vector<2x128xbf16>, vector<128x512xbf16>, vector<2x512xf32> -> vector<2x512xf32>
    %193 = arith.addf %188, %183 : vector<2x512xf32>
    %194 = arith.addf %192, %184 : vector<2x512xf32>
    %195 = tpu.concatenate %193, %194 in 0 : vector<2x512xf32>, vector<2x512xf32> -> vector<4x512xf32>
    %196 = math.tanh %195 : vector<4x512xf32>
    %197 = vector.extract_strided_slice %196 {offsets = [0, 0], sizes = [4, 128], strides = [1, 1]} : vector<4x512xf32> to vector<4x128xf32>
    %cst_67 = arith.constant 5.000000e-01 : f32
    %198 = vector.broadcast %cst_67 : f32 to vector<4x128xf32>
    %199 = arith.mulf %198, %197 : vector<4x128xf32>
    %cst_68 = arith.constant 5.000000e-01 : f32
    %200 = vector.broadcast %cst_68 : f32 to vector<4x128xf32>
    %201 = arith.addf %199, %200 : vector<4x128xf32>
    %202 = vector.extract_strided_slice %196 {offsets = [0, 128], sizes = [4, 128], strides = [1, 1]} : vector<4x512xf32> to vector<4x128xf32>
    %cst_69 = arith.constant 5.000000e-01 : f32
    %203 = vector.broadcast %cst_69 : f32 to vector<4x128xf32>
    %204 = arith.mulf %203, %202 : vector<4x128xf32>
    %cst_70 = arith.constant 5.000000e-01 : f32
    %205 = vector.broadcast %cst_70 : f32 to vector<4x128xf32>
    %206 = arith.addf %204, %205 : vector<4x128xf32>
    %207 = vector.extract_strided_slice %196 {offsets = [0, 256], sizes = [4, 128], strides = [1, 1]} : vector<4x512xf32> to vector<4x128xf32>
    %208 = vector.extract_strided_slice %196 {offsets = [0, 384], sizes = [4, 128], strides = [1, 1]} : vector<4x512xf32> to vector<4x128xf32>
    %cst_71 = arith.constant 5.000000e-01 : f32
    %209 = vector.broadcast %cst_71 : f32 to vector<4x128xf32>
    %210 = arith.mulf %209, %208 : vector<4x128xf32>
    %cst_72 = arith.constant 5.000000e-01 : f32
    %211 = vector.broadcast %cst_72 : f32 to vector<4x128xf32>
    %212 = arith.addf %210, %211 : vector<4x128xf32>
    %213 = arith.mulf %206, %178 : vector<4x128xf32>
    %214 = arith.mulf %201, %207 : vector<4x128xf32>
    %215 = arith.addf %213, %214 : vector<4x128xf32>
    %216 = math.tanh %215 : vector<4x128xf32>
    %217 = arith.mulf %212, %216 : vector<4x128xf32>
    %218 = vector.extract_strided_slice %217 {offsets = [0, 0], sizes = [2, 128], strides = [1, 1]} : vector<4x128xf32> to vector<2x128xf32>
    %219 = vector.extract_strided_slice %217 {offsets = [2, 0], sizes = [2, 128], strides = [1, 1]} : vector<4x128xf32> to vector<2x128xf32>
    %220 = vector.extract_strided_slice %5 {offsets = [12, 0], sizes = [2, 512], strides = [1, 1]} : vector<16x1024xf32> to vector<2x512xf32>
    %221 = vector.extract_strided_slice %5 {offsets = [2, 512], sizes = [2, 512], strides = [1, 1]} : vector<16x1024xf32> to vector<2x512xf32>
    %222 = vector.extract_strided_slice %217 {offsets = [0, 0], sizes = [2, 128], strides = [1, 1]} : vector<4x128xf32> to vector<2x128xf32>
    %223 = arith.truncf %222 : vector<2x128xf32> to vector<2x128xbf16>
    %c0_73 = arith.constant 0 : index
    %c0_74 = arith.constant 0 : index
    %224 = vector.load %arg2[%c0_73, %c0_74] : memref<128x512xbf16, #tpu.memory_space<vmem>>, vector<128x512xbf16>
    %cst_75 = arith.constant dense<0.000000e+00> : vector<2x512xf32>
    %225 = tpu.matmul %223, %224, %cst_75 {dimension_numbers = #tpu.dot_dimension_numbers<[1], [0], [0], [1], [0, 0, 1, 1], [], []>} : vector<2x128xbf16>, vector<128x512xbf16>, vector<2x512xf32> -> vector<2x512xf32>
    %226 = vector.extract_strided_slice %217 {offsets = [2, 0], sizes = [2, 128], strides = [1, 1]} : vector<4x128xf32> to vector<2x128xf32>
    %227 = arith.truncf %226 : vector<2x128xf32> to vector<2x128xbf16>
    %c0_76 = arith.constant 0 : index
    %c0_77 = arith.constant 0 : index
    %228 = vector.load %arg3[%c0_76, %c0_77] : memref<128x512xbf16, #tpu.memory_space<vmem>>, vector<128x512xbf16>
    %cst_78 = arith.constant dense<0.000000e+00> : vector<2x512xf32>
    %229 = tpu.matmul %227, %228, %cst_78 {dimension_numbers = #tpu.dot_dimension_numbers<[1], [0], [0], [1], [0, 0, 1, 1], [], []>} : vector<2x128xbf16>, vector<128x512xbf16>, vector<2x512xf32> -> vector<2x512xf32>
    %230 = arith.addf %225, %220 : vector<2x512xf32>
    %231 = arith.addf %229, %221 : vector<2x512xf32>
    %232 = tpu.concatenate %230, %231 in 0 : vector<2x512xf32>, vector<2x512xf32> -> vector<4x512xf32>
    %233 = math.tanh %232 : vector<4x512xf32>
    %234 = vector.extract_strided_slice %233 {offsets = [0, 0], sizes = [4, 128], strides = [1, 1]} : vector<4x512xf32> to vector<4x128xf32>
    %cst_79 = arith.constant 5.000000e-01 : f32
    %235 = vector.broadcast %cst_79 : f32 to vector<4x128xf32>
    %236 = arith.mulf %235, %234 : vector<4x128xf32>
    %cst_80 = arith.constant 5.000000e-01 : f32
    %237 = vector.broadcast %cst_80 : f32 to vector<4x128xf32>
    %238 = arith.addf %236, %237 : vector<4x128xf32>
    %239 = vector.extract_strided_slice %233 {offsets = [0, 128], sizes = [4, 128], strides = [1, 1]} : vector<4x512xf32> to vector<4x128xf32>
    %cst_81 = arith.constant 5.000000e-01 : f32
    %240 = vector.broadcast %cst_81 : f32 to vector<4x128xf32>
    %241 = arith.mulf %240, %239 : vector<4x128xf32>
    %cst_82 = arith.constant 5.000000e-01 : f32
    %242 = vector.broadcast %cst_82 : f32 to vector<4x128xf32>
    %243 = arith.addf %241, %242 : vector<4x128xf32>
    %244 = vector.extract_strided_slice %233 {offsets = [0, 256], sizes = [4, 128], strides = [1, 1]} : vector<4x512xf32> to vector<4x128xf32>
    %245 = vector.extract_strided_slice %233 {offsets = [0, 384], sizes = [4, 128], strides = [1, 1]} : vector<4x512xf32> to vector<4x128xf32>
    %cst_83 = arith.constant 5.000000e-01 : f32
    %246 = vector.broadcast %cst_83 : f32 to vector<4x128xf32>
    %247 = arith.mulf %246, %245 : vector<4x128xf32>
    %cst_84 = arith.constant 5.000000e-01 : f32
    %248 = vector.broadcast %cst_84 : f32 to vector<4x128xf32>
    %249 = arith.addf %247, %248 : vector<4x128xf32>
    %250 = arith.mulf %243, %215 : vector<4x128xf32>
    %251 = arith.mulf %238, %244 : vector<4x128xf32>
    %252 = arith.addf %250, %251 : vector<4x128xf32>
    %253 = math.tanh %252 : vector<4x128xf32>
    %254 = arith.mulf %249, %253 : vector<4x128xf32>
    %255 = vector.extract_strided_slice %254 {offsets = [0, 0], sizes = [2, 128], strides = [1, 1]} : vector<4x128xf32> to vector<2x128xf32>
    %256 = vector.extract_strided_slice %254 {offsets = [2, 0], sizes = [2, 128], strides = [1, 1]} : vector<4x128xf32> to vector<2x128xf32>
    %257 = vector.extract_strided_slice %5 {offsets = [14, 0], sizes = [2, 512], strides = [1, 1]} : vector<16x1024xf32> to vector<2x512xf32>
    %258 = vector.extract_strided_slice %5 {offsets = [0, 512], sizes = [2, 512], strides = [1, 1]} : vector<16x1024xf32> to vector<2x512xf32>
    %259 = vector.extract_strided_slice %254 {offsets = [0, 0], sizes = [2, 128], strides = [1, 1]} : vector<4x128xf32> to vector<2x128xf32>
    %260 = arith.truncf %259 : vector<2x128xf32> to vector<2x128xbf16>
    %c0_85 = arith.constant 0 : index
    %c0_86 = arith.constant 0 : index
    %261 = vector.load %arg2[%c0_85, %c0_86] : memref<128x512xbf16, #tpu.memory_space<vmem>>, vector<128x512xbf16>
    %cst_87 = arith.constant dense<0.000000e+00> : vector<2x512xf32>
    %262 = tpu.matmul %260, %261, %cst_87 {dimension_numbers = #tpu.dot_dimension_numbers<[1], [0], [0], [1], [0, 0, 1, 1], [], []>} : vector<2x128xbf16>, vector<128x512xbf16>, vector<2x512xf32> -> vector<2x512xf32>
    %263 = vector.extract_strided_slice %254 {offsets = [2, 0], sizes = [2, 128], strides = [1, 1]} : vector<4x128xf32> to vector<2x128xf32>
    %264 = arith.truncf %263 : vector<2x128xf32> to vector<2x128xbf16>
    %c0_88 = arith.constant 0 : index
    %c0_89 = arith.constant 0 : index
    %265 = vector.load %arg3[%c0_88, %c0_89] : memref<128x512xbf16, #tpu.memory_space<vmem>>, vector<128x512xbf16>
    %cst_90 = arith.constant dense<0.000000e+00> : vector<2x512xf32>
    %266 = tpu.matmul %264, %265, %cst_90 {dimension_numbers = #tpu.dot_dimension_numbers<[1], [0], [0], [1], [0, 0, 1, 1], [], []>} : vector<2x128xbf16>, vector<128x512xbf16>, vector<2x512xf32> -> vector<2x512xf32>
    %267 = arith.addf %262, %257 : vector<2x512xf32>
    %268 = arith.addf %266, %258 : vector<2x512xf32>
    %269 = tpu.concatenate %267, %268 in 0 : vector<2x512xf32>, vector<2x512xf32> -> vector<4x512xf32>
    %270 = math.tanh %269 : vector<4x512xf32>
    %271 = vector.extract_strided_slice %270 {offsets = [0, 0], sizes = [4, 128], strides = [1, 1]} : vector<4x512xf32> to vector<4x128xf32>
    %cst_91 = arith.constant 5.000000e-01 : f32
    %272 = vector.broadcast %cst_91 : f32 to vector<4x128xf32>
    %273 = arith.mulf %272, %271 : vector<4x128xf32>
    %cst_92 = arith.constant 5.000000e-01 : f32
    %274 = vector.broadcast %cst_92 : f32 to vector<4x128xf32>
    %275 = arith.addf %273, %274 : vector<4x128xf32>
    %276 = vector.extract_strided_slice %270 {offsets = [0, 128], sizes = [4, 128], strides = [1, 1]} : vector<4x512xf32> to vector<4x128xf32>
    %cst_93 = arith.constant 5.000000e-01 : f32
    %277 = vector.broadcast %cst_93 : f32 to vector<4x128xf32>
    %278 = arith.mulf %277, %276 : vector<4x128xf32>
    %cst_94 = arith.constant 5.000000e-01 : f32
    %279 = vector.broadcast %cst_94 : f32 to vector<4x128xf32>
    %280 = arith.addf %278, %279 : vector<4x128xf32>
    %281 = vector.extract_strided_slice %270 {offsets = [0, 256], sizes = [4, 128], strides = [1, 1]} : vector<4x512xf32> to vector<4x128xf32>
    %282 = vector.extract_strided_slice %270 {offsets = [0, 384], sizes = [4, 128], strides = [1, 1]} : vector<4x512xf32> to vector<4x128xf32>
    %cst_95 = arith.constant 5.000000e-01 : f32
    %283 = vector.broadcast %cst_95 : f32 to vector<4x128xf32>
    %284 = arith.mulf %283, %282 : vector<4x128xf32>
    %cst_96 = arith.constant 5.000000e-01 : f32
    %285 = vector.broadcast %cst_96 : f32 to vector<4x128xf32>
    %286 = arith.addf %284, %285 : vector<4x128xf32>
    %287 = arith.mulf %280, %252 : vector<4x128xf32>
    %288 = arith.mulf %275, %281 : vector<4x128xf32>
    %289 = arith.addf %287, %288 : vector<4x128xf32>
    %290 = math.tanh %289 : vector<4x128xf32>
    %291 = arith.mulf %286, %290 : vector<4x128xf32>
    %292 = vector.extract_strided_slice %291 {offsets = [0, 0], sizes = [2, 128], strides = [1, 1]} : vector<4x128xf32> to vector<2x128xf32>
    %293 = vector.extract_strided_slice %291 {offsets = [2, 0], sizes = [2, 128], strides = [1, 1]} : vector<4x128xf32> to vector<2x128xf32>
    %294 = tpu.concatenate %33, %70, %107, %144, %181, %218, %255, %292 in 0 : vector<2x128xf32>, vector<2x128xf32>, vector<2x128xf32>, vector<2x128xf32>, vector<2x128xf32>, vector<2x128xf32>, vector<2x128xf32>, vector<2x128xf32> -> vector<16x128xf32>
    %295 = tpu.concatenate %293, %256, %219, %182, %145, %108, %71, %34 in 0 : vector<2x128xf32>, vector<2x128xf32>, vector<2x128xf32>, vector<2x128xf32>, vector<2x128xf32>, vector<2x128xf32>, vector<2x128xf32>, vector<2x128xf32> -> vector<16x128xf32>
    %296 = tpu.concatenate %294, %295 in 1 : vector<16x128xf32>, vector<16x128xf32> -> vector<16x256xf32>
    %297 = arith.truncf %296 : vector<16x256xf32> to vector<16x256xbf16>
    %c0_97 = arith.constant 0 : index
    %c0_98 = arith.constant 0 : index
    %298 = vector.load %arg5[%c0_97, %c0_98] : memref<256x1024xbf16, #tpu.memory_space<vmem>>, vector<256x1024xbf16>
    %cst_99 = arith.constant dense<0.000000e+00> : vector<16x1024xf32>
    %299 = tpu.matmul %297, %298, %cst_99 {dimension_numbers = #tpu.dot_dimension_numbers<[1], [0], [0], [1], [0, 0, 1, 1], [], []>} : vector<16x256xbf16>, vector<256x1024xbf16>, vector<16x1024xf32> -> vector<16x1024xf32>
    %c0_100 = arith.constant 0 : index
    %c0_101 = arith.constant 0 : index
    %300 = vector.load %arg7[%c0_100, %c0_101] : memref<1x1024xf32, #tpu.memory_space<vmem>>, vector<1x1024xf32>
    %301 = vector.broadcast %300 : vector<1x1024xf32> to vector<16x1024xf32>
    %302 = arith.addf %299, %301 : vector<16x1024xf32>
    %303 = vector.extract_strided_slice %302 {offsets = [14, 512], sizes = [2, 512], strides = [1, 1]} : vector<16x1024xf32> to vector<2x512xf32>
    %304 = math.tanh %303 : vector<2x512xf32>
    %305 = vector.extract_strided_slice %304 {offsets = [0, 0], sizes = [2, 128], strides = [1, 1]} : vector<2x512xf32> to vector<2x128xf32>
    %cst_102 = arith.constant 5.000000e-01 : f32
    %306 = vector.broadcast %cst_102 : f32 to vector<2x128xf32>
    %307 = arith.mulf %306, %305 : vector<2x128xf32>
    %cst_103 = arith.constant 5.000000e-01 : f32
    %308 = vector.broadcast %cst_103 : f32 to vector<2x128xf32>
    %309 = arith.addf %307, %308 : vector<2x128xf32>
    %310 = vector.extract_strided_slice %304 {offsets = [0, 128], sizes = [2, 128], strides = [1, 1]} : vector<2x512xf32> to vector<2x128xf32>
    %cst_104 = arith.constant 5.000000e-01 : f32
    %311 = vector.broadcast %cst_104 : f32 to vector<2x128xf32>
    %312 = arith.mulf %311, %310 : vector<2x128xf32>
    %cst_105 = arith.constant 5.000000e-01 : f32
    %313 = vector.broadcast %cst_105 : f32 to vector<2x128xf32>
    %314 = arith.addf %312, %313 : vector<2x128xf32>
    %315 = vector.extract_strided_slice %304 {offsets = [0, 256], sizes = [2, 128], strides = [1, 1]} : vector<2x512xf32> to vector<2x128xf32>
    %316 = vector.extract_strided_slice %304 {offsets = [0, 384], sizes = [2, 128], strides = [1, 1]} : vector<2x512xf32> to vector<2x128xf32>
    %cst_106 = arith.constant 5.000000e-01 : f32
    %317 = vector.broadcast %cst_106 : f32 to vector<2x128xf32>
    %318 = arith.mulf %317, %316 : vector<2x128xf32>
    %cst_107 = arith.constant 5.000000e-01 : f32
    %319 = vector.broadcast %cst_107 : f32 to vector<2x128xf32>
    %320 = arith.addf %318, %319 : vector<2x128xf32>
    %321 = arith.mulf %314, %7 : vector<2x128xf32>
    %322 = arith.mulf %309, %315 : vector<2x128xf32>
    %323 = arith.addf %321, %322 : vector<2x128xf32>
    %324 = math.tanh %323 : vector<2x128xf32>
    %325 = arith.mulf %320, %324 : vector<2x128xf32>
    %326 = vector.extract_strided_slice %302 {offsets = [0, 0], sizes = [2, 512], strides = [1, 1]} : vector<16x1024xf32> to vector<2x512xf32>
    %327 = math.tanh %326 : vector<2x512xf32>
    %328 = vector.extract_strided_slice %327 {offsets = [0, 0], sizes = [2, 128], strides = [1, 1]} : vector<2x512xf32> to vector<2x128xf32>
    %cst_108 = arith.constant 5.000000e-01 : f32
    %329 = vector.broadcast %cst_108 : f32 to vector<2x128xf32>
    %330 = arith.mulf %329, %328 : vector<2x128xf32>
    %cst_109 = arith.constant 5.000000e-01 : f32
    %331 = vector.broadcast %cst_109 : f32 to vector<2x128xf32>
    %332 = arith.addf %330, %331 : vector<2x128xf32>
    %333 = vector.extract_strided_slice %327 {offsets = [0, 128], sizes = [2, 128], strides = [1, 1]} : vector<2x512xf32> to vector<2x128xf32>
    %cst_110 = arith.constant 5.000000e-01 : f32
    %334 = vector.broadcast %cst_110 : f32 to vector<2x128xf32>
    %335 = arith.mulf %334, %333 : vector<2x128xf32>
    %cst_111 = arith.constant 5.000000e-01 : f32
    %336 = vector.broadcast %cst_111 : f32 to vector<2x128xf32>
    %337 = arith.addf %335, %336 : vector<2x128xf32>
    %338 = vector.extract_strided_slice %327 {offsets = [0, 256], sizes = [2, 128], strides = [1, 1]} : vector<2x512xf32> to vector<2x128xf32>
    %339 = vector.extract_strided_slice %327 {offsets = [0, 384], sizes = [2, 128], strides = [1, 1]} : vector<2x512xf32> to vector<2x128xf32>
    %cst_112 = arith.constant 5.000000e-01 : f32
    %340 = vector.broadcast %cst_112 : f32 to vector<2x128xf32>
    %341 = arith.mulf %340, %339 : vector<2x128xf32>
    %cst_113 = arith.constant 5.000000e-01 : f32
    %342 = vector.broadcast %cst_113 : f32 to vector<2x128xf32>
    %343 = arith.addf %341, %342 : vector<2x128xf32>
    %344 = arith.mulf %337, %7 : vector<2x128xf32>
    %345 = arith.mulf %332, %338 : vector<2x128xf32>
    %346 = arith.addf %344, %345 : vector<2x128xf32>
    %347 = math.tanh %346 : vector<2x128xf32>
    %348 = arith.mulf %343, %347 : vector<2x128xf32>
    %349 = vector.extract_strided_slice %302 {offsets = [2, 0], sizes = [2, 512], strides = [1, 1]} : vector<16x1024xf32> to vector<2x512xf32>
    %350 = arith.truncf %348 : vector<2x128xf32> to vector<2x128xbf16>
    %c0_114 = arith.constant 0 : index
    %c0_115 = arith.constant 0 : index
    %351 = vector.load %arg6[%c0_114, %c0_115] : memref<128x512xbf16, #tpu.memory_space<vmem>>, vector<128x512xbf16>
    %cst_116 = arith.constant dense<0.000000e+00> : vector<2x512xf32>
    %352 = tpu.matmul %350, %351, %cst_116 {dimension_numbers = #tpu.dot_dimension_numbers<[1], [0], [0], [1], [0, 0, 1, 1], [], []>} : vector<2x128xbf16>, vector<128x512xbf16>, vector<2x512xf32> -> vector<2x512xf32>
    %353 = arith.addf %352, %349 : vector<2x512xf32>
    %354 = math.tanh %353 : vector<2x512xf32>
    %355 = vector.extract_strided_slice %354 {offsets = [0, 0], sizes = [2, 128], strides = [1, 1]} : vector<2x512xf32> to vector<2x128xf32>
    %cst_117 = arith.constant 5.000000e-01 : f32
    %356 = vector.broadcast %cst_117 : f32 to vector<2x128xf32>
    %357 = arith.mulf %356, %355 : vector<2x128xf32>
    %cst_118 = arith.constant 5.000000e-01 : f32
    %358 = vector.broadcast %cst_118 : f32 to vector<2x128xf32>
    %359 = arith.addf %357, %358 : vector<2x128xf32>
    %360 = vector.extract_strided_slice %354 {offsets = [0, 128], sizes = [2, 128], strides = [1, 1]} : vector<2x512xf32> to vector<2x128xf32>
    %cst_119 = arith.constant 5.000000e-01 : f32
    %361 = vector.broadcast %cst_119 : f32 to vector<2x128xf32>
    %362 = arith.mulf %361, %360 : vector<2x128xf32>
    %cst_120 = arith.constant 5.000000e-01 : f32
    %363 = vector.broadcast %cst_120 : f32 to vector<2x128xf32>
    %364 = arith.addf %362, %363 : vector<2x128xf32>
    %365 = vector.extract_strided_slice %354 {offsets = [0, 256], sizes = [2, 128], strides = [1, 1]} : vector<2x512xf32> to vector<2x128xf32>
    %366 = vector.extract_strided_slice %354 {offsets = [0, 384], sizes = [2, 128], strides = [1, 1]} : vector<2x512xf32> to vector<2x128xf32>
    %cst_121 = arith.constant 5.000000e-01 : f32
    %367 = vector.broadcast %cst_121 : f32 to vector<2x128xf32>
    %368 = arith.mulf %367, %366 : vector<2x128xf32>
    %cst_122 = arith.constant 5.000000e-01 : f32
    %369 = vector.broadcast %cst_122 : f32 to vector<2x128xf32>
    %370 = arith.addf %368, %369 : vector<2x128xf32>
    %371 = arith.mulf %364, %346 : vector<2x128xf32>
    %372 = arith.mulf %359, %365 : vector<2x128xf32>
    %373 = arith.addf %371, %372 : vector<2x128xf32>
    %374 = math.tanh %373 : vector<2x128xf32>
    %375 = arith.mulf %370, %374 : vector<2x128xf32>
    %376 = vector.extract_strided_slice %302 {offsets = [4, 0], sizes = [2, 512], strides = [1, 1]} : vector<16x1024xf32> to vector<2x512xf32>
    %377 = arith.truncf %375 : vector<2x128xf32> to vector<2x128xbf16>
    %c0_123 = arith.constant 0 : index
    %c0_124 = arith.constant 0 : index
    %378 = vector.load %arg6[%c0_123, %c0_124] : memref<128x512xbf16, #tpu.memory_space<vmem>>, vector<128x512xbf16>
    %cst_125 = arith.constant dense<0.000000e+00> : vector<2x512xf32>
    %379 = tpu.matmul %377, %378, %cst_125 {dimension_numbers = #tpu.dot_dimension_numbers<[1], [0], [0], [1], [0, 0, 1, 1], [], []>} : vector<2x128xbf16>, vector<128x512xbf16>, vector<2x512xf32> -> vector<2x512xf32>
    %380 = arith.addf %379, %376 : vector<2x512xf32>
    %381 = math.tanh %380 : vector<2x512xf32>
    %382 = vector.extract_strided_slice %381 {offsets = [0, 0], sizes = [2, 128], strides = [1, 1]} : vector<2x512xf32> to vector<2x128xf32>
    %cst_126 = arith.constant 5.000000e-01 : f32
    %383 = vector.broadcast %cst_126 : f32 to vector<2x128xf32>
    %384 = arith.mulf %383, %382 : vector<2x128xf32>
    %cst_127 = arith.constant 5.000000e-01 : f32
    %385 = vector.broadcast %cst_127 : f32 to vector<2x128xf32>
    %386 = arith.addf %384, %385 : vector<2x128xf32>
    %387 = vector.extract_strided_slice %381 {offsets = [0, 128], sizes = [2, 128], strides = [1, 1]} : vector<2x512xf32> to vector<2x128xf32>
    %cst_128 = arith.constant 5.000000e-01 : f32
    %388 = vector.broadcast %cst_128 : f32 to vector<2x128xf32>
    %389 = arith.mulf %388, %387 : vector<2x128xf32>
    %cst_129 = arith.constant 5.000000e-01 : f32
    %390 = vector.broadcast %cst_129 : f32 to vector<2x128xf32>
    %391 = arith.addf %389, %390 : vector<2x128xf32>
    %392 = vector.extract_strided_slice %381 {offsets = [0, 256], sizes = [2, 128], strides = [1, 1]} : vector<2x512xf32> to vector<2x128xf32>
    %393 = vector.extract_strided_slice %381 {offsets = [0, 384], sizes = [2, 128], strides = [1, 1]} : vector<2x512xf32> to vector<2x128xf32>
    %cst_130 = arith.constant 5.000000e-01 : f32
    %394 = vector.broadcast %cst_130 : f32 to vector<2x128xf32>
    %395 = arith.mulf %394, %393 : vector<2x128xf32>
    %cst_131 = arith.constant 5.000000e-01 : f32
    %396 = vector.broadcast %cst_131 : f32 to vector<2x128xf32>
    %397 = arith.addf %395, %396 : vector<2x128xf32>
    %398 = arith.mulf %391, %373 : vector<2x128xf32>
    %399 = arith.mulf %386, %392 : vector<2x128xf32>
    %400 = arith.addf %398, %399 : vector<2x128xf32>
    %401 = math.tanh %400 : vector<2x128xf32>
    %402 = arith.mulf %397, %401 : vector<2x128xf32>
    %403 = vector.extract_strided_slice %302 {offsets = [6, 0], sizes = [2, 512], strides = [1, 1]} : vector<16x1024xf32> to vector<2x512xf32>
    %404 = arith.truncf %402 : vector<2x128xf32> to vector<2x128xbf16>
    %c0_132 = arith.constant 0 : index
    %c0_133 = arith.constant 0 : index
    %405 = vector.load %arg6[%c0_132, %c0_133] : memref<128x512xbf16, #tpu.memory_space<vmem>>, vector<128x512xbf16>
    %cst_134 = arith.constant dense<0.000000e+00> : vector<2x512xf32>
    %406 = tpu.matmul %404, %405, %cst_134 {dimension_numbers = #tpu.dot_dimension_numbers<[1], [0], [0], [1], [0, 0, 1, 1], [], []>} : vector<2x128xbf16>, vector<128x512xbf16>, vector<2x512xf32> -> vector<2x512xf32>
    %407 = arith.addf %406, %403 : vector<2x512xf32>
    %408 = math.tanh %407 : vector<2x512xf32>
    %409 = vector.extract_strided_slice %408 {offsets = [0, 0], sizes = [2, 128], strides = [1, 1]} : vector<2x512xf32> to vector<2x128xf32>
    %cst_135 = arith.constant 5.000000e-01 : f32
    %410 = vector.broadcast %cst_135 : f32 to vector<2x128xf32>
    %411 = arith.mulf %410, %409 : vector<2x128xf32>
    %cst_136 = arith.constant 5.000000e-01 : f32
    %412 = vector.broadcast %cst_136 : f32 to vector<2x128xf32>
    %413 = arith.addf %411, %412 : vector<2x128xf32>
    %414 = vector.extract_strided_slice %408 {offsets = [0, 128], sizes = [2, 128], strides = [1, 1]} : vector<2x512xf32> to vector<2x128xf32>
    %cst_137 = arith.constant 5.000000e-01 : f32
    %415 = vector.broadcast %cst_137 : f32 to vector<2x128xf32>
    %416 = arith.mulf %415, %414 : vector<2x128xf32>
    %cst_138 = arith.constant 5.000000e-01 : f32
    %417 = vector.broadcast %cst_138 : f32 to vector<2x128xf32>
    %418 = arith.addf %416, %417 : vector<2x128xf32>
    %419 = vector.extract_strided_slice %408 {offsets = [0, 256], sizes = [2, 128], strides = [1, 1]} : vector<2x512xf32> to vector<2x128xf32>
    %420 = vector.extract_strided_slice %408 {offsets = [0, 384], sizes = [2, 128], strides = [1, 1]} : vector<2x512xf32> to vector<2x128xf32>
    %cst_139 = arith.constant 5.000000e-01 : f32
    %421 = vector.broadcast %cst_139 : f32 to vector<2x128xf32>
    %422 = arith.mulf %421, %420 : vector<2x128xf32>
    %cst_140 = arith.constant 5.000000e-01 : f32
    %423 = vector.broadcast %cst_140 : f32 to vector<2x128xf32>
    %424 = arith.addf %422, %423 : vector<2x128xf32>
    %425 = arith.mulf %418, %400 : vector<2x128xf32>
    %426 = arith.mulf %413, %419 : vector<2x128xf32>
    %427 = arith.addf %425, %426 : vector<2x128xf32>
    %428 = math.tanh %427 : vector<2x128xf32>
    %429 = arith.mulf %424, %428 : vector<2x128xf32>
    %430 = vector.extract_strided_slice %302 {offsets = [8, 0], sizes = [2, 512], strides = [1, 1]} : vector<16x1024xf32> to vector<2x512xf32>
    %431 = arith.truncf %429 : vector<2x128xf32> to vector<2x128xbf16>
    %c0_141 = arith.constant 0 : index
    %c0_142 = arith.constant 0 : index
    %432 = vector.load %arg6[%c0_141, %c0_142] : memref<128x512xbf16, #tpu.memory_space<vmem>>, vector<128x512xbf16>
    %cst_143 = arith.constant dense<0.000000e+00> : vector<2x512xf32>
    %433 = tpu.matmul %431, %432, %cst_143 {dimension_numbers = #tpu.dot_dimension_numbers<[1], [0], [0], [1], [0, 0, 1, 1], [], []>} : vector<2x128xbf16>, vector<128x512xbf16>, vector<2x512xf32> -> vector<2x512xf32>
    %434 = arith.addf %433, %430 : vector<2x512xf32>
    %435 = math.tanh %434 : vector<2x512xf32>
    %436 = vector.extract_strided_slice %435 {offsets = [0, 0], sizes = [2, 128], strides = [1, 1]} : vector<2x512xf32> to vector<2x128xf32>
    %cst_144 = arith.constant 5.000000e-01 : f32
    %437 = vector.broadcast %cst_144 : f32 to vector<2x128xf32>
    %438 = arith.mulf %437, %436 : vector<2x128xf32>
    %cst_145 = arith.constant 5.000000e-01 : f32
    %439 = vector.broadcast %cst_145 : f32 to vector<2x128xf32>
    %440 = arith.addf %438, %439 : vector<2x128xf32>
    %441 = vector.extract_strided_slice %435 {offsets = [0, 128], sizes = [2, 128], strides = [1, 1]} : vector<2x512xf32> to vector<2x128xf32>
    %cst_146 = arith.constant 5.000000e-01 : f32
    %442 = vector.broadcast %cst_146 : f32 to vector<2x128xf32>
    %443 = arith.mulf %442, %441 : vector<2x128xf32>
    %cst_147 = arith.constant 5.000000e-01 : f32
    %444 = vector.broadcast %cst_147 : f32 to vector<2x128xf32>
    %445 = arith.addf %443, %444 : vector<2x128xf32>
    %446 = vector.extract_strided_slice %435 {offsets = [0, 256], sizes = [2, 128], strides = [1, 1]} : vector<2x512xf32> to vector<2x128xf32>
    %447 = vector.extract_strided_slice %435 {offsets = [0, 384], sizes = [2, 128], strides = [1, 1]} : vector<2x512xf32> to vector<2x128xf32>
    %cst_148 = arith.constant 5.000000e-01 : f32
    %448 = vector.broadcast %cst_148 : f32 to vector<2x128xf32>
    %449 = arith.mulf %448, %447 : vector<2x128xf32>
    %cst_149 = arith.constant 5.000000e-01 : f32
    %450 = vector.broadcast %cst_149 : f32 to vector<2x128xf32>
    %451 = arith.addf %449, %450 : vector<2x128xf32>
    %452 = arith.mulf %445, %427 : vector<2x128xf32>
    %453 = arith.mulf %440, %446 : vector<2x128xf32>
    %454 = arith.addf %452, %453 : vector<2x128xf32>
    %455 = math.tanh %454 : vector<2x128xf32>
    %456 = arith.mulf %451, %455 : vector<2x128xf32>
    %457 = vector.extract_strided_slice %302 {offsets = [10, 0], sizes = [2, 512], strides = [1, 1]} : vector<16x1024xf32> to vector<2x512xf32>
    %458 = arith.truncf %456 : vector<2x128xf32> to vector<2x128xbf16>
    %c0_150 = arith.constant 0 : index
    %c0_151 = arith.constant 0 : index
    %459 = vector.load %arg6[%c0_150, %c0_151] : memref<128x512xbf16, #tpu.memory_space<vmem>>, vector<128x512xbf16>
    %cst_152 = arith.constant dense<0.000000e+00> : vector<2x512xf32>
    %460 = tpu.matmul %458, %459, %cst_152 {dimension_numbers = #tpu.dot_dimension_numbers<[1], [0], [0], [1], [0, 0, 1, 1], [], []>} : vector<2x128xbf16>, vector<128x512xbf16>, vector<2x512xf32> -> vector<2x512xf32>
    %461 = arith.addf %460, %457 : vector<2x512xf32>
    %462 = math.tanh %461 : vector<2x512xf32>
    %463 = vector.extract_strided_slice %462 {offsets = [0, 0], sizes = [2, 128], strides = [1, 1]} : vector<2x512xf32> to vector<2x128xf32>
    %cst_153 = arith.constant 5.000000e-01 : f32
    %464 = vector.broadcast %cst_153 : f32 to vector<2x128xf32>
    %465 = arith.mulf %464, %463 : vector<2x128xf32>
    %cst_154 = arith.constant 5.000000e-01 : f32
    %466 = vector.broadcast %cst_154 : f32 to vector<2x128xf32>
    %467 = arith.addf %465, %466 : vector<2x128xf32>
    %468 = vector.extract_strided_slice %462 {offsets = [0, 128], sizes = [2, 128], strides = [1, 1]} : vector<2x512xf32> to vector<2x128xf32>
    %cst_155 = arith.constant 5.000000e-01 : f32
    %469 = vector.broadcast %cst_155 : f32 to vector<2x128xf32>
    %470 = arith.mulf %469, %468 : vector<2x128xf32>
    %cst_156 = arith.constant 5.000000e-01 : f32
    %471 = vector.broadcast %cst_156 : f32 to vector<2x128xf32>
    %472 = arith.addf %470, %471 : vector<2x128xf32>
    %473 = vector.extract_strided_slice %462 {offsets = [0, 256], sizes = [2, 128], strides = [1, 1]} : vector<2x512xf32> to vector<2x128xf32>
    %474 = vector.extract_strided_slice %462 {offsets = [0, 384], sizes = [2, 128], strides = [1, 1]} : vector<2x512xf32> to vector<2x128xf32>
    %cst_157 = arith.constant 5.000000e-01 : f32
    %475 = vector.broadcast %cst_157 : f32 to vector<2x128xf32>
    %476 = arith.mulf %475, %474 : vector<2x128xf32>
    %cst_158 = arith.constant 5.000000e-01 : f32
    %477 = vector.broadcast %cst_158 : f32 to vector<2x128xf32>
    %478 = arith.addf %476, %477 : vector<2x128xf32>
    %479 = arith.mulf %472, %454 : vector<2x128xf32>
    %480 = arith.mulf %467, %473 : vector<2x128xf32>
    %481 = arith.addf %479, %480 : vector<2x128xf32>
    %482 = math.tanh %481 : vector<2x128xf32>
    %483 = arith.mulf %478, %482 : vector<2x128xf32>
    %484 = vector.extract_strided_slice %302 {offsets = [12, 0], sizes = [2, 512], strides = [1, 1]} : vector<16x1024xf32> to vector<2x512xf32>
    %485 = arith.truncf %483 : vector<2x128xf32> to vector<2x128xbf16>
    %c0_159 = arith.constant 0 : index
    %c0_160 = arith.constant 0 : index
    %486 = vector.load %arg6[%c0_159, %c0_160] : memref<128x512xbf16, #tpu.memory_space<vmem>>, vector<128x512xbf16>
    %cst_161 = arith.constant dense<0.000000e+00> : vector<2x512xf32>
    %487 = tpu.matmul %485, %486, %cst_161 {dimension_numbers = #tpu.dot_dimension_numbers<[1], [0], [0], [1], [0, 0, 1, 1], [], []>} : vector<2x128xbf16>, vector<128x512xbf16>, vector<2x512xf32> -> vector<2x512xf32>
    %488 = arith.addf %487, %484 : vector<2x512xf32>
    %489 = math.tanh %488 : vector<2x512xf32>
    %490 = vector.extract_strided_slice %489 {offsets = [0, 0], sizes = [2, 128], strides = [1, 1]} : vector<2x512xf32> to vector<2x128xf32>
    %cst_162 = arith.constant 5.000000e-01 : f32
    %491 = vector.broadcast %cst_162 : f32 to vector<2x128xf32>
    %492 = arith.mulf %491, %490 : vector<2x128xf32>
    %cst_163 = arith.constant 5.000000e-01 : f32
    %493 = vector.broadcast %cst_163 : f32 to vector<2x128xf32>
    %494 = arith.addf %492, %493 : vector<2x128xf32>
    %495 = vector.extract_strided_slice %489 {offsets = [0, 128], sizes = [2, 128], strides = [1, 1]} : vector<2x512xf32> to vector<2x128xf32>
    %cst_164 = arith.constant 5.000000e-01 : f32
    %496 = vector.broadcast %cst_164 : f32 to vector<2x128xf32>
    %497 = arith.mulf %496, %495 : vector<2x128xf32>
    %cst_165 = arith.constant 5.000000e-01 : f32
    %498 = vector.broadcast %cst_165 : f32 to vector<2x128xf32>
    %499 = arith.addf %497, %498 : vector<2x128xf32>
    %500 = vector.extract_strided_slice %489 {offsets = [0, 256], sizes = [2, 128], strides = [1, 1]} : vector<2x512xf32> to vector<2x128xf32>
    %501 = vector.extract_strided_slice %489 {offsets = [0, 384], sizes = [2, 128], strides = [1, 1]} : vector<2x512xf32> to vector<2x128xf32>
    %cst_166 = arith.constant 5.000000e-01 : f32
    %502 = vector.broadcast %cst_166 : f32 to vector<2x128xf32>
    %503 = arith.mulf %502, %501 : vector<2x128xf32>
    %cst_167 = arith.constant 5.000000e-01 : f32
    %504 = vector.broadcast %cst_167 : f32 to vector<2x128xf32>
    %505 = arith.addf %503, %504 : vector<2x128xf32>
    %506 = arith.mulf %499, %481 : vector<2x128xf32>
    %507 = arith.mulf %494, %500 : vector<2x128xf32>
    %508 = arith.addf %506, %507 : vector<2x128xf32>
    %509 = math.tanh %508 : vector<2x128xf32>
    %510 = arith.mulf %505, %509 : vector<2x128xf32>
    %511 = vector.extract_strided_slice %302 {offsets = [14, 0], sizes = [2, 512], strides = [1, 1]} : vector<16x1024xf32> to vector<2x512xf32>
    %512 = arith.truncf %510 : vector<2x128xf32> to vector<2x128xbf16>
    %c0_168 = arith.constant 0 : index
    %c0_169 = arith.constant 0 : index
    %513 = vector.load %arg6[%c0_168, %c0_169] : memref<128x512xbf16, #tpu.memory_space<vmem>>, vector<128x512xbf16>
    %cst_170 = arith.constant dense<0.000000e+00> : vector<2x512xf32>
    %514 = tpu.matmul %512, %513, %cst_170 {dimension_numbers = #tpu.dot_dimension_numbers<[1], [0], [0], [1], [0, 0, 1, 1], [], []>} : vector<2x128xbf16>, vector<128x512xbf16>, vector<2x512xf32> -> vector<2x512xf32>
    %515 = arith.addf %514, %511 : vector<2x512xf32>
    %516 = math.tanh %515 : vector<2x512xf32>
    %517 = vector.extract_strided_slice %516 {offsets = [0, 0], sizes = [2, 128], strides = [1, 1]} : vector<2x512xf32> to vector<2x128xf32>
    %cst_171 = arith.constant 5.000000e-01 : f32
    %518 = vector.broadcast %cst_171 : f32 to vector<2x128xf32>
    %519 = arith.mulf %518, %517 : vector<2x128xf32>
    %cst_172 = arith.constant 5.000000e-01 : f32
    %520 = vector.broadcast %cst_172 : f32 to vector<2x128xf32>
    %521 = arith.addf %519, %520 : vector<2x128xf32>
    %522 = vector.extract_strided_slice %516 {offsets = [0, 128], sizes = [2, 128], strides = [1, 1]} : vector<2x512xf32> to vector<2x128xf32>
    %cst_173 = arith.constant 5.000000e-01 : f32
    %523 = vector.broadcast %cst_173 : f32 to vector<2x128xf32>
    %524 = arith.mulf %523, %522 : vector<2x128xf32>
    %cst_174 = arith.constant 5.000000e-01 : f32
    %525 = vector.broadcast %cst_174 : f32 to vector<2x128xf32>
    %526 = arith.addf %524, %525 : vector<2x128xf32>
    %527 = vector.extract_strided_slice %516 {offsets = [0, 256], sizes = [2, 128], strides = [1, 1]} : vector<2x512xf32> to vector<2x128xf32>
    %528 = vector.extract_strided_slice %516 {offsets = [0, 384], sizes = [2, 128], strides = [1, 1]} : vector<2x512xf32> to vector<2x128xf32>
    %cst_175 = arith.constant 5.000000e-01 : f32
    %529 = vector.broadcast %cst_175 : f32 to vector<2x128xf32>
    %530 = arith.mulf %529, %528 : vector<2x128xf32>
    %cst_176 = arith.constant 5.000000e-01 : f32
    %531 = vector.broadcast %cst_176 : f32 to vector<2x128xf32>
    %532 = arith.addf %530, %531 : vector<2x128xf32>
    %533 = arith.mulf %526, %508 : vector<2x128xf32>
    %534 = arith.mulf %521, %527 : vector<2x128xf32>
    %535 = arith.addf %533, %534 : vector<2x128xf32>
    %536 = math.tanh %535 : vector<2x128xf32>
    %537 = arith.mulf %532, %536 : vector<2x128xf32>
    %538 = tpu.concatenate %537, %325 in 1 : vector<2x128xf32>, vector<2x128xf32> -> vector<2x256xf32>
    %c0_177 = arith.constant 0 : index
    %c0_178 = arith.constant 0 : index
    %539 = vector.load %arg8[%c0_177, %c0_178] : memref<256x128xf32, #tpu.memory_space<vmem>>, vector<256x128xf32>
    %cst_179 = arith.constant dense<0.000000e+00> : vector<2x128xf32>
    %540 = tpu.matmul %538, %539, %cst_179 {dimension_numbers = #tpu.dot_dimension_numbers<[1], [0], [0], [1], [0, 0, 1, 1], [], []>} : vector<2x256xf32>, vector<256x128xf32>, vector<2x128xf32> -> vector<2x128xf32>
    %c0_180 = arith.constant 0 : index
    %c0_181 = arith.constant 0 : index
    %541 = vector.load %arg9[%c0_180, %c0_181] : memref<1x128xf32, #tpu.memory_space<vmem>>, vector<1x128xf32>
    %542 = vector.broadcast %541 : vector<1x128xf32> to vector<2x128xf32>
    %543 = arith.addf %540, %542 : vector<2x128xf32>
    %cst_182 = arith.constant 0.000000e+00 : f32
    %544 = vector.broadcast %cst_182 : f32 to vector<2x128xf32>
    %545 = arith.maximumf %543, %544 : vector<2x128xf32>
    %c0_183 = arith.constant 0 : index
    %c0_184 = arith.constant 0 : index
    %546 = vector.load %arg10[%c0_183, %c0_184] : memref<128x4xf32, #tpu.memory_space<vmem>>, vector<128x4xf32>
    %cst_185 = arith.constant dense<0.000000e+00> : vector<2x4xf32>
    %547 = tpu.matmul %545, %546, %cst_185 {dimension_numbers = #tpu.dot_dimension_numbers<[1], [0], [0], [1], [0, 0, 1, 1], [], []>} : vector<2x128xf32>, vector<128x4xf32>, vector<2x4xf32> -> vector<2x4xf32>
    %c0_186 = arith.constant 0 : index
    %c0_187 = arith.constant 0 : index
    %548 = vector.load %arg11[%c0_186, %c0_187] : memref<1x4xf32, #tpu.memory_space<vmem>>, vector<1x4xf32>
    %549 = vector.broadcast %548 : vector<1x4xf32> to vector<2x4xf32>
    %550 = arith.addf %547, %549 : vector<2x4xf32>
    %c0_188 = arith.constant 0 : index
    %c0_189 = arith.constant 0 : index
    %551 = vector.load %arg12[%c0_188, %c0_189] : memref<2x4xf32, #tpu.memory_space<vmem>>, vector<2x4xf32>
    tpu.vector_store %arg12[%c0_188, %c0_189], %550 {strides = array<i32>} : memref<2x4xf32, #tpu.memory_space<vmem>>, vector<2x4xf32>,
    return
  }
}

</mosaic_0001>

<bundles_post_ra>
// kernel: lstm_emotion_classifier.1
= control target key start
LH: loop header
LB: loop body
LE: loop exit
PB: predicated region body
PF: predicated region fallthrough
CT: control target
= control target key end

     0   :  { %v7739_v6 = vmov 0   ;;  %vm140_vm0 = vcmask 130048   ;;  %s7721_s0 = inlined_call_operand.vmem [shape: bf16[16,16], index: 0, kind: input, shape index: {}]   ;;  %s7722_s1 = inlined_call_operand.vmem [shape: bf16[16,1024], index: 1, kind: input, shape index: {}]   ;;  %s7723_s2 = inlined_call_operand.vmem [shape: bf16[128,512], index: 2, kind: input, shape index: {}]   ;;  %s7724_s3 = inlined_call_operand.vmem [shape: bf16[128,512], index: 3, kind: input, shape index: {}]   ;;  %s7725_s4 = inlined_call_operand.vmem [shape: f32[1,1024], index: 4, kind: input, shape index: {}]   ;;  %s7726_s5 = inlined_call_operand.vmem [shape: bf16[256,1024], index: 5, kind: input, shape index: {}]   ;;  %s7727_s6 = inlined_call_operand.vmem [shape: bf16[128,512], index: 6, kind: input, shape index: {}]   ;;  %s7728_s7 = inlined_call_operand.vmem [shape: f32[1,1024], index: 7, kind: input, shape index: {}]   ;;  %s7729_s8 = inlined_call_operand.vmem [shape: f32[256,128], index: 8, kind: input, shape index: {}]   ;;  %s7730_s9 = inlined_call_operand.vmem [shape: f32[1,128], index: 9, kind: input, shape index: {}]   ;;  %s7731_s10 = inlined_call_operand.vmem [shape: f32[128,4], index: 10, kind: input, shape index: {}]   ;;  %s7732_s11 = inlined_call_operand.vmem [shape: f32[1,4], index: 11, kind: input, shape index: {}]   ;;  %s7733_s12 = inlined_call_operand.hbm [shape: f32[2,4], index: 12, kind: output, shape index: {}]  }
   0x1   :  { %v45_v0 = vld [vmem:[%s7722_s1] sm:$0xff]  ;;  %v46_v2 = vld [vmem:[%s7722_s1 + $0x8] sm:$0xff]  ;;  %176 = vmatprep.mubr.bf16.mxu0 %v7739_v6  ;;  %219 = vmatprep.mubr.bf16.mxu1 %v7739_v6  ;;  %v47_v9 = vld [vmem:[%s7722_s1 + $0x10] sm:$0xff] }
   0x2   :  { %v49_v1 = vld [vmem:[%s7722_s1 + $0x20] sm:$0xff]  ;;  %v50_v4 = vld [vmem:[%s7722_s1 + $0x28] sm:$0xff]  ;;  %v51_v10 = vld [vmem:[%s7722_s1 + $0x30] sm:$0xff] }
   0x3   :  { %v4423_v3 = vcombine.high %v45_v0, %v49_v1  ;;  %v4422_v5 = vcombine.low %v45_v0, %v49_v1  ;;  %v4425_v7 = vcombine.high %v46_v2, %v50_v4  ;;  %v4424_v8 = vcombine.low %v46_v2, %v50_v4  ;;  %v4751_v11 = vld [vmem:[%s7721_s0] sm:$0xff]   ;;  %v48_v13 = vld [vmem:[%s7722_s1 + $0x18] sm:$0xff] }
   0x4   :  { %v4427_v12 = vcombine.high %v47_v9, %v51_v10  ;;  %v52_v14 = vld [vmem:[%s7722_s1 + $0x38] sm:$0xff]  ;;  %v4426_v15 = vcombine.low %v47_v9, %v51_v10 }
   0x5   :  { %158 = vmatprep.subr.bf16.mxu0 %v4423_v3  ;;  %201 = vmatprep.subr.bf16.mxu1 %v4425_v7  ;;  %v4429_v16 = vcombine.high %v48_v13, %v52_v14  ;;  %v4428_v17 = vcombine.low %v48_v13, %v52_v14 }
   0x6   :  { %159 = vmatpush1.bf16.msra.mxu0 %v4422_v5  ;;  %202 = vmatpush1.bf16.msra.mxu1 %v4424_v8 }
   0x7   :  { %244 = vmatprep.subr.bf16.mxu0 %v4427_v12  ;;  %287 = vmatprep.subr.bf16.mxu1 %v4429_v16 }
   0x9   :  { %4430 = vmatmul.mubr.msk.bf16.vlgmr.msra.gmra.mxu0 %vm140_vm0, %v4751_v11  ;;  %4431 = vmatmul.mubr.msk.bf16.vlgmr.msra.gmra.mxu1 %vm140_vm0, %v4751_v11 }
   0xa   :  { %245 = vmatpush1.bf16.msra.mxu0 %v4426_v15  ;;  %288 = vmatpush1.bf16.msra.mxu1 %v4428_v17 }
   0xb   :  { %262 = vmatprep.mubr.bf16.mxu0 %v7739_v6  ;;  %305 = vmatprep.mubr.bf16.mxu1 %v7739_v6 }
  0x11   :  { %4432 = vmatmul.mubr.msk.bf16.vlgmr.msra.gmra.mxu0 %vm140_vm0, %v4751_v11  ;;  %4433 = vmatmul.mubr.msk.bf16.vlgmr.msra.gmra.mxu1 %vm140_vm0, %v4751_v11 }
  0x12   :  { %617 = vmatprep.mubr.bf16.mxu0 %v7739_v6  ;;  %658 = vmatprep.mubr.bf16.mxu1 %v7739_v6 }
  0x13   :  { %17 = vsyncpa [#allocation3], 0  ;;  %v5257_v18 = vld [vmem:[%s7723_s2 + $0xe4] ss:$16 sps:$4 sm:$0xff]   ;;  %v5262_v19 = vld [vmem:[%s7723_s2 + $0xec] ss:$16 sps:$4 sm:$0xff]   ;;  %v55_v52 = vlaneseq }
  0x14   :  { %v5267_v20 = vld [vmem:[%s7723_s2 + $0xe0] ss:$16 sps:$4 sm:$0xff]   ;;  %v5272_v21 = vld [vmem:[%s7723_s2 + $0xe8] ss:$16 sps:$4 sm:$0xff]   ;;  %585 = vmatprep.subr.bf16.mxu0 %v5257_v18  ;;  %626 = vmatprep.subr.bf16.mxu1 %v5262_v19  ;;  %v5281_v22 = vld [vmem:[%s7723_s2 + $0xc4] ss:$16 sps:$4 sm:$0xff]  }
  0x15   :  { %7899 = vst [vmem:[#allocation5_spill] sm:$0xff] %v5267_v20  ;;  %7900 = vst [vmem:[#allocation6_spill] sm:$0xff] %v5272_v21  ;;  %586 = vmatpush1.bf16.msra.mxu0 %v5267_v20  ;;  %627 = vmatpush1.bf16.msra.mxu1 %v5272_v21  ;;  %v5286_v23 = vld [vmem:[%s7723_s2 + $0xcc] ss:$16 sps:$4 sm:$0xff]   ;;  %v5291_v24 = vld [vmem:[%s7723_s2 + $0xc0] ss:$16 sps:$4 sm:$0xff]  }
  0x16   :  { %7901 = vst [vmem:[#allocation7_spill] sm:$0xff] %v5281_v22  ;;  %7902 = vst [vmem:[#allocation8_spill] sm:$0xff] %v5286_v23  ;;  %v5296_v25 = vld [vmem:[%s7723_s2 + $0xc8] ss:$16 sps:$4 sm:$0xff]   ;;  %587 = vmatprep.subr.bf16.mxu0 %v5281_v22  ;;  %628 = vmatprep.subr.bf16.mxu1 %v5286_v23  ;;  %v5305_v26 = vld [vmem:[%s7723_s2 + $0xa4] ss:$16 sps:$4 sm:$0xff]  }
  0x17   :  { %7903 = vst [vmem:[#allocation9_spill] sm:$0xff] %v5291_v24  ;;  %7904 = vst [vmem:[#allocation10_spill] sm:$0xff] %v5296_v25  ;;  %v5310_v27 = vld [vmem:[%s7723_s2 + $0xac] ss:$16 sps:$4 sm:$0xff]   ;;  %v5315_v28 = vld [vmem:[%s7723_s2 + $0xa0] ss:$16 sps:$4 sm:$0xff]  }
  0x18   :  { %7905 = vst [vmem:[#allocation11_spill] sm:$0xff] %v5305_v26  ;;  %7906 = vst [vmem:[#allocation12_spill] sm:$0xff] %v5310_v27  ;;  %v5320_v29 = vld [vmem:[%s7723_s2 + $0xa8] ss:$16 sps:$4 sm:$0xff]   ;;  %v5329_v30 = vld [vmem:[%s7723_s2 + $0x84] ss:$16 sps:$4 sm:$0xff]  }
  0x19   :  { %588 = vmatpush1.bf16.msra.mxu0 %v5291_v24  ;;  %629 = vmatpush1.bf16.msra.mxu1 %v5296_v25  ;;  %7907 = vst [vmem:[#allocation13_spill] sm:$0xff] %v5315_v28  ;;  %7908 = vst [vmem:[#allocation14_spill] sm:$0xff] %v5320_v29  ;;  %v5334_v31 = vld [vmem:[%s7723_s2 + $0x8c] ss:$16 sps:$4 sm:$0xff]   ;;  %v5339_v32 = vld [vmem:[%s7723_s2 + $0x80] ss:$16 sps:$4 sm:$0xff]  }
  0x1a   :  { %589 = vmatprep.subr.bf16.mxu0 %v5305_v26  ;;  %630 = vmatprep.subr.bf16.mxu1 %v5310_v27  ;;  %7909 = vst [vmem:[#allocation15_spill] sm:$0xff] %v5329_v30  ;;  %7910 = vst [vmem:[#allocation16_spill] sm:$0xff] %v5334_v31  ;;  %v5344_v33 = vld [vmem:[%s7723_s2 + $0x88] ss:$16 sps:$4 sm:$0xff]   ;;  %v5353_v34 = vld [vmem:[%s7723_s2 + $0x64] ss:$16 sps:$4 sm:$0xff]  }
  0x1b   :  { %7911 = vst [vmem:[#allocation17_spill] sm:$0xff] %v5339_v32  ;;  %7912 = vst [vmem:[#allocation18_spill] sm:$0xff] %v5344_v33  ;;  %v5358_v35 = vld [vmem:[%s7723_s2 + $0x6c] ss:$16 sps:$4 sm:$0xff]   ;;  %v5363_v36 = vld [vmem:[%s7723_s2 + $0x60] ss:$16 sps:$4 sm:$0xff]  }
  0x1c   :  { %7913 = vst [vmem:[#allocation19_spill] sm:$0xff] %v5353_v34  ;;  %7914 = vst [vmem:[#allocation20_spill] sm:$0xff] %v5358_v35  ;;  %v5368_v37 = vld [vmem:[%s7723_s2 + $0x68] ss:$16 sps:$4 sm:$0xff]   ;;  %v5373_v38 = vld [vmem:[%s7723_s2 + $0x44] ss:$16 sps:$4 sm:$0xff]  }
  0x1d   :  { %590 = vmatpush1.bf16.msra.mxu0 %v5315_v28  ;;  %631 = vmatpush1.bf16.msra.mxu1 %v5320_v29  ;;  %7915 = vst [vmem:[#allocation21_spill] sm:$0xff] %v5363_v36  ;;  %7916 = vst [vmem:[#allocation22_spill] sm:$0xff] %v5368_v37  ;;  %v5378_v39 = vld [vmem:[%s7723_s2 + $0x4c] ss:$16 sps:$4 sm:$0xff]   ;;  %v5387_v40 = vld [vmem:[%s7723_s2 + $0x40] ss:$16 sps:$4 sm:$0xff]  }
  0x1e   :  { %591 = vmatprep.subr.bf16.mxu0 %v5329_v30  ;;  %632 = vmatprep.subr.bf16.mxu1 %v5334_v31  ;;  %7917 = vst [vmem:[#allocation23_spill] sm:$0xff] %v5373_v38  ;;  %7918 = vst [vmem:[#allocation24_spill] sm:$0xff] %v5378_v39  ;;  %v5392_v41 = vld [vmem:[%s7723_s2 + $0x48] ss:$16 sps:$4 sm:$0xff]   ;;  %v5399_v42 = vld [vmem:[%s7723_s2 + $0x24] ss:$16 sps:$4 sm:$0xff]  }
  0x1f   :  { %7919 = vst [vmem:[#allocation25_spill] sm:$0xff] %v5387_v40  ;;  %7920 = vst [vmem:[#allocation26_spill] sm:$0xff] %v5392_v41  ;;  %v5404_v43 = vld [vmem:[%s7723_s2 + $0x2c] ss:$16 sps:$4 sm:$0xff]   ;;  %v5411_v44 = vld [vmem:[%s7723_s2 + $0x20] ss:$16 sps:$4 sm:$0xff]  }
  0x20   :  { %7921 = vst [vmem:[#allocation27_spill] sm:$0xff] %v5399_v42  ;;  %7922 = vst [vmem:[#allocation28_spill] sm:$0xff] %v5404_v43  ;;  %v5416_v45 = vld [vmem:[%s7723_s2 + $0x28] ss:$16 sps:$4 sm:$0xff]   ;;  %v5423_v46 = vld [vmem:[%s7723_s2 + $0x4] ss:$16 sps:$4 sm:$0xff]  }
  0x21   :  { %592 = vmatpush1.bf16.msra.mxu0 %v5339_v32  ;;  %633 = vmatpush1.bf16.msra.mxu1 %v5344_v33  ;;  %7923 = vst [vmem:[#allocation29_spill] sm:$0xff] %v5411_v44  ;;  %7924 = vst [vmem:[#allocation30_spill] sm:$0xff] %v5416_v45  ;;  %v5428_v47 = vld [vmem:[%s7723_s2 + $0xc] ss:$16 sps:$4 sm:$0xff]   ;;  %v5435_v48 = vld [vmem:[%s7723_s2] ss:$16 sps:$4 sm:$0xff]  }
  0x22   :  { %593 = vmatprep.subr.bf16.mxu0 %v5353_v34  ;;  %634 = vmatprep.subr.bf16.mxu1 %v5358_v35  ;;  %7925 = vst [vmem:[#allocation31_spill] sm:$0xff] %v5423_v46  ;;  %7926 = vst [vmem:[#allocation32_spill] sm:$0xff] %v5428_v47  ;;  %v5440_v49 = vld [vmem:[%s7723_s2 + $0x8] ss:$16 sps:$4 sm:$0xff]   ;;  %v5447_v50 = vld [vmem:[%s7724_s3 + $0xe4] ss:$16 sps:$4 sm:$0xff]  }
  0x23   :  { %7927 = vst [vmem:[#allocation33_spill] sm:$0xff] %v5435_v48  ;;  %7928 = vst [vmem:[#allocation34_spill] sm:$0xff] %v5440_v49  ;;  %v5452_v51 = vld [vmem:[%s7724_s3 + $0xec] ss:$16 sps:$4 sm:$0xff]   ;;  %v5458_v53 = vshrl.u32 %v55_v52, 7  ;;  %v53_v56 = vld [vmem:[%s7725_s4] sm:$0xff] }
  0x24   :  { %7929 = vst [vmem:[#allocation35_spill] sm:$0xff] %v5447_v50  ;;  %7930 = vst [vmem:[#allocation36_spill] sm:$0xff] %v5452_v51  ;;  %vm328_vm1 = vcmask 1041408   ;;  %vm2236_vm2 = vcmask 1043456   ;;  %vm2238_vm3 = vcmask 1045504   ;;  %vm5154_vm4 = vmmov 0  }
  0x25   :  { %594 = vmatpush1.bf16.msra.mxu0 %v5363_v36  ;;  %635 = vmatpush1.bf16.msra.mxu1 %v5368_v37  ;;  %7931 = vst [vmem:[#allocation37_spill] sm:$0xff] %v5458_v53  ;;  %v7735_v54 = vsub.s32 2, %v5458_v53  ;;  %v7738_v55 = vsub.s32 0, %v5458_v53  ;;  %v7734_v58 = vsub.s32 3, %v5458_v53  ;;  %v7737_v60 = vsub.s32 1, %v5458_v53  ;;  %s5155_s18 = smov [#allocation2]  }
  0x26   :  { %595 = vmatprep.subr.bf16.mxu0 %v5373_v38  ;;  %636 = vmatprep.subr.bf16.mxu1 %v5378_v39  ;;  %v7736_v61 = vsub.s32 4, %v5458_v53  ;;  %v7741_v2 = vsub.s32 5, %v5458_v53  ;;  %v7743_v5 = vsub.s32 6, %v5458_v53  ;;  %v7746_v7 = vsub.s32 7, %v5458_v53 }
  0x27   :  { %v66_v62 = vrot.slane %v53_v56, %v7735_v54  ;;  %v58_v0 = vrot.slane %v53_v56, %v7738_v55  ;;  %v70_v3 = vrot.slane %v53_v56, %v7734_v58  ;;  %v62_v8 = vrot.slane %v53_v56, %v7737_v60 }
  0x28   :  { %v74_v11 = vrot.slane %v53_v56, %v7736_v61  ;;  %v78_v16 = vrot.slane %v53_v56, %v7741_v2  ;;  %v86_v58 = vrot.slane %v53_v56, %v7746_v7  ;;  %vm4405_vm5 = vcmask 25600  }
  0x29   :  { %596 = vmatpush1.bf16.msra.mxu0 %v5387_v40  ;;  %637 = vmatpush1.bf16.msra.mxu1 %v5392_v41 }
  0x2a   :  { %597 = vmatprep.subr.bf16.mxu0 %v5399_v42  ;;  %638 = vmatprep.subr.bf16.mxu1 %v5404_v43 }
  0x2d   :  { %598 = vmatpush1.bf16.msra.mxu0 %v5411_v44  ;;  %639 = vmatpush1.bf16.msra.mxu1 %v5416_v45 }
  0x2e   :  { %599 = vmatprep.subr.bf16.mxu0 %v5423_v46  ;;  %640 = vmatprep.subr.bf16.mxu1 %v5428_v47 }
  0x31   :  { %600 = vmatpush1.bf16.msra.mxu0 %v5435_v48  ;;  %641 = vmatpush1.bf16.msra.mxu1 %v5440_v49 }
  0x32   :  { %830 = vmatprep.subr.bf16.mxu0 %v5447_v50  ;;  %871 = vmatprep.subr.bf16.mxu1 %v5452_v51 }
  0xc9   :  { %v178_v57 = vpop.f32.mrf.mxu0  ;;  %v221_v59 = vpop.f32.mrf.mxu1 }
  0xcb   :  { %v180_v63 = vpop.f32.mrf.mxu0  ;;  %v223_v1 = vpop.f32.mrf.mxu1 }
  0xcc   :  { %v5512_v7 = vadd.f32 %v180_v63, %v62_v8 }
  0xcd   :  { %v182_v4 = vpop.f32.mrf.mxu0  ;;  %v225_v10 = vpop.f32.mrf.mxu1 }
  0xce   :  { %v5479_v9 = vadd.f32 %v182_v4, %v58_v0  ;;  %v5483_v12 = vadd.f32 %v225_v10, %v66_v62  ;;  %v82_v4 = vrot.slane %v53_v56, %v7743_v5  ;;  %v5507_v56 = vadd.f32 %v178_v57, %v58_v0  ;;  %7944 = vst [vmem:[#allocation50_spill] sm:$0xff] %v5512_v7 }
  0xcf   :  { %v184_v13 = vpop.f32.mrf.mxu0  ;;  %v227_v15 = vpop.f32.mrf.mxu1 }
  0xd0   :  { %7932 = vst [vmem:[#allocation38_spill] sm:$0xff] %v5479_v9  ;;  %7933 = vst [vmem:[#allocation39_spill] sm:$0xff] %v5483_v12  ;;  %v5485_v14 = vadd.f32 %v184_v13, %v62_v8  ;;  %v5489_v17 = vadd.f32 %v227_v15, %v70_v3  ;;  %v5637_v9 = vld [vmem:[%s7724_s3 + $0x64] ss:$16 sps:$4 sm:$0xff]  }
  0xd1   :  { %v264_v52 = vpop.f32.mrf.mxu0  ;;  %v307_v10 = vpop.f32.mrf.mxu1  ;;  %7942 = vst [vmem:[#allocation48_spill] sm:$0xff] %v5507_v56  ;;  %7949 = vst [vmem:[#allocation54_spill] sm:$0xff] %v5637_v9 }
  0xd2   :  { %7934 = vst [vmem:[#allocation40_spill] sm:$0xff] %v5485_v14  ;;  %7935 = vst [vmem:[#allocation41_spill] sm:$0xff] %v5489_v17  ;;  %v5495_v54 = vadd.f32 %v264_v52, %v74_v11  ;;  %v5497_v61 = vadd.f32 %v307_v10, %v82_v4  ;;  %v5630_v14 = vld [vmem:[%s7724_s3 + $0x88] ss:$16 sps:$4 sm:$0xff]  }
  0xd3   :  { %v266_v13 = vpop.f32.mrf.mxu0  ;;  %v309_v55 = vpop.f32.mrf.mxu1  ;;  %7948 = vst [vmem:[#allocation53_spill] sm:$0xff] %v5630_v14 }
  0xd4   :  { %7936 = vst [vmem:[#allocation42_spill] sm:$0xff] %v5495_v54  ;;  %7937 = vst [vmem:[#allocation43_spill] sm:$0xff] %v5497_v61  ;;  %v5499_v60 = vadd.f32 %v266_v13, %v78_v16  ;;  %v5501_v6 = vadd.f32 %v309_v55, %v86_v58  ;;  %v5649_v61 = vld [vmem:[%s7724_s3 + $0x60] ss:$16 sps:$4 sm:$0xff]   ;;  %v5654_v54 = vld [vmem:[%s7724_s3 + $0x68] ss:$16 sps:$4 sm:$0xff]  }
  0xd5   :  { %v268_v15 = vpop.f32.mrf.mxu0  ;;  %v311_v17 = vpop.f32.mrf.mxu1  ;;  %7951 = vst [vmem:[#allocation56_spill] sm:$0xff] %v5649_v61  ;;  %7952 = vst [vmem:[#allocation57_spill] sm:$0xff] %v5654_v54 }
  0xd6   :  { %7938 = vst [vmem:[#allocation44_spill] sm:$0xff] %v5499_v60  ;;  %7939 = vst [vmem:[#allocation45_spill] sm:$0xff] %v5501_v6  ;;  %v5503_v2 = vadd.f32 %v268_v15, %v74_v11  ;;  %v5505_v5 = vadd.f32 %v311_v17, %v82_v4  ;;  %v5520_v17 = vadd.f32 %v221_v59, %v66_v62  ;;  %v5642_v60 = vld [vmem:[%s7724_s3 + $0x6c] ss:$16 sps:$4 sm:$0xff]  }
  0xd7   :  { %v270_v53 = vpop.f32.mrf.mxu0  ;;  %v313_v57 = vpop.f32.mrf.mxu1  ;;  %7950 = vst [vmem:[#allocation55_spill] sm:$0xff] %v5642_v60 }
  0xd8   :  { %7940 = vst [vmem:[#allocation46_spill] sm:$0xff] %v5503_v2  ;;  %7941 = vst [vmem:[#allocation47_spill] sm:$0xff] %v5505_v5  ;;  %v7749_v52 = vrot.slane %v5503_v2, 4  ;;  %v5510_v10 = vadd.f32 %v270_v53, %v78_v16  ;;  %v7748_v11 = vrot.slane %v5505_v5, 4  ;;  %v5530_v0 = vadd.f32 %v313_v57, %v86_v58 }
  0xd9   :  { %7945 = vst [vmem:[#allocation51_spill] sm:$0xff] %v5520_v17  ;;  %v5533_v16 = vadd.f32 %v223_v1, %v70_v3 }
  0xda   :  { %7943 = vst [vmem:[#allocation49_spill] sm:$0xff] %v5510_v10  ;;  %v329_v55 = vsel %vm328_vm1, %v5507_v56, %v7749_v52  ;;  %v7747_v13 = vrot.slane %v5510_v10, 4  ;;  %v331_v63 = vsel %vm328_vm1, %v5520_v17, %v7748_v11  ;;  %v7752_v8 = vrot.slane %v5530_v0, 4 }
  0xdb   :  { %4896 = vtanh.f32 %v329_v55 }
  0xdc   :  { %v330_v53 = vsel %vm328_vm1, %v5512_v7, %v7747_v13  ;;  %v332_v62 = vsel %vm328_vm1, %v5533_v16, %v7752_v8  ;;  %v5625_v8 = vld [vmem:[%s7724_s3 + $0x80] ss:$16 sps:$4 sm:$0xff]  }
  0xdd   :  { %4898 = vtanh.f32 %v330_v53 }
  0xde   :  { %4900 = vtanh.f32 %v331_v63 }
  0xdf   :  { %4902 = vtanh.f32 %v332_v62  ;;  %v5561_v62 = vld [vmem:[%s7724_s3 + $0xc4] ss:$16 sps:$4 sm:$0xff]  }
  0xe8   :  { %v4897_v59 = vpop.eup %4896 }
  0xe9   :  { %v337_v4 = vmul.f32 0.5, %v4897_v59  ;;  %v5547_v59 = vld [vmem:[%s7724_s3 + $0xe0] ss:$16 sps:$4 sm:$0xff]  }
  0xea   :  { %v4899_v15 = vpop.eup %4898 }
  0xeb   :  { %v338_v55 = vadd.f32 0.5, %v337_v4  ;;  %v339_v53 = vmul.f32 0.5, %v4899_v15  ;;  %v4901_v11 = vpop.eup %4900  ;;  %v5580_v4 = vld [vmem:[%s7724_s3 + $0xc8] ss:$16 sps:$4 sm:$0xff]   ;;  %v5587_v15 = vld [vmem:[%s7724_s3 + $0xa4] ss:$16 sps:$4 sm:$0xff]  }
  0xec   :  { %v4903_v1 = vpop.eup %4902 }
  0xed   :  { %v340_v13 = vadd.f32 0.5, %v339_v53  ;;  %v344_v57 = vmul.f32 %v4901_v11, %v338_v55  ;;  %v341_v3 = vmul.f32 0.5, %v4903_v1  ;;  %v5592_v55 = vld [vmem:[%s7724_s3 + $0xac] ss:$16 sps:$4 sm:$0xff]   ;;  %v7947_v53 = vmov 0  }
  0xee   :  { %v5613_v1 = vld [vmem:[%s7724_s3 + $0x84] ss:$16 sps:$4 sm:$0xff]  }
  0xef   :  { %v343_v58 = vmul.f32 0.0, %v340_v13  ;;  %v342_v52 = vadd.f32 0.5, %v341_v3  ;;  %v5552_v13 = vld [vmem:[%s7724_s3 + $0xe8] ss:$16 sps:$4 sm:$0xff]   ;;  %v5618_v3 = vld [vmem:[%s7724_s3 + $0x8c] ss:$16 sps:$4 sm:$0xff]  }
  0xf1   :  { %v5539_v63 = vadd.f32 %v344_v57, %v343_v58  ;;  %v5601_v58 = vld [vmem:[%s7724_s3 + $0xa0] ss:$16 sps:$4 sm:$0xff]   ;;  %v5606_v57 = vld [vmem:[%s7724_s3 + $0xa8] ss:$16 sps:$4 sm:$0xff]  }
  0xf3   :  { %4904 = vtanh.f32 %v5539_v63 }
 0x100   :  { %v4905_v6 = vpop.eup %4904 }
 0x101   :  { %v5542_v12 = vmul.f32 %v4905_v6, %v342_v52  ;;  %v5566_v6 = vld [vmem:[%s7724_s3 + $0xcc] ss:$16 sps:$4 sm:$0xff]   ;;  %v5575_v52 = vld [vmem:[%s7724_s3 + $0xc0] ss:$16 sps:$4 sm:$0xff]  }
 0x103   :  { %7946 = vst [vmem:[#allocation52_spill] sm:$0xff] %v5542_v12  ;;  %v5556_v11 = vpack.c.bf16 %v5542_v12, %v5542_v12  ;;  %v5661_v12 = vld [vmem:[%s7724_s3 + $0x44] ss:$16 sps:$4 sm:$0xff]  }
 0x104   :  { %7953 = vst [vmem:[#allocation58_spill] sm:$0xff] %v5661_v12 }
 0x105   :  { %618 = vmatmul.mubr.bf16.vlgmr.msra.gmra.mxu0 %v5556_v11  ;;  %659 = vmatmul.mubr.bf16.vlgmr.msra.gmra.mxu1 %v5556_v11 }
 0x106   :  { %831 = vmatpush1.bf16.msra.mxu0 %v5547_v59  ;;  %872 = vmatpush1.bf16.msra.mxu1 %v5552_v13 }
 0x107   :  { %832 = vmatprep.subr.bf16.mxu0 %v5561_v62  ;;  %873 = vmatprep.subr.bf16.mxu1 %v5566_v6 }
 0x108   :  { %862 = vmatprep.mubr.bf16.mxu0 %v7947_v53  ;;  %903 = vmatprep.mubr.bf16.mxu1 %v7947_v53 }
 0x10a   :  { %833 = vmatpush1.bf16.msra.mxu0 %v5575_v52  ;;  %874 = vmatpush1.bf16.msra.mxu1 %v5580_v4 }
 0x10b   :  { %834 = vmatprep.subr.bf16.mxu0 %v5587_v15  ;;  %875 = vmatprep.subr.bf16.mxu1 %v5592_v55 }
 0x10e   :  { %835 = vmatpush1.bf16.msra.mxu0 %v5601_v58  ;;  %876 = vmatpush1.bf16.msra.mxu1 %v5606_v57 }
 0x10f   :  { %836 = vmatprep.subr.bf16.mxu0 %v5613_v1  ;;  %877 = vmatprep.subr.bf16.mxu1 %v5618_v3 }
 0x112   :  { %837 = vmatpush1.bf16.msra.mxu0 %v5625_v8  ;;  %878 = vmatpush1.bf16.msra.mxu1 %v5630_v14  ;;  %v5666_v14 = vld [vmem:[%s7724_s3 + $0x4c] ss:$16 sps:$4 sm:$0xff]  }
 0x113   :  { %838 = vmatprep.subr.bf16.mxu0 %v5637_v9  ;;  %879 = vmatprep.subr.bf16.mxu1 %v5642_v60  ;;  %7954 = vst [vmem:[#allocation59_spill] sm:$0xff] %v5666_v14  ;;  %v5673_v9 = vld [vmem:[%s7724_s3 + $0x40] ss:$16 sps:$4 sm:$0xff]   ;;  %v5678_v60 = vld [vmem:[%s7724_s3 + $0x48] ss:$16 sps:$4 sm:$0xff]  }
 0x114   :  { %7955 = vst [vmem:[#allocation60_spill] sm:$0xff] %v5673_v9  ;;  %7956 = vst [vmem:[#allocation61_spill] sm:$0xff] %v5678_v60 }
 0x116   :  { %839 = vmatpush1.bf16.msra.mxu0 %v5649_v61  ;;  %880 = vmatpush1.bf16.msra.mxu1 %v5654_v54  ;;  %v5685_v61 = vld [vmem:[%s7724_s3 + $0x24] ss:$16 sps:$4 sm:$0xff]   ;;  %v5690_v54 = vld [vmem:[%s7724_s3 + $0x2c] ss:$16 sps:$4 sm:$0xff]  }
 0x117   :  { %840 = vmatprep.subr.bf16.mxu0 %v5661_v12  ;;  %881 = vmatprep.subr.bf16.mxu1 %v5666_v14  ;;  %7957 = vst [vmem:[#allocation62_spill] sm:$0xff] %v5685_v61  ;;  %7958 = vst [vmem:[#allocation63_spill] sm:$0xff] %v5690_v54  ;;  %v5697_v12 = vld [vmem:[%s7724_s3 + $0x20] ss:$16 sps:$4 sm:$0xff]   ;;  %v5702_v14 = vld [vmem:[%s7724_s3 + $0x28] ss:$16 sps:$4 sm:$0xff]  }
 0x118   :  { %7959 = vst [vmem:[#allocation64_spill] sm:$0xff] %v5702_v14 }
 0x11a   :  { %841 = vmatpush1.bf16.msra.mxu0 %v5673_v9  ;;  %882 = vmatpush1.bf16.msra.mxu1 %v5678_v60  ;;  %v5709_v9 = vld [vmem:[%s7724_s3 + $0x4] ss:$16 sps:$4 sm:$0xff]   ;;  %v5714_v60 = vld [vmem:[%s7724_s3 + $0xc] ss:$16 sps:$4 sm:$0xff]  }
 0x11b   :  { %842 = vmatprep.subr.bf16.mxu0 %v5685_v61  ;;  %883 = vmatprep.subr.bf16.mxu1 %v5690_v54  ;;  %v5721_v61 = vld [vmem:[%s7724_s3] ss:$16 sps:$4 sm:$0xff]   ;;  %v5726_v54 = vld [vmem:[%s7724_s3 + $0x8] ss:$16 sps:$4 sm:$0xff]  }
 0x11e   :  { %843 = vmatpush1.bf16.msra.mxu0 %v5697_v12  ;;  %884 = vmatpush1.bf16.msra.mxu1 %v5702_v14  ;;  %v668_v14 = vrot.slane %v5556_v11, 1 }
 0x11f   :  { %844 = vmatprep.subr.bf16.mxu0 %v5709_v9  ;;  %885 = vmatprep.subr.bf16.mxu1 %v5714_v60 }
 0x122   :  { %845 = vmatpush1.bf16.msra.mxu0 %v5721_v61  ;;  %886 = vmatpush1.bf16.msra.mxu1 %v5726_v54 }
 0x123   :  { %952 = vmatprep.subr.bf16.mxu0 %v5257_v18  ;;  %993 = vmatprep.subr.bf16.mxu1 %v5262_v19 }
 0x125   :  { %863 = vmatmul.mubr.bf16.vlgmr.msra.gmra.mxu0 %v668_v14  ;;  %904 = vmatmul.mubr.bf16.vlgmr.msra.gmra.mxu1 %v668_v14 }
 0x126   :  { %953 = vmatpush1.bf16.msra.mxu0 %v5267_v20  ;;  %994 = vmatpush1.bf16.msra.mxu1 %v5272_v21 }
 0x127   :  { %954 = vmatprep.subr.bf16.mxu0 %v5281_v22  ;;  %995 = vmatprep.subr.bf16.mxu1 %v5286_v23 }
 0x128   :  { %984 = vmatprep.mubr.bf16.mxu0 %v7947_v53  ;;  %1025 = vmatprep.mubr.bf16.mxu1 %v7947_v53 }
 0x12a   :  { %955 = vmatpush1.bf16.msra.mxu0 %v5291_v24  ;;  %996 = vmatpush1.bf16.msra.mxu1 %v5296_v25 }
 0x12b   :  { %956 = vmatprep.subr.bf16.mxu0 %v5305_v26  ;;  %997 = vmatprep.subr.bf16.mxu1 %v5310_v27 }
 0x12e   :  { %957 = vmatpush1.bf16.msra.mxu0 %v5315_v28  ;;  %998 = vmatpush1.bf16.msra.mxu1 %v5320_v29 }
 0x12f   :  { %958 = vmatprep.subr.bf16.mxu0 %v5329_v30  ;;  %999 = vmatprep.subr.bf16.mxu1 %v5334_v31 }
 0x132   :  { %959 = vmatpush1.bf16.msra.mxu0 %v5339_v32  ;;  %1000 = vmatpush1.bf16.msra.mxu1 %v5344_v33 }
 0x133   :  { %960 = vmatprep.subr.bf16.mxu0 %v5353_v34  ;;  %1001 = vmatprep.subr.bf16.mxu1 %v5358_v35 }
 0x136   :  { %961 = vmatpush1.bf16.msra.mxu0 %v5363_v36  ;;  %1002 = vmatpush1.bf16.msra.mxu1 %v5368_v37  ;;  %v578_v37 = vrot.slane %v5512_v7, 2 }
 0x137   :  { %962 = vmatprep.subr.bf16.mxu0 %v5373_v38  ;;  %1003 = vmatprep.subr.bf16.mxu1 %v5378_v39 }
 0x13a   :  { %963 = vmatpush1.bf16.msra.mxu0 %v5387_v40  ;;  %1004 = vmatpush1.bf16.msra.mxu1 %v5392_v41 }
 0x13b   :  { %964 = vmatprep.subr.bf16.mxu0 %v5399_v42  ;;  %1005 = vmatprep.subr.bf16.mxu1 %v5404_v43 }
 0x13e   :  { %965 = vmatpush1.bf16.msra.mxu0 %v5411_v44  ;;  %1006 = vmatpush1.bf16.msra.mxu1 %v5416_v45 }
 0x13f   :  { %966 = vmatprep.subr.bf16.mxu0 %v5423_v46  ;;  %1007 = vmatprep.subr.bf16.mxu1 %v5428_v47  ;;  %v577_v47 = vrot.slane %v5507_v56, 2 }
 0x142   :  { %967 = vmatpush1.bf16.msra.mxu0 %v5435_v48  ;;  %1008 = vmatpush1.bf16.msra.mxu1 %v5440_v49  ;;  %v7960_v48 = vrot.slane %v5503_v2, 4  ;;  %v7961_v49 = vrot.slane %v5505_v5, 4 }
 0x143   :  { %1045 = vmatprep.subr.bf16.mxu0 %v5447_v50  ;;  %1086 = vmatprep.subr.bf16.mxu1 %v5452_v51  ;;  %v579_v51 = vrot.slane %v5520_v17, 2 }
 0x1c5   :  { %v619_v14 = vpop.f32.mrf.mxu0  ;;  %v660_v11 = vpop.f32.mrf.mxu1 }
 0x1c6   :  { %v661_v32 = vadd.f32 %v660_v11, %v579_v51 }
 0x1c7   :  { %v621_v42 = vpop.f32.mrf.mxu0  ;;  %v662_v43 = vpop.f32.mrf.mxu1 }
 0x1c8   :  { %v622_v2 = vadd.f32 %v621_v42, %v578_v37 }
 0x1c9   :  { %v623_v41 = vpop.f32.mrf.mxu0  ;;  %v664_v44 = vpop.f32.mrf.mxu1 }
 0x1ca   :  { %v620_v41 = vadd.f32 %v619_v14, %v577_v47 }
 0x1cb   :  { %v624_v40 = vpop.f32.mrf.mxu0  ;;  %v665_v45 = vpop.f32.mrf.mxu1 }
 0x1cc   :  { %v7962_v45 = vrot.slane %v5510_v10, 4 }
 0x1e5   :  { %v864_v39 = vpop.f32.mrf.mxu0  ;;  %v905_v46 = vpop.f32.mrf.mxu1 }
 0x1e6   :  { %v865_v38 = vadd.f32 %v864_v39, %v7960_v48  ;;  %v906_v50 = vadd.f32 %v905_v46, %v7961_v49 }
 0x1e7   :  { %v866_v36 = vpop.f32.mrf.mxu0  ;;  %v907_v35 = vpop.f32.mrf.mxu1 }
 0x1e8   :  { %v916_v44 = vrot.slane %v865_v38, 6  ;;  %v918_v40 = vrot.slane %v906_v50, 6  ;;  %v867_v34 = vadd.f32 %v866_v36, %v7962_v45  ;;  %v7963_v38 = vrot.slane %v5530_v0, 4 }
 0x1e9   :  { %v868_v33 = vpop.f32.mrf.mxu0  ;;  %v909_v56 = vpop.f32.mrf.mxu1 }
 0x1ea   :  { %v924_v39 = vsel %vm328_vm1, %v620_v41, %v916_v44  ;;  %v917_v48 = vrot.slane %v867_v34, 6  ;;  %v926_v7 = vsel %vm328_vm1, %v661_v32, %v918_v40  ;;  %v908_v47 = vadd.f32 %v907_v35, %v7963_v38  ;;  %v7970_v38 = vld [vmem:[#allocation58_spill] sm:$0xff] }
 0x1eb   :  { %4906 = vtanh.f32 %v924_v39  ;;  %v869_v46 = vpop.f32.mrf.mxu0  ;;  %v910_v49 = vpop.f32.mrf.mxu1  ;;  %v580_v33 = vrot.slane %v5533_v16, 2  ;;  %v7966_v39 = vld [vmem:[#allocation54_spill] sm:$0xff] }
 0x1ec   :  { %v925_v17 = vsel %vm328_vm1, %v622_v2, %v917_v48  ;;  %v919_v36 = vrot.slane %v908_v47, 6  ;;  %v7967_v48 = vld [vmem:[#allocation55_spill] sm:$0xff]  ;;  %v7968_v46 = vld [vmem:[#allocation56_spill] sm:$0xff]  ;;  %v7969_v49 = vld [vmem:[#allocation57_spill] sm:$0xff] }
 0x1ed   :  { %4908 = vtanh.f32 %v925_v17  ;;  %v663_v50 = vadd.f32 %v662_v43, %v580_v33  ;;  %v7971_v47 = vld [vmem:[#allocation59_spill] sm:$0xff]  ;;  %v7972_v33 = vld [vmem:[#allocation60_spill] sm:$0xff] }
 0x1ee   :  { %4910 = vtanh.f32 %v926_v7 }
 0x1ef   :  { %v927_v42 = vsel %vm328_vm1, %v663_v50, %v919_v36  ;;  %v7973_v36 = vld [vmem:[#allocation61_spill] sm:$0xff]  ;;  %v7974_v50 = vld [vmem:[#allocation62_spill] sm:$0xff] }
 0x1f0   :  { %4912 = vtanh.f32 %v927_v42  ;;  %v7976_v42 = vld [vmem:[#allocation64_spill] sm:$0xff] }
 0x1f8   :  { %v4907_v37 = vpop.eup %4906 }
 0x1f9   :  { %v932_v34 = vmul.f32 0.5, %v4907_v37  ;;  %v7975_v37 = vld [vmem:[#allocation63_spill] sm:$0xff] }
 0x1fa   :  { %v4909_v51 = vpop.eup %4908 }
 0x1fb   :  { %v933_v56 = vadd.f32 0.5, %v932_v34  ;;  %v934_v14 = vmul.f32 0.5, %v4909_v51  ;;  %v4911_v32 = vpop.eup %4910  ;;  %v7977_v51 = vld [vmem:[#allocation17_spill] sm:$0xff] }
 0x1fd   :  { %v935_v11 = vadd.f32 0.5, %v934_v14  ;;  %v939_v2 = vmul.f32 %v4911_v32, %v933_v56  ;;  %v4913_v35 = vpop.eup %4912  ;;  %v7978_v56 = vld [vmem:[#allocation18_spill] sm:$0xff]  ;;  %v7979_v14 = vld [vmem:[#allocation19_spill] sm:$0xff]  ;;  %v7980_v32 = vld [vmem:[#allocation20_spill] sm:$0xff] }
 0x1fe   :  { %v936_v41 = vmul.f32 0.5, %v4913_v35  ;;  %v7984_v35 = vld [vmem:[#allocation24_spill] sm:$0xff] }
 0x1ff   :  { %v938_v7 = vmul.f32 %v935_v11, %v5539_v63  ;;  %v7965_v63 = vld [vmem:[#allocation53_spill] sm:$0xff] }
 0x200   :  { %v937_v43 = vadd.f32 0.5, %v936_v41  ;;  %v7981_v11 = vld [vmem:[#allocation21_spill] sm:$0xff] }
 0x201   :  { %v5786_v17 = vadd.f32 %v939_v2, %v938_v7  ;;  %v7982_v2 = vld [vmem:[#allocation22_spill] sm:$0xff]  ;;  %v7983_v7 = vld [vmem:[#allocation23_spill] sm:$0xff]  ;;  %v7985_v41 = vld [vmem:[#allocation25_spill] sm:$0xff] }
 0x203   :  { %4914 = vtanh.f32 %v5786_v17 }
 0x210   :  { %v4915_v44 = vpop.eup %4914 }
 0x211   :  { %v5789_v40 = vmul.f32 %v4915_v44, %v937_v43  ;;  %v7986_v43 = vld [vmem:[#allocation26_spill] sm:$0xff]  ;;  %v7987_v44 = vld [vmem:[#allocation27_spill] sm:$0xff] }
 0x213   :  { %7964 = vst [vmem:[#allocation65_spill] sm:$0xff] %v5789_v40  ;;  %v943_v45 = vpack.c.bf16 %v5789_v40, %v5789_v40  ;;  %v7990_v40 = vld [vmem:[#allocation30_spill] sm:$0xff] }
 0x215   :  { %985 = vmatmul.mubr.bf16.vlgmr.msra.gmra.mxu0 %v943_v45  ;;  %1026 = vmatmul.mubr.bf16.vlgmr.msra.gmra.mxu1 %v943_v45  ;;  %v1035_v34 = vrot.slane %v943_v45, 1  ;;  %v7988_v45 = vld [vmem:[#allocation28_spill] sm:$0xff] }
 0x216   :  { %1046 = vmatpush1.bf16.msra.mxu0 %v5547_v59  ;;  %1087 = vmatpush1.bf16.msra.mxu1 %v5552_v13 }
 0x217   :  { %1047 = vmatprep.subr.bf16.mxu0 %v5561_v62  ;;  %1088 = vmatprep.subr.bf16.mxu1 %v5566_v6 }
 0x218   :  { %1077 = vmatprep.mubr.bf16.mxu0 %v7947_v53  ;;  %1118 = vmatprep.mubr.bf16.mxu1 %v7947_v53 }
 0x21a   :  { %1048 = vmatpush1.bf16.msra.mxu0 %v5575_v52  ;;  %1089 = vmatpush1.bf16.msra.mxu1 %v5580_v4 }
 0x21b   :  { %1049 = vmatprep.subr.bf16.mxu0 %v5587_v15  ;;  %1090 = vmatprep.subr.bf16.mxu1 %v5592_v55 }
 0x21e   :  { %1050 = vmatpush1.bf16.msra.mxu0 %v5601_v58  ;;  %1091 = vmatpush1.bf16.msra.mxu1 %v5606_v57 }
 0x21f   :  { %1051 = vmatprep.subr.bf16.mxu0 %v5613_v1  ;;  %1092 = vmatprep.subr.bf16.mxu1 %v5618_v3 }
 0x222   :  { %1052 = vmatpush1.bf16.msra.mxu0 %v5625_v8  ;;  %1093 = vmatpush1.bf16.msra.mxu1 %v7965_v63 }
 0x223   :  { %1053 = vmatprep.subr.bf16.mxu0 %v7966_v39  ;;  %1094 = vmatprep.subr.bf16.mxu1 %v7967_v48 }
 0x226   :  { %1054 = vmatpush1.bf16.msra.mxu0 %v7968_v46  ;;  %1095 = vmatpush1.bf16.msra.mxu1 %v7969_v49 }
 0x227   :  { %1055 = vmatprep.subr.bf16.mxu0 %v7970_v38  ;;  %1096 = vmatprep.subr.bf16.mxu1 %v7971_v47 }
 0x22a   :  { %1056 = vmatpush1.bf16.msra.mxu0 %v7972_v33  ;;  %1097 = vmatpush1.bf16.msra.mxu1 %v7973_v36 }
 0x22b   :  { %1057 = vmatprep.subr.bf16.mxu0 %v7974_v50  ;;  %1098 = vmatprep.subr.bf16.mxu1 %v7975_v37 }
 0x22e   :  { %1058 = vmatpush1.bf16.msra.mxu0 %v5697_v12  ;;  %1099 = vmatpush1.bf16.msra.mxu1 %v7976_v42 }
 0x22f   :  { %1059 = vmatprep.subr.bf16.mxu0 %v5709_v9  ;;  %1100 = vmatprep.subr.bf16.mxu1 %v5714_v60 }
 0x232   :  { %1060 = vmatpush1.bf16.msra.mxu0 %v5721_v61  ;;  %1101 = vmatpush1.bf16.msra.mxu1 %v5726_v54 }
 0x233   :  { %1167 = vmatprep.subr.bf16.mxu0 %v5257_v18  ;;  %1208 = vmatprep.subr.bf16.mxu1 %v5262_v19 }
 0x235   :  { %1078 = vmatmul.mubr.bf16.vlgmr.msra.gmra.mxu0 %v1035_v34  ;;  %1119 = vmatmul.mubr.bf16.vlgmr.msra.gmra.mxu1 %v1035_v34  ;;  %v7989_v34 = vld [vmem:[#allocation29_spill] sm:$0xff] }
 0x236   :  { %1168 = vmatpush1.bf16.msra.mxu0 %v5267_v20  ;;  %1209 = vmatpush1.bf16.msra.mxu1 %v5272_v21 }
 0x237   :  { %1169 = vmatprep.subr.bf16.mxu0 %v5281_v22  ;;  %1210 = vmatprep.subr.bf16.mxu1 %v5286_v23 }
 0x238   :  { %1199 = vmatprep.mubr.bf16.mxu0 %v7947_v53  ;;  %1240 = vmatprep.mubr.bf16.mxu1 %v7947_v53 }
 0x23a   :  { %1170 = vmatpush1.bf16.msra.mxu0 %v5291_v24  ;;  %1211 = vmatpush1.bf16.msra.mxu1 %v5296_v25  ;;  %v8000_v25 = vld [vmem:[#allocation50_spill] sm:$0xff] }
 0x23b   :  { %1171 = vmatprep.subr.bf16.mxu0 %v5305_v26  ;;  %1212 = vmatprep.subr.bf16.mxu1 %v5310_v27  ;;  %v7999_v27 = vld [vmem:[#allocation51_spill] sm:$0xff]  ;;  %v945_v24 = vrot.slane %v8000_v25, 4 }
 0x23c   :  { %v946_v26 = vrot.slane %v7999_v27, 4 }
 0x23e   :  { %1172 = vmatpush1.bf16.msra.mxu0 %v5315_v28  ;;  %1213 = vmatpush1.bf16.msra.mxu1 %v5320_v29  ;;  %v7998_v29 = vld [vmem:[#allocation48_spill] sm:$0xff] }
 0x23f   :  { %1173 = vmatprep.subr.bf16.mxu0 %v5329_v30  ;;  %1214 = vmatprep.subr.bf16.mxu1 %v5334_v31  ;;  %v7997_v31 = vld [vmem:[#allocation46_spill] sm:$0xff] }
 0x242   :  { %1174 = vmatpush1.bf16.msra.mxu0 %v7977_v51  ;;  %1215 = vmatpush1.bf16.msra.mxu1 %v7978_v56 }
 0x243   :  { %1175 = vmatprep.subr.bf16.mxu0 %v7979_v14  ;;  %1216 = vmatprep.subr.bf16.mxu1 %v7980_v32  ;;  %v7991_v32 = vld [vmem:[#allocation31_spill] sm:$0xff] }
 0x246   :  { %1176 = vmatpush1.bf16.msra.mxu0 %v7981_v11  ;;  %1217 = vmatpush1.bf16.msra.mxu1 %v7982_v2  ;;  %v7992_v11 = vld [vmem:[#allocation32_spill] sm:$0xff]  ;;  %v7993_v2 = vld [vmem:[#allocation33_spill] sm:$0xff] }
 0x247   :  { %1177 = vmatprep.subr.bf16.mxu0 %v7983_v7  ;;  %1218 = vmatprep.subr.bf16.mxu1 %v7984_v35  ;;  %v7994_v7 = vld [vmem:[#allocation34_spill] sm:$0xff]  ;;  %v7995_v35 = vld [vmem:[#allocation35_spill] sm:$0xff] }
 0x24a   :  { %1178 = vmatpush1.bf16.msra.mxu0 %v7985_v41  ;;  %1219 = vmatpush1.bf16.msra.mxu1 %v7986_v43  ;;  %v7996_v41 = vld [vmem:[#allocation36_spill] sm:$0xff] }
 0x24b   :  { %1179 = vmatprep.subr.bf16.mxu0 %v7987_v44  ;;  %1220 = vmatprep.subr.bf16.mxu1 %v7988_v45 }
 0x24e   :  { %1180 = vmatpush1.bf16.msra.mxu0 %v7989_v34  ;;  %1221 = vmatpush1.bf16.msra.mxu1 %v7990_v40 }
 0x24f   :  { %1181 = vmatprep.subr.bf16.mxu0 %v7991_v32  ;;  %1222 = vmatprep.subr.bf16.mxu1 %v7992_v11  ;;  %v1037_v32 = vrot.slane %v7997_v31, 2  ;;  %v1039_v11 = vrot.slane %v5505_v5, 2 }
 0x252   :  { %1182 = vmatpush1.bf16.msra.mxu0 %v7993_v2  ;;  %1223 = vmatpush1.bf16.msra.mxu1 %v7994_v7  ;;  %v944_v7 = vrot.slane %v7998_v29, 4 }
 0x253   :  { %1252 = vmatprep.subr.bf16.mxu0 %v7995_v35  ;;  %1293 = vmatprep.subr.bf16.mxu1 %v7996_v41  ;;  %v1038_v41 = vrot.slane %v5510_v10, 2 }
 0x2d5   :  { %v986_v43 = vpop.f32.mrf.mxu0  ;;  %v1027_v44 = vpop.f32.mrf.mxu1 }
 0x2d6   :  { %v1028_v21 = vadd.f32 %v1027_v44, %v946_v26 }
 0x2d7   :  { %v988_v14 = vpop.f32.mrf.mxu0  ;;  %v1029_v45 = vpop.f32.mrf.mxu1 }
 0x2d8   :  { %v989_v20 = vadd.f32 %v988_v14, %v945_v24 }
 0x2d9   :  { %v990_v56 = vpop.f32.mrf.mxu0  ;;  %v1031_v34 = vpop.f32.mrf.mxu1 }
 0x2db   :  { %v991_v51 = vpop.f32.mrf.mxu0  ;;  %v1032_v40 = vpop.f32.mrf.mxu1 }
 0x2dc   :  { %v987_v51 = vadd.f32 %v986_v43, %v944_v7  ;;  %v1040_v7 = vrot.slane %v5530_v0, 2 }
 0x2f5   :  { %v1079_v30 = vpop.f32.mrf.mxu0  ;;  %v1120_v2 = vpop.f32.mrf.mxu1 }
 0x2f6   :  { %v1080_v28 = vadd.f32 %v1079_v30, %v1037_v32  ;;  %v1121_v35 = vadd.f32 %v1120_v2, %v1039_v11 }
 0x2f7   :  { %v1081_v56 = vpop.f32.mrf.mxu0  ;;  %v1122_v34 = vpop.f32.mrf.mxu1 }
 0x2f8   :  { %v1131_v40 = vrot.slane %v1080_v28, 6  ;;  %v1133_v23 = vrot.slane %v1121_v35, 6  ;;  %v1082_v31 = vadd.f32 %v1081_v56, %v1038_v41  ;;  %v1123_v28 = vadd.f32 %v1122_v34, %v1040_v7  ;;  %v8005_v7 = vld [vmem:[#allocation9_spill] sm:$0xff] }
 0x2f9   :  { %v1083_v22 = vpop.f32.mrf.mxu0  ;;  %v1124_v5 = vpop.f32.mrf.mxu1 }
 0x2fa   :  { %v1139_v29 = vsel %vm328_vm1, %v987_v51, %v1131_v40  ;;  %v1132_v30 = vrot.slane %v1082_v31, 6  ;;  %v1141_v2 = vsel %vm328_vm1, %v1028_v21, %v1133_v23  ;;  %v947_v22 = vrot.slane %v5533_v16, 4 }
 0x2fb   :  { %4916 = vtanh.f32 %v1139_v29  ;;  %v1084_v32 = vpop.f32.mrf.mxu0  ;;  %v1125_v11 = vpop.f32.mrf.mxu1  ;;  %v1134_v5 = vrot.slane %v1123_v28, 6  ;;  %v8006_v28 = vld [vmem:[#allocation10_spill] sm:$0xff] }
 0x2fc   :  { %v1140_v10 = vsel %vm328_vm1, %v989_v20, %v1132_v30  ;;  %v1030_v26 = vadd.f32 %v1029_v45, %v947_v22  ;;  %v8001_v30 = vld [vmem:[#allocation5_spill] sm:$0xff]  ;;  %v8002_v32 = vld [vmem:[#allocation6_spill] sm:$0xff]  ;;  %v8003_v11 = vld [vmem:[#allocation7_spill] sm:$0xff] }
 0x2fd   :  { %4918 = vtanh.f32 %v1140_v10  ;;  %v8009_v22 = vld [vmem:[#allocation13_spill] sm:$0xff] }
 0x2fe   :  { %4920 = vtanh.f32 %v1141_v2  ;;  %v1142_v14 = vsel %vm328_vm1, %v1030_v26, %v1134_v5  ;;  %v8004_v2 = vld [vmem:[#allocation8_spill] sm:$0xff]  ;;  %v8010_v5 = vld [vmem:[#allocation14_spill] sm:$0xff]  ;;  %v8011_v26 = vld [vmem:[#allocation15_spill] sm:$0xff] }
 0x2ff   :  { %4922 = vtanh.f32 %v1142_v14  ;;  %v8013_v14 = vld [vmem:[#allocation17_spill] sm:$0xff] }
 0x308   :  { %v4917_v24 = vpop.eup %4916 }
 0x309   :  { %v1147_v31 = vmul.f32 0.5, %v4917_v24  ;;  %v8012_v24 = vld [vmem:[#allocation16_spill] sm:$0xff] }
 0x30a   :  { %v4919_v29 = vpop.eup %4918 }
 0x30b   :  { %v1148_v35 = vadd.f32 0.5, %v1147_v31  ;;  %v1149_v41 = vmul.f32 0.5, %v4919_v29  ;;  %v4921_v21 = vpop.eup %4920  ;;  %v8014_v31 = vld [vmem:[#allocation18_spill] sm:$0xff]  ;;  %v8015_v29 = vld [vmem:[#allocation19_spill] sm:$0xff] }
 0x30c   :  { %v4923_v44 = vpop.eup %4922 }
 0x30d   :  { %v1150_v23 = vadd.f32 0.5, %v1149_v41  ;;  %v1154_v20 = vmul.f32 %v4921_v21, %v1148_v35  ;;  %v1151_v56 = vmul.f32 0.5, %v4923_v44  ;;  %v8016_v35 = vld [vmem:[#allocation20_spill] sm:$0xff]  ;;  %v8017_v41 = vld [vmem:[#allocation21_spill] sm:$0xff]  ;;  %v8018_v21 = vld [vmem:[#allocation22_spill] sm:$0xff] }
 0x30e   :  { %v8022_v44 = vld [vmem:[#allocation26_spill] sm:$0xff] }
 0x30f   :  { %v1153_v10 = vmul.f32 %v1150_v23, %v5786_v17  ;;  %v1152_v45 = vadd.f32 0.5, %v1151_v56  ;;  %v8019_v23 = vld [vmem:[#allocation23_spill] sm:$0xff] }
 0x310   :  { %v8023_v56 = vld [vmem:[#allocation27_spill] sm:$0xff] }
 0x311   :  { %v5874_v43 = vadd.f32 %v1154_v20, %v1153_v10  ;;  %v8020_v20 = vld [vmem:[#allocation24_spill] sm:$0xff]  ;;  %v8021_v10 = vld [vmem:[#allocation25_spill] sm:$0xff] }
 0x313   :  { %4924 = vtanh.f32 %v5874_v43 }
 0x320   :  { %v4925_v34 = vpop.eup %4924 }
 0x321   :  { %v5877_v51 = vmul.f32 %v4925_v34, %v1152_v45  ;;  %v8024_v45 = vld [vmem:[#allocation28_spill] sm:$0xff]  ;;  %v8025_v34 = vld [vmem:[#allocation29_spill] sm:$0xff] }
 0x323   :  { %v1158_v40 = vpack.c.bf16 %v5877_v51, %v5877_v51 }
 0x325   :  { %1200 = vmatmul.mubr.bf16.vlgmr.msra.gmra.mxu0 %v1158_v40  ;;  %1241 = vmatmul.mubr.bf16.vlgmr.msra.gmra.mxu1 %v1158_v40  ;;  %v1250_v17 = vrot.slane %v1158_v40, 1  ;;  %v8026_v40 = vld [vmem:[#allocation30_spill] sm:$0xff] }
 0x326   :  { %1253 = vmatpush1.bf16.msra.mxu0 %v5547_v59  ;;  %1294 = vmatpush1.bf16.msra.mxu1 %v5552_v13 }
 0x327   :  { %1254 = vmatprep.subr.bf16.mxu0 %v5561_v62  ;;  %1295 = vmatprep.subr.bf16.mxu1 %v5566_v6 }
 0x328   :  { %1284 = vmatprep.mubr.bf16.mxu0 %v7947_v53  ;;  %1325 = vmatprep.mubr.bf16.mxu1 %v7947_v53 }
 0x32a   :  { %1255 = vmatpush1.bf16.msra.mxu0 %v5575_v52  ;;  %1296 = vmatpush1.bf16.msra.mxu1 %v5580_v4 }
 0x32b   :  { %1256 = vmatprep.subr.bf16.mxu0 %v5587_v15  ;;  %1297 = vmatprep.subr.bf16.mxu1 %v5592_v55 }
 0x32e   :  { %1257 = vmatpush1.bf16.msra.mxu0 %v5601_v58  ;;  %1298 = vmatpush1.bf16.msra.mxu1 %v5606_v57 }
 0x32f   :  { %1258 = vmatprep.subr.bf16.mxu0 %v5613_v1  ;;  %1299 = vmatprep.subr.bf16.mxu1 %v5618_v3 }
 0x332   :  { %1259 = vmatpush1.bf16.msra.mxu0 %v5625_v8  ;;  %1300 = vmatpush1.bf16.msra.mxu1 %v7965_v63 }
 0x333   :  { %1260 = vmatprep.subr.bf16.mxu0 %v7966_v39  ;;  %1301 = vmatprep.subr.bf16.mxu1 %v7967_v48 }
 0x336   :  { %1261 = vmatpush1.bf16.msra.mxu0 %v7968_v46  ;;  %1302 = vmatpush1.bf16.msra.mxu1 %v7969_v49 }
 0x337   :  { %1262 = vmatprep.subr.bf16.mxu0 %v7970_v38  ;;  %1303 = vmatprep.subr.bf16.mxu1 %v7971_v47 }
 0x33a   :  { %1263 = vmatpush1.bf16.msra.mxu0 %v7972_v33  ;;  %1304 = vmatpush1.bf16.msra.mxu1 %v7973_v36 }
 0x33b   :  { %1264 = vmatprep.subr.bf16.mxu0 %v7974_v50  ;;  %1305 = vmatprep.subr.bf16.mxu1 %v7975_v37 }
 0x33e   :  { %1265 = vmatpush1.bf16.msra.mxu0 %v5697_v12  ;;  %1306 = vmatpush1.bf16.msra.mxu1 %v7976_v42 }
 0x33f   :  { %1266 = vmatprep.subr.bf16.mxu0 %v5709_v9  ;;  %1307 = vmatprep.subr.bf16.mxu1 %v5714_v60 }
 0x342   :  { %1267 = vmatpush1.bf16.msra.mxu0 %v5721_v61  ;;  %1308 = vmatpush1.bf16.msra.mxu1 %v5726_v54 }
 0x343   :  { %1366 = vmatprep.subr.bf16.mxu0 %v5257_v18  ;;  %1407 = vmatprep.subr.bf16.mxu1 %v5262_v19  ;;  %v8007_v18 = vld [vmem:[#allocation11_spill] sm:$0xff]  ;;  %v8008_v19 = vld [vmem:[#allocation12_spill] sm:$0xff] }
 0x345   :  { %1285 = vmatmul.mubr.bf16.vlgmr.msra.gmra.mxu0 %v1250_v17  ;;  %1326 = vmatmul.mubr.bf16.vlgmr.msra.gmra.mxu1 %v1250_v17  ;;  %v8027_v17 = vld [vmem:[#allocation31_spill] sm:$0xff] }
 0x346   :  { %1367 = vmatpush1.bf16.msra.mxu0 %v8001_v30  ;;  %1408 = vmatpush1.bf16.msra.mxu1 %v8002_v32  ;;  %v8028_v30 = vld [vmem:[#allocation32_spill] sm:$0xff]  ;;  %v8029_v32 = vld [vmem:[#allocation33_spill] sm:$0xff] }
 0x347   :  { %1368 = vmatprep.subr.bf16.mxu0 %v8003_v11  ;;  %1409 = vmatprep.subr.bf16.mxu1 %v8004_v2  ;;  %v8030_v11 = vld [vmem:[#allocation34_spill] sm:$0xff]  ;;  %v8031_v2 = vld [vmem:[#allocation35_spill] sm:$0xff] }
 0x348   :  { %1398 = vmatprep.mubr.bf16.mxu0 %v7947_v53  ;;  %1439 = vmatprep.mubr.bf16.mxu1 %v7947_v53 }
 0x34a   :  { %1369 = vmatpush1.bf16.msra.mxu0 %v8005_v7  ;;  %1410 = vmatpush1.bf16.msra.mxu1 %v8006_v28  ;;  %v8032_v7 = vld [vmem:[#allocation36_spill] sm:$0xff] }
 0x34b   :  { %1370 = vmatprep.subr.bf16.mxu0 %v8007_v18  ;;  %1411 = vmatprep.subr.bf16.mxu1 %v8008_v19 }
 0x34e   :  { %1371 = vmatpush1.bf16.msra.mxu0 %v8009_v22  ;;  %1412 = vmatpush1.bf16.msra.mxu1 %v8010_v5 }
 0x34f   :  { %1372 = vmatprep.subr.bf16.mxu0 %v8011_v26  ;;  %1413 = vmatprep.subr.bf16.mxu1 %v8012_v24 }
 0x352   :  { %1373 = vmatpush1.bf16.msra.mxu0 %v8013_v14  ;;  %1414 = vmatpush1.bf16.msra.mxu1 %v8014_v31 }
 0x353   :  { %1374 = vmatprep.subr.bf16.mxu0 %v8015_v29  ;;  %1415 = vmatprep.subr.bf16.mxu1 %v8016_v35  ;;  %v8033_v35 = vld [vmem:[#allocation48_spill] sm:$0xff] }
 0x356   :  { %1375 = vmatpush1.bf16.msra.mxu0 %v8017_v41  ;;  %1416 = vmatpush1.bf16.msra.mxu1 %v8018_v21  ;;  %v1159_v41 = vrot.slane %v8033_v35, 6  ;;  %v8034_v21 = vld [vmem:[#allocation46_spill] sm:$0xff]  ;;  %v1162_v35 = vrot.slane %v5533_v16, 6 }
 0x357   :  { %1376 = vmatprep.subr.bf16.mxu0 %v8019_v23  ;;  %1417 = vmatprep.subr.bf16.mxu1 %v8020_v20  ;;  %v8035_v20 = vld [vmem:[#allocation47_spill] sm:$0xff] }
 0x35a   :  { %1377 = vmatpush1.bf16.msra.mxu0 %v8021_v10  ;;  %1418 = vmatpush1.bf16.msra.mxu1 %v8022_v44  ;;  %v1161_v44 = vrot.slane %v7999_v27, 6 }
 0x35b   :  { %1378 = vmatprep.subr.bf16.mxu0 %v8023_v56  ;;  %1419 = vmatprep.subr.bf16.mxu1 %v8024_v45  ;;  %v1160_v56 = vrot.slane %v8000_v25, 6 }
 0x35e   :  { %1379 = vmatpush1.bf16.msra.mxu0 %v8025_v34  ;;  %1420 = vmatpush1.bf16.msra.mxu1 %v8026_v40 }
 0x35f   :  { %1380 = vmatprep.subr.bf16.mxu0 %v8027_v17  ;;  %1421 = vmatprep.subr.bf16.mxu1 %v8028_v30 }
 0x362   :  { %1381 = vmatpush1.bf16.msra.mxu0 %v8029_v32  ;;  %1422 = vmatpush1.bf16.msra.mxu1 %v8030_v11  ;;  %v8036_v32 = vld [vmem:[#allocation49_spill] sm:$0xff] }
 0x363   :  { %1463 = vmatprep.subr.bf16.mxu0 %v8031_v2  ;;  %1504 = vmatprep.subr.bf16.mxu1 %v8032_v7 }
 0x3e5   :  { %v1201_v28 = vpop.f32.mrf.mxu0  ;;  %v1242_v18 = vpop.f32.mrf.mxu1 }
 0x3e6   :  { %v1202_v40 = vadd.f32 %v1201_v28, %v1159_v41 }
 0x3e7   :  { %v1203_v19 = vpop.f32.mrf.mxu0  ;;  %v1244_v22 = vpop.f32.mrf.mxu1 }
 0x3e9   :  { %v1205_v5 = vpop.f32.mrf.mxu0  ;;  %v1246_v26 = vpop.f32.mrf.mxu1 }
 0x3ea   :  { %v1243_v5 = vadd.f32 %v1242_v18, %v1161_v44  ;;  %v1204_v26 = vadd.f32 %v1203_v19, %v1160_v56 }
 0x3eb   :  { %v1206_v24 = vpop.f32.mrf.mxu0  ;;  %v1247_v14 = vpop.f32.mrf.mxu1 }
 0x405   :  { %v1286_v31 = vpop.f32.mrf.mxu0  ;;  %v1327_v29 = vpop.f32.mrf.mxu1 }
 0x406   :  { %v1287_v23 = vadd.f32 %v1286_v31, %v8034_v21  ;;  %v1328_v10 = vadd.f32 %v1327_v29, %v8035_v20  ;;  %v1245_v21 = vadd.f32 %v1244_v22, %v1162_v35  ;;  %v8037_v22 = vld [vmem:[#allocation65_spill] sm:$0xff] }
 0x407   :  { %v1288_v45 = vpop.f32.mrf.mxu0  ;;  %v1329_v34 = vpop.f32.mrf.mxu1  ;;  %v6207_v35 = vld [vmem:[%s7724_s3 + $0xe4] ss:$16 sps:$4 sm:$0xff]  }
 0x408   :  { %v1338_v17 = vrot.slane %v1287_v23, 6  ;;  %v1340_v30 = vrot.slane %v1328_v10, 6  ;;  %v1289_v11 = vadd.f32 %v1288_v45, %v8036_v32  ;;  %v1330_v28 = vadd.f32 %v1329_v34, %v5530_v0  ;;  %8059 = vst [vmem:[#allocation11_spill] sm:$0xff] %v6207_v35 }
 0x409   :  { %v1290_v2 = vpop.f32.mrf.mxu0  ;;  %v1331_v7 = vpop.f32.mrf.mxu1  ;;  %v2218_v34 = vrot.slane %v8037_v22, 6 }
 0x40a   :  { %v1346_v24 = vsel %vm328_vm1, %v1202_v40, %v1338_v17  ;;  %v1339_v14 = vrot.slane %v1289_v11, 6  ;;  %v1348_v27 = vsel %vm328_vm1, %v1243_v5, %v1340_v30  ;;  %v1341_v41 = vrot.slane %v1330_v28, 6  ;;  %v6201_v28 = vld [vmem:[%s7723_s2 + $0x8] ss:$16 sps:$4 sm:$0xff]  }
 0x40b   :  { %4926 = vtanh.f32 %v1346_v24  ;;  %v1291_v31 = vpop.f32.mrf.mxu0  ;;  %v1332_v29 = vpop.f32.mrf.mxu1  ;;  %v2221_v2 = vrot.slane %v5877_v51, 4  ;;  %v8038_v24 = vld [vmem:[#allocation52_spill] sm:$0xff]  ;;  %8058 = vst [vmem:[#allocation10_spill] sm:$0xff] %v6201_v28 }
 0x40c   :  { %v1347_v25 = vsel %vm328_vm1, %v1204_v26, %v1339_v14  ;;  %v1349_v19 = vsel %vm328_vm1, %v1245_v21, %v1341_v41  ;;  %v6213_v41 = vld [vmem:[%s7724_s3 + $0xec] ss:$16 sps:$4 sm:$0xff]  }
 0x40d   :  { %4928 = vtanh.f32 %v1347_v25  ;;  %v6195_v25 = vld [vmem:[%s7723_s2] ss:$16 sps:$4 sm:$0xff]   ;;  %8060 = vst [vmem:[#allocation12_spill] sm:$0xff] %v6213_v41 }
 0x40e   :  { %4930 = vtanh.f32 %v1348_v27  ;;  %8057 = vst [vmem:[#allocation9_spill] sm:$0xff] %v6195_v25 }
 0x40f   :  { %4932 = vtanh.f32 %v1349_v19 }
 0x418   :  { %v4927_v18 = vpop.eup %4926 }
 0x419   :  { %v1354_v23 = vmul.f32 0.5, %v4927_v18 }
 0x41a   :  { %v4929_v20 = vpop.eup %4928 }
 0x41b   :  { %v1355_v10 = vadd.f32 0.5, %v1354_v23  ;;  %v1356_v44 = vmul.f32 0.5, %v4929_v20  ;;  %v4931_v56 = vpop.eup %4930 }
 0x41c   :  { %v4933_v0 = vpop.eup %4932 }
 0x41d   :  { %v1357_v45 = vadd.f32 0.5, %v1356_v44  ;;  %v1361_v40 = vmul.f32 %v4931_v56, %v1355_v10  ;;  %v1358_v16 = vmul.f32 0.5, %v4933_v0 }
 0x41f   :  { %v1360_v17 = vmul.f32 %v1357_v45, %v5874_v43  ;;  %v1359_v32 = vadd.f32 0.5, %v1358_v16  ;;  %v2235_v43 = vsel %vm328_vm1, %v8038_v24, %v2218_v34  ;;  %v8061_v45 = vld [vmem:[#allocation42_spill] sm:$0xff] }
 0x420   :  { %v2237_v14 = vsel %vm2236_vm2, %v2235_v43, %v2221_v2 }
 0x421   :  { %v5962_v30 = vadd.f32 %v1361_v40, %v1360_v17  ;;  %v1455_v40 = vrot.slane %v8061_v45, 6  ;;  %v8062_v17 = vld [vmem:[#allocation43_spill] sm:$0xff] }
 0x422   :  { %v1457_v0 = vrot.slane %v8062_v17, 6 }
 0x423   :  { %4934 = vtanh.f32 %v5962_v30 }
 0x430   :  { %v4935_v11 = vpop.eup %4934 }
 0x431   :  { %v1364_v7 = vmul.f32 %v4935_v11, %v1359_v32  ;;  %v8063_v11 = vld [vmem:[#allocation44_spill] sm:$0xff] }
 0x432   :  { %v1456_v2 = vrot.slane %v8063_v11, 6 }
 0x433   :  { %v1365_v5 = vpack.c.bf16 %v1364_v7, %v1364_v7  ;;  %v2224_v26 = vrot.slane %v1364_v7, 2 }
 0x435   :  { %1399 = vmatmul.mubr.bf16.vlgmr.msra.gmra.mxu0 %v1365_v5  ;;  %1440 = vmatmul.mubr.bf16.vlgmr.msra.gmra.mxu1 %v1365_v5  ;;  %v2252_v31 = vsel %vm328_vm1, %v2224_v26, %v5877_v51  ;;  %v5973_v29 = vsel %vm2238_vm3, %v2237_v14, %v2224_v26  ;;  %v6189_v51 = vld [vmem:[%s7723_s2 + $0xc] ss:$16 sps:$4 sm:$0xff]  }
 0x436   :  { %8039 = vst [vmem:[#allocation53_spill] sm:$0xff] %v5973_v29  ;;  %1464 = vmatpush1.bf16.msra.mxu0 %v5547_v59  ;;  %1505 = vmatpush1.bf16.msra.mxu1 %v5552_v13  ;;  %v5978_v27 = vsel %vm2236_vm2, %v2252_v31, %v2218_v34  ;;  %v6013_v59 = vld [vmem:[%s7723_s2 + $0xe4] ss:$16 sps:$4 sm:$0xff]   ;;  %v6051_v13 = vld [vmem:[%s7723_s2 + $0xc0] ss:$16 sps:$4 sm:$0xff]   ;;  %8056 = vst [vmem:[#allocation8_spill] sm:$0xff] %v6189_v51 }
 0x437   :  { %8040 = vst [vmem:[#allocation54_spill] sm:$0xff] %v5978_v27  ;;  %1465 = vmatprep.subr.bf16.mxu0 %v5561_v62  ;;  %1506 = vmatprep.subr.bf16.mxu1 %v5566_v6  ;;  %v6057_v62 = vld [vmem:[%s7723_s2 + $0xc8] ss:$16 sps:$4 sm:$0xff]   ;;  %v6063_v6 = vld [vmem:[%s7723_s2 + $0xa4] ss:$16 sps:$4 sm:$0xff]  }
 0x438   :  { %1495 = vmatprep.mubr.bf16.mxu0 %v7947_v53  ;;  %1536 = vmatprep.mubr.bf16.mxu1 %v7947_v53  ;;  %v8064_v26 = vld [vmem:[#allocation38_spill] sm:$0xff] }
 0x43a   :  { %1466 = vmatpush1.bf16.msra.mxu0 %v5575_v52  ;;  %1507 = vmatpush1.bf16.msra.mxu1 %v5580_v4  ;;  %v6069_v52 = vld [vmem:[%s7723_s2 + $0xac] ss:$16 sps:$4 sm:$0xff]   ;;  %v6075_v4 = vld [vmem:[%s7723_s2 + $0xa0] ss:$16 sps:$4 sm:$0xff]  }
 0x43b   :  { %1467 = vmatprep.subr.bf16.mxu0 %v5587_v15  ;;  %1508 = vmatprep.subr.bf16.mxu1 %v5592_v55  ;;  %v6081_v15 = vld [vmem:[%s7723_s2 + $0xa8] ss:$16 sps:$4 sm:$0xff]   ;;  %v6087_v55 = vld [vmem:[%s7723_s2 + $0x84] ss:$16 sps:$4 sm:$0xff]  }
 0x43e   :  { %1468 = vmatpush1.bf16.msra.mxu0 %v5601_v58  ;;  %1509 = vmatpush1.bf16.msra.mxu1 %v5606_v57  ;;  %v6093_v58 = vld [vmem:[%s7723_s2 + $0x8c] ss:$16 sps:$4 sm:$0xff]   ;;  %v6099_v57 = vld [vmem:[%s7723_s2 + $0x80] ss:$16 sps:$4 sm:$0xff]  }
 0x43f   :  { %1469 = vmatprep.subr.bf16.mxu0 %v5613_v1  ;;  %1510 = vmatprep.subr.bf16.mxu1 %v5618_v3  ;;  %8041 = vst [vmem:[#allocation55_spill] sm:$0xff] %v6099_v57  ;;  %v6105_v1 = vld [vmem:[%s7723_s2 + $0x88] ss:$16 sps:$4 sm:$0xff]   ;;  %v6111_v3 = vld [vmem:[%s7723_s2 + $0x64] ss:$16 sps:$4 sm:$0xff]  }
 0x440   :  { %8042 = vst [vmem:[#allocation56_spill] sm:$0xff] %v6105_v1  ;;  %8043 = vst [vmem:[#allocation57_spill] sm:$0xff] %v6111_v3 }
 0x442   :  { %1470 = vmatpush1.bf16.msra.mxu0 %v5625_v8  ;;  %1511 = vmatpush1.bf16.msra.mxu1 %v7965_v63  ;;  %v1449_v8 = vrot.slane %v1365_v5, 1  ;;  %v6117_v63 = vld [vmem:[%s7723_s2 + $0x6c] ss:$16 sps:$4 sm:$0xff]  }
 0x443   :  { %1471 = vmatprep.subr.bf16.mxu0 %v7966_v39  ;;  %1512 = vmatprep.subr.bf16.mxu1 %v7967_v48  ;;  %8044 = vst [vmem:[#allocation58_spill] sm:$0xff] %v6117_v63  ;;  %v6123_v39 = vld [vmem:[%s7723_s2 + $0x60] ss:$16 sps:$4 sm:$0xff]   ;;  %v6129_v48 = vld [vmem:[%s7723_s2 + $0x68] ss:$16 sps:$4 sm:$0xff]  }
 0x444   :  { %8045 = vst [vmem:[#allocation59_spill] sm:$0xff] %v6123_v39  ;;  %8046 = vst [vmem:[#allocation60_spill] sm:$0xff] %v6129_v48 }
 0x446   :  { %1472 = vmatpush1.bf16.msra.mxu0 %v7968_v46  ;;  %1513 = vmatpush1.bf16.msra.mxu1 %v7969_v49  ;;  %v6135_v46 = vld [vmem:[%s7723_s2 + $0x44] ss:$16 sps:$4 sm:$0xff]   ;;  %v6141_v49 = vld [vmem:[%s7723_s2 + $0x4c] ss:$16 sps:$4 sm:$0xff]  }
 0x447   :  { %1473 = vmatprep.subr.bf16.mxu0 %v7970_v38  ;;  %1514 = vmatprep.subr.bf16.mxu1 %v7971_v47  ;;  %8047 = vst [vmem:[#allocation61_spill] sm:$0xff] %v6135_v46  ;;  %8048 = vst [vmem:[#allocation62_spill] sm:$0xff] %v6141_v49  ;;  %v6147_v38 = vld [vmem:[%s7723_s2 + $0x40] ss:$16 sps:$4 sm:$0xff]   ;;  %v6153_v47 = vld [vmem:[%s7723_s2 + $0x48] ss:$16 sps:$4 sm:$0xff]  }
 0x448   :  { %8049 = vst [vmem:[#allocation63_spill] sm:$0xff] %v6147_v38  ;;  %8050 = vst [vmem:[#allocation64_spill] sm:$0xff] %v6153_v47 }
 0x44a   :  { %1474 = vmatpush1.bf16.msra.mxu0 %v7972_v33  ;;  %1515 = vmatpush1.bf16.msra.mxu1 %v7973_v36  ;;  %v6159_v33 = vld [vmem:[%s7723_s2 + $0x24] ss:$16 sps:$4 sm:$0xff]   ;;  %v6165_v36 = vld [vmem:[%s7723_s2 + $0x2c] ss:$16 sps:$4 sm:$0xff]  }
 0x44b   :  { %1475 = vmatprep.subr.bf16.mxu0 %v7974_v50  ;;  %1516 = vmatprep.subr.bf16.mxu1 %v7975_v37  ;;  %8051 = vst [vmem:[#allocation51_spill] sm:$0xff] %v6159_v33  ;;  %8052 = vst [vmem:[#allocation50_spill] sm:$0xff] %v6165_v36  ;;  %v6171_v50 = vld [vmem:[%s7723_s2 + $0x20] ss:$16 sps:$4 sm:$0xff]   ;;  %v6177_v37 = vld [vmem:[%s7723_s2 + $0x28] ss:$16 sps:$4 sm:$0xff]  }
 0x44c   :  { %8053 = vst [vmem:[#allocation5_spill] sm:$0xff] %v6171_v50  ;;  %8054 = vst [vmem:[#allocation6_spill] sm:$0xff] %v6177_v37 }
 0x44e   :  { %1476 = vmatpush1.bf16.msra.mxu0 %v5697_v12  ;;  %1517 = vmatpush1.bf16.msra.mxu1 %v7976_v42  ;;  %v6019_v12 = vld [vmem:[%s7723_s2 + $0xec] ss:$16 sps:$4 sm:$0xff]   ;;  %v6183_v42 = vld [vmem:[%s7723_s2 + $0x4] ss:$16 sps:$4 sm:$0xff]  }
 0x44f   :  { %1477 = vmatprep.subr.bf16.mxu0 %v5709_v9  ;;  %1518 = vmatprep.subr.bf16.mxu1 %v5714_v60  ;;  %v6031_v60 = vld [vmem:[%s7723_s2 + $0xe8] ss:$16 sps:$4 sm:$0xff]   ;;  %v6043_v9 = vld [vmem:[%s7723_s2 + $0xcc] ss:$16 sps:$4 sm:$0xff]   ;;  %8055 = vst [vmem:[#allocation7_spill] sm:$0xff] %v6183_v42 }
 0x452   :  { %1478 = vmatpush1.bf16.msra.mxu0 %v5721_v61  ;;  %1519 = vmatpush1.bf16.msra.mxu1 %v5726_v54  ;;  %v6025_v54 = vld [vmem:[%s7723_s2 + $0xe0] ss:$16 sps:$4 sm:$0xff]   ;;  %v6037_v61 = vld [vmem:[%s7723_s2 + $0xc4] ss:$16 sps:$4 sm:$0xff]  }
 0x453   :  { %1589 = vmatprep.subr.bf16.mxu0 %v6013_v59  ;;  %1630 = vmatprep.subr.bf16.mxu1 %v6019_v12 }
 0x455   :  { %1496 = vmatmul.mubr.bf16.vlgmr.msra.gmra.mxu0 %v1449_v8  ;;  %1537 = vmatmul.mubr.bf16.vlgmr.msra.gmra.mxu1 %v1449_v8 }
 0x456   :  { %1590 = vmatpush1.bf16.msra.mxu0 %v6025_v54  ;;  %1631 = vmatpush1.bf16.msra.mxu1 %v6031_v60 }
 0x457   :  { %1591 = vmatprep.subr.bf16.mxu0 %v6037_v61  ;;  %1632 = vmatprep.subr.bf16.mxu1 %v6043_v9 }
 0x458   :  { %1621 = vmatprep.mubr.bf16.mxu0 %v7947_v53  ;;  %1662 = vmatprep.mubr.bf16.mxu1 %v7947_v53 }
 0x45a   :  { %1592 = vmatpush1.bf16.msra.mxu0 %v6051_v13  ;;  %1633 = vmatpush1.bf16.msra.mxu1 %v6057_v62 }
 0x45b   :  { %1593 = vmatprep.subr.bf16.mxu0 %v6063_v6  ;;  %1634 = vmatprep.subr.bf16.mxu1 %v6069_v52 }
 0x45e   :  { %1594 = vmatpush1.bf16.msra.mxu0 %v6075_v4  ;;  %1635 = vmatpush1.bf16.msra.mxu1 %v6081_v15 }
 0x45f   :  { %1595 = vmatprep.subr.bf16.mxu0 %v6087_v55  ;;  %1636 = vmatprep.subr.bf16.mxu1 %v6093_v58 }
 0x462   :  { %1596 = vmatpush1.bf16.msra.mxu0 %v6099_v57  ;;  %1637 = vmatpush1.bf16.msra.mxu1 %v6105_v1 }
 0x463   :  { %1597 = vmatprep.subr.bf16.mxu0 %v6111_v3  ;;  %1638 = vmatprep.subr.bf16.mxu1 %v6117_v63 }
 0x466   :  { %1598 = vmatpush1.bf16.msra.mxu0 %v6123_v39  ;;  %1639 = vmatpush1.bf16.msra.mxu1 %v6129_v48 }
 0x467   :  { %1599 = vmatprep.subr.bf16.mxu0 %v6135_v46  ;;  %1640 = vmatprep.subr.bf16.mxu1 %v6141_v49 }
 0x46a   :  { %1600 = vmatpush1.bf16.msra.mxu0 %v6147_v38  ;;  %1641 = vmatpush1.bf16.msra.mxu1 %v6153_v47 }
 0x46b   :  { %1601 = vmatprep.subr.bf16.mxu0 %v6159_v33  ;;  %1642 = vmatprep.subr.bf16.mxu1 %v6165_v36 }
 0x46e   :  { %1602 = vmatpush1.bf16.msra.mxu0 %v6171_v50  ;;  %1643 = vmatpush1.bf16.msra.mxu1 %v6177_v37 }
 0x46f   :  { %1603 = vmatprep.subr.bf16.mxu0 %v6183_v42  ;;  %1644 = vmatprep.subr.bf16.mxu1 %v6189_v51 }
 0x472   :  { %1604 = vmatpush1.bf16.msra.mxu0 %v6195_v25  ;;  %1645 = vmatpush1.bf16.msra.mxu1 %v6201_v28 }
 0x473   :  { %1682 = vmatprep.subr.bf16.mxu0 %v6207_v35  ;;  %1723 = vmatprep.subr.bf16.mxu1 %v6213_v41 }
 0x4f5   :  { %v1400_v21 = vpop.f32.mrf.mxu0  ;;  %v1441_v18 = vpop.f32.mrf.mxu1 }
 0x4f6   :  { %v1401_v43 = vadd.f32 %v1400_v21, %v8064_v26 }
 0x4f7   :  { %v1402_v19 = vpop.f32.mrf.mxu0  ;;  %v1443_v23 = vpop.f32.mrf.mxu1 }
 0x4f9   :  { %v1404_v20 = vpop.f32.mrf.mxu0  ;;  %v1445_v10 = vpop.f32.mrf.mxu1 }
 0x4fa   :  { %v8065_v10 = vld [vmem:[#allocation40_spill] sm:$0xff] }
 0x4fb   :  { %v1405_v44 = vpop.f32.mrf.mxu0  ;;  %v1446_v56 = vpop.f32.mrf.mxu1 }
 0x4fc   :  { %v1403_v44 = vadd.f32 %v1402_v19, %v8065_v10  ;;  %v8068_v19 = vld [vmem:[#allocation41_spill] sm:$0xff] }
 0x515   :  { %v1497_v16 = vpop.f32.mrf.mxu0  ;;  %v1538_v22 = vpop.f32.mrf.mxu1 }
 0x516   :  { %v1498_v34 = vadd.f32 %v1497_v16, %v1455_v40  ;;  %v1539_v32 = vadd.f32 %v1538_v22, %v1457_v0  ;;  %v8066_v0 = vld [vmem:[#allocation39_spill] sm:$0xff] }
 0x517   :  { %v1499_v7 = vpop.f32.mrf.mxu0  ;;  %v1540_v5 = vpop.f32.mrf.mxu1  ;;  %v1442_v16 = vadd.f32 %v1441_v18, %v8066_v0 }
 0x518   :  { %v1549_v14 = vrot.slane %v1498_v34, 6  ;;  %v1500_v31 = vadd.f32 %v1499_v7, %v1456_v2  ;;  %v1551_v27 = vrot.slane %v1539_v32, 6  ;;  %v8067_v34 = vld [vmem:[#allocation45_spill] sm:$0xff] }
 0x519   :  { %v1501_v8 = vpop.f32.mrf.mxu0  ;;  %v1542_v20 = vpop.f32.mrf.mxu1  ;;  %v1458_v2 = vrot.slane %v8067_v34, 6 }
 0x51a   :  { %v1557_v56 = vsel %vm328_vm1, %v1401_v43, %v1549_v14  ;;  %v1550_v29 = vrot.slane %v1500_v31, 6  ;;  %v1559_v21 = vsel %vm328_vm1, %v1442_v16, %v1551_v27  ;;  %v1444_v20 = vadd.f32 %v1443_v23, %v8068_v19 }
 0x51b   :  { %4936 = vtanh.f32 %v1557_v56  ;;  %v1502_v24 = vpop.f32.mrf.mxu0  ;;  %v1543_v40 = vpop.f32.mrf.mxu1  ;;  %v1541_v7 = vadd.f32 %v1540_v5, %v1458_v2 }
 0x51c   :  { %v1558_v22 = vsel %vm328_vm1, %v1403_v44, %v1550_v29 }
 0x51d   :  { %4938 = vtanh.f32 %v1558_v22  ;;  %v1552_v8 = vrot.slane %v1541_v7, 6  ;;  %v6249_v7 = vld [vmem:[%s7724_s3 + $0xe8] ss:$16 sps:$4 sm:$0xff]  }
 0x51e   :  { %4940 = vtanh.f32 %v1559_v21 }
 0x51f   :  { %v1560_v32 = vsel %vm328_vm1, %v1444_v20, %v1552_v8  ;;  %v6255_v8 = vld [vmem:[%s7724_s3 + $0xc4] ss:$16 sps:$4 sm:$0xff]   ;;  %v6261_v20 = vld [vmem:[%s7724_s3 + $0xcc] ss:$16 sps:$4 sm:$0xff]  }
 0x520   :  { %4942 = vtanh.f32 %v1560_v32  ;;  %v6275_v32 = vld [vmem:[%s7724_s3 + $0xc8] ss:$16 sps:$4 sm:$0xff]  }
 0x528   :  { %v4937_v43 = vpop.eup %4936 }
 0x529   :  { %v1565_v14 = vmul.f32 0.5, %v4937_v43  ;;  %v6269_v43 = vld [vmem:[%s7724_s3 + $0xc0] ss:$16 sps:$4 sm:$0xff]  }
 0x52a   :  { %v4939_v24 = vpop.eup %4938 }
 0x52b   :  { %v1566_v31 = vadd.f32 0.5, %v1565_v14  ;;  %v1567_v56 = vmul.f32 0.5, %v4939_v24  ;;  %v4941_v29 = vpop.eup %4940  ;;  %v6281_v14 = vld [vmem:[%s7724_s3 + $0xa4] ss:$16 sps:$4 sm:$0xff]   ;;  %v6287_v24 = vld [vmem:[%s7724_s3 + $0xac] ss:$16 sps:$4 sm:$0xff]  }
 0x52d   :  { %v1568_v18 = vadd.f32 0.5, %v1567_v56  ;;  %v1572_v27 = vmul.f32 %v4941_v29, %v1566_v31  ;;  %v4943_v5 = vpop.eup %4942  ;;  %v6293_v31 = vld [vmem:[%s7724_s3 + $0xa0] ss:$16 sps:$4 sm:$0xff]   ;;  %v6299_v56 = vld [vmem:[%s7724_s3 + $0xa8] ss:$16 sps:$4 sm:$0xff]  }
 0x52e   :  { %v1569_v16 = vmul.f32 0.5, %v4943_v5  ;;  %v6311_v29 = vld [vmem:[%s7724_s3 + $0x8c] ss:$16 sps:$4 sm:$0xff]   ;;  %v6329_v5 = vld [vmem:[%s7724_s3 + $0x64] ss:$16 sps:$4 sm:$0xff]  }
 0x52f   :  { %v1571_v44 = vmul.f32 %v1568_v18, %v5962_v30  ;;  %v6243_v30 = vld [vmem:[%s7724_s3 + $0xe0] ss:$16 sps:$4 sm:$0xff]   ;;  %v6305_v18 = vld [vmem:[%s7724_s3 + $0x84] ss:$16 sps:$4 sm:$0xff]  }
 0x530   :  { %v1570_v23 = vadd.f32 0.5, %v1569_v16  ;;  %v6335_v16 = vld [vmem:[%s7724_s3 + $0x6c] ss:$16 sps:$4 sm:$0xff]  }
 0x531   :  { %v6229_v40 = vadd.f32 %v1572_v27, %v1571_v44  ;;  %v6317_v44 = vld [vmem:[%s7724_s3 + $0x80] ss:$16 sps:$4 sm:$0xff]   ;;  %v6323_v27 = vld [vmem:[%s7724_s3 + $0x88] ss:$16 sps:$4 sm:$0xff]   ;;  %8070 = vst [vmem:[#allocation14_spill] sm:$0xff] %v6335_v16 }
 0x533   :  { %4944 = vtanh.f32 %v6229_v40 }
 0x540   :  { %v4945_v22 = vpop.eup %4944 }
 0x541   :  { %v6232_v21 = vmul.f32 %v4945_v22, %v1570_v23  ;;  %v6341_v23 = vld [vmem:[%s7724_s3 + $0x60] ss:$16 sps:$4 sm:$0xff]   ;;  %v6347_v22 = vld [vmem:[%s7724_s3 + $0x68] ss:$16 sps:$4 sm:$0xff]  }
 0x542   :  { %8071 = vst [vmem:[#allocation15_spill] sm:$0xff] %v6341_v23  ;;  %8072 = vst [vmem:[#allocation16_spill] sm:$0xff] %v6347_v22 }
 0x543   :  { %8069 = vst [vmem:[#allocation13_spill] sm:$0xff] %v6232_v21  ;;  %v6236_v2 = vpack.c.bf16 %v6232_v21, %v6232_v21  ;;  %v6353_v21 = vld [vmem:[%s7724_s3 + $0x44] ss:$16 sps:$4 sm:$0xff]  }
 0x544   :  { %8073 = vst [vmem:[#allocation17_spill] sm:$0xff] %v6353_v21 }
 0x545   :  { %1622 = vmatmul.mubr.bf16.vlgmr.msra.gmra.mxu0 %v6236_v2  ;;  %1663 = vmatmul.mubr.bf16.vlgmr.msra.gmra.mxu1 %v6236_v2 }
 0x546   :  { %1683 = vmatpush1.bf16.msra.mxu0 %v6243_v30  ;;  %1724 = vmatpush1.bf16.msra.mxu1 %v6249_v7 }
 0x547   :  { %1684 = vmatprep.subr.bf16.mxu0 %v6255_v8  ;;  %1725 = vmatprep.subr.bf16.mxu1 %v6261_v20 }
 0x548   :  { %1714 = vmatprep.mubr.bf16.mxu0 %v7947_v53  ;;  %1755 = vmatprep.mubr.bf16.mxu1 %v7947_v53 }
 0x54a   :  { %1685 = vmatpush1.bf16.msra.mxu0 %v6269_v43  ;;  %1726 = vmatpush1.bf16.msra.mxu1 %v6275_v32 }
 0x54b   :  { %1686 = vmatprep.subr.bf16.mxu0 %v6281_v14  ;;  %1727 = vmatprep.subr.bf16.mxu1 %v6287_v24 }
 0x54e   :  { %1687 = vmatpush1.bf16.msra.mxu0 %v6293_v31  ;;  %1728 = vmatpush1.bf16.msra.mxu1 %v6299_v56 }
 0x54f   :  { %1688 = vmatprep.subr.bf16.mxu0 %v6305_v18  ;;  %1729 = vmatprep.subr.bf16.mxu1 %v6311_v29 }
 0x552   :  { %1689 = vmatpush1.bf16.msra.mxu0 %v6317_v44  ;;  %1730 = vmatpush1.bf16.msra.mxu1 %v6323_v27 }
 0x553   :  { %1690 = vmatprep.subr.bf16.mxu0 %v6329_v5  ;;  %1731 = vmatprep.subr.bf16.mxu1 %v6335_v16  ;;  %v6359_v16 = vld [vmem:[%s7724_s3 + $0x4c] ss:$16 sps:$4 sm:$0xff]  }
 0x554   :  { %8074 = vst [vmem:[#allocation18_spill] sm:$0xff] %v6359_v16 }
 0x556   :  { %1691 = vmatpush1.bf16.msra.mxu0 %v6341_v23  ;;  %1732 = vmatpush1.bf16.msra.mxu1 %v6347_v22  ;;  %v6365_v23 = vld [vmem:[%s7724_s3 + $0x40] ss:$16 sps:$4 sm:$0xff]   ;;  %v6371_v22 = vld [vmem:[%s7724_s3 + $0x48] ss:$16 sps:$4 sm:$0xff]  }
 0x557   :  { %1692 = vmatprep.subr.bf16.mxu0 %v6353_v21  ;;  %1733 = vmatprep.subr.bf16.mxu1 %v6359_v16  ;;  %8075 = vst [vmem:[#allocation19_spill] sm:$0xff] %v6365_v23  ;;  %8076 = vst [vmem:[#allocation20_spill] sm:$0xff] %v6371_v22  ;;  %v6377_v21 = vld [vmem:[%s7724_s3 + $0x24] ss:$16 sps:$4 sm:$0xff]   ;;  %v6383_v16 = vld [vmem:[%s7724_s3 + $0x2c] ss:$16 sps:$4 sm:$0xff]  }
 0x558   :  { %8077 = vst [vmem:[#allocation21_spill] sm:$0xff] %v6377_v21  ;;  %8078 = vst [vmem:[#allocation22_spill] sm:$0xff] %v6383_v16 }
 0x55a   :  { %1693 = vmatpush1.bf16.msra.mxu0 %v6365_v23  ;;  %1734 = vmatpush1.bf16.msra.mxu1 %v6371_v22  ;;  %v6389_v23 = vld [vmem:[%s7724_s3 + $0x20] ss:$16 sps:$4 sm:$0xff]   ;;  %v6395_v22 = vld [vmem:[%s7724_s3 + $0x28] ss:$16 sps:$4 sm:$0xff]  }
 0x55b   :  { %1694 = vmatprep.subr.bf16.mxu0 %v6377_v21  ;;  %1735 = vmatprep.subr.bf16.mxu1 %v6383_v16  ;;  %8079 = vst [vmem:[#allocation23_spill] sm:$0xff] %v6389_v23  ;;  %8080 = vst [vmem:[#allocation24_spill] sm:$0xff] %v6395_v22  ;;  %v6401_v21 = vld [vmem:[%s7724_s3 + $0x4] ss:$16 sps:$4 sm:$0xff]   ;;  %v6407_v16 = vld [vmem:[%s7724_s3 + $0xc] ss:$16 sps:$4 sm:$0xff]  }
 0x55c   :  { %8081 = vst [vmem:[#allocation25_spill] sm:$0xff] %v6401_v21 }
 0x55e   :  { %1695 = vmatpush1.bf16.msra.mxu0 %v6389_v23  ;;  %1736 = vmatpush1.bf16.msra.mxu1 %v6395_v22  ;;  %v6413_v23 = vld [vmem:[%s7724_s3] ss:$16 sps:$4 sm:$0xff]   ;;  %v6419_v22 = vld [vmem:[%s7724_s3 + $0x8] ss:$16 sps:$4 sm:$0xff]  }
 0x55f   :  { %1696 = vmatprep.subr.bf16.mxu0 %v6401_v21  ;;  %1737 = vmatprep.subr.bf16.mxu1 %v6407_v16  ;;  %v1672_v21 = vrot.slane %v6236_v2, 1 }
 0x562   :  { %1697 = vmatpush1.bf16.msra.mxu0 %v6413_v23  ;;  %1738 = vmatpush1.bf16.msra.mxu1 %v6419_v22 }
 0x563   :  { %1804 = vmatprep.subr.bf16.mxu0 %v6013_v59  ;;  %1845 = vmatprep.subr.bf16.mxu1 %v6019_v12 }
 0x565   :  { %1715 = vmatmul.mubr.bf16.vlgmr.msra.gmra.mxu0 %v1672_v21  ;;  %1756 = vmatmul.mubr.bf16.vlgmr.msra.gmra.mxu1 %v1672_v21 }
 0x566   :  { %1805 = vmatpush1.bf16.msra.mxu0 %v6025_v54  ;;  %1846 = vmatpush1.bf16.msra.mxu1 %v6031_v60 }
 0x567   :  { %1806 = vmatprep.subr.bf16.mxu0 %v6037_v61  ;;  %1847 = vmatprep.subr.bf16.mxu1 %v6043_v9 }
 0x568   :  { %1836 = vmatprep.mubr.bf16.mxu0 %v7947_v53  ;;  %1877 = vmatprep.mubr.bf16.mxu1 %v7947_v53 }
 0x56a   :  { %1807 = vmatpush1.bf16.msra.mxu0 %v6051_v13  ;;  %1848 = vmatpush1.bf16.msra.mxu1 %v6057_v62 }
 0x56b   :  { %1808 = vmatprep.subr.bf16.mxu0 %v6063_v6  ;;  %1849 = vmatprep.subr.bf16.mxu1 %v6069_v52 }
 0x56e   :  { %1809 = vmatpush1.bf16.msra.mxu0 %v6075_v4  ;;  %1850 = vmatpush1.bf16.msra.mxu1 %v6081_v15 }
 0x56f   :  { %1810 = vmatprep.subr.bf16.mxu0 %v6087_v55  ;;  %1851 = vmatprep.subr.bf16.mxu1 %v6093_v58 }
 0x572   :  { %1811 = vmatpush1.bf16.msra.mxu0 %v6099_v57  ;;  %1852 = vmatpush1.bf16.msra.mxu1 %v6105_v1 }
 0x573   :  { %1812 = vmatprep.subr.bf16.mxu0 %v6111_v3  ;;  %1853 = vmatprep.subr.bf16.mxu1 %v6117_v63 }
 0x576   :  { %1813 = vmatpush1.bf16.msra.mxu0 %v6123_v39  ;;  %1854 = vmatpush1.bf16.msra.mxu1 %v6129_v48 }
 0x577   :  { %1814 = vmatprep.subr.bf16.mxu0 %v6135_v46  ;;  %1855 = vmatprep.subr.bf16.mxu1 %v6141_v49 }
 0x57a   :  { %1815 = vmatpush1.bf16.msra.mxu0 %v6147_v38  ;;  %1856 = vmatpush1.bf16.msra.mxu1 %v6153_v47 }
 0x57b   :  { %1816 = vmatprep.subr.bf16.mxu0 %v6159_v33  ;;  %1857 = vmatprep.subr.bf16.mxu1 %v6165_v36 }
 0x57e   :  { %1817 = vmatpush1.bf16.msra.mxu0 %v6171_v50  ;;  %1858 = vmatpush1.bf16.msra.mxu1 %v6177_v37 }
 0x57f   :  { %1818 = vmatprep.subr.bf16.mxu0 %v6183_v42  ;;  %1859 = vmatprep.subr.bf16.mxu1 %v6189_v51  ;;  %v1674_v42 = vrot.slane %v8061_v45, 4  ;;  %v1676_v51 = vrot.slane %v8062_v17, 4 }
 0x582   :  { %1819 = vmatpush1.bf16.msra.mxu0 %v6195_v25  ;;  %1860 = vmatpush1.bf16.msra.mxu1 %v6201_v28  ;;  %v1581_v28 = vrot.slane %v8064_v26, 2 }
 0x583   :  { %1897 = vmatprep.subr.bf16.mxu0 %v6207_v35  ;;  %1938 = vmatprep.subr.bf16.mxu1 %v6213_v41  ;;  %v1675_v41 = vrot.slane %v8063_v11, 4 }
 0x605   :  { %v1623_v21 = vpop.f32.mrf.mxu0  ;;  %v1664_v2 = vpop.f32.mrf.mxu1 }
 0x606   :  { %v1624_v63 = vadd.f32 %v1623_v21, %v1581_v28 }
 0x607   :  { %v1625_v33 = vpop.f32.mrf.mxu0  ;;  %v1666_v36 = vpop.f32.mrf.mxu1 }
 0x609   :  { %v1627_v47 = vpop.f32.mrf.mxu0  ;;  %v1668_v50 = vpop.f32.mrf.mxu1 }
 0x60a   :  { %v1582_v47 = vrot.slane %v8065_v10, 2 }
 0x60b   :  { %v1628_v38 = vpop.f32.mrf.mxu0  ;;  %v1669_v37 = vpop.f32.mrf.mxu1 }
 0x60c   :  { %v1583_v37 = vrot.slane %v8066_v0, 2  ;;  %v1626_v17 = vadd.f32 %v1625_v33, %v1582_v47 }
 0x625   :  { %v1716_v49 = vpop.f32.mrf.mxu0  ;;  %v1757_v25 = vpop.f32.mrf.mxu1 }
 0x626   :  { %v1717_v46 = vadd.f32 %v1716_v49, %v1674_v42  ;;  %v1758_v35 = vadd.f32 %v1757_v25, %v1676_v51  ;;  %v1665_v51 = vadd.f32 %v1664_v2, %v1583_v37 }
 0x627   :  { %v1718_v48 = vpop.f32.mrf.mxu0  ;;  %v1759_v39 = vpop.f32.mrf.mxu1 }
 0x628   :  { %v1768_v50 = vrot.slane %v1717_v46, 6  ;;  %v1719_v38 = vadd.f32 %v1718_v48, %v1675_v41  ;;  %v1770_v57 = vrot.slane %v1758_v35, 6  ;;  %v1677_v48 = vrot.slane %v8067_v34, 4 }
 0x629   :  { %v1720_v45 = vpop.f32.mrf.mxu0  ;;  %v1761_v3 = vpop.f32.mrf.mxu1 }
 0x62a   :  { %v1776_v1 = vsel %vm328_vm1, %v1624_v63, %v1768_v50  ;;  %v1769_v26 = vrot.slane %v1719_v38, 6  ;;  %v1778_v28 = vsel %vm328_vm1, %v1665_v51, %v1770_v57  ;;  %v1760_v46 = vadd.f32 %v1759_v39, %v1677_v48  ;;  %v8084_v51 = vld [vmem:[#allocation15_spill] sm:$0xff]  ;;  %v8087_v48 = vld [vmem:[#allocation18_spill] sm:$0xff] }
 0x62b   :  { %4946 = vtanh.f32 %v1776_v1  ;;  %v1721_v49 = vpop.f32.mrf.mxu0  ;;  %v1762_v42 = vpop.f32.mrf.mxu1  ;;  %v1584_v3 = vrot.slane %v8068_v19, 2 }
 0x62c   :  { %v1777_v25 = vsel %vm328_vm1, %v1626_v17, %v1769_v26  ;;  %v1771_v33 = vrot.slane %v1760_v46, 6  ;;  %v8088_v46 = vld [vmem:[#allocation19_spill] sm:$0xff] }
 0x62d   :  { %4948 = vtanh.f32 %v1777_v25  ;;  %v1667_v41 = vadd.f32 %v1666_v36, %v1584_v3  ;;  %v8085_v25 = vld [vmem:[#allocation16_spill] sm:$0xff] }
 0x62e   :  { %4950 = vtanh.f32 %v1778_v28  ;;  %v8086_v28 = vld [vmem:[#allocation17_spill] sm:$0xff]  ;;  %v8089_v3 = vld [vmem:[#allocation20_spill] sm:$0xff] }
 0x62f   :  { %v1779_v35 = vsel %vm328_vm1, %v1667_v41, %v1771_v33  ;;  %v8090_v33 = vld [vmem:[#allocation21_spill] sm:$0xff]  ;;  %v8091_v41 = vld [vmem:[#allocation22_spill] sm:$0xff] }
 0x630   :  { %4952 = vtanh.f32 %v1779_v35  ;;  %v8093_v35 = vld [vmem:[#allocation24_spill] sm:$0xff] }
 0x638   :  { %v4947_v63 = vpop.eup %4946 }
 0x639   :  { %v1784_v1 = vmul.f32 0.5, %v4947_v63  ;;  %v8092_v63 = vld [vmem:[#allocation23_spill] sm:$0xff] }
 0x63a   :  { %v4949_v45 = vpop.eup %4948 }
 0x63b   :  { %v1785_v21 = vadd.f32 0.5, %v1784_v1  ;;  %v1786_v2 = vmul.f32 0.5, %v4949_v45  ;;  %v4951_v26 = vpop.eup %4950  ;;  %v8094_v1 = vld [vmem:[#allocation25_spill] sm:$0xff] }
 0x63d   :  { %v1787_v17 = vadd.f32 0.5, %v1786_v2  ;;  %v1791_v47 = vmul.f32 %v4951_v26, %v1785_v21  ;;  %v4953_v39 = vpop.eup %4952  ;;  %v8109_v21 = vld [vmem:[#allocation7_spill] sm:$0xff]  ;;  %v8110_v2 = vld [vmem:[#allocation8_spill] sm:$0xff]  ;;  %v8112_v26 = vld [vmem:[#allocation10_spill] sm:$0xff] }
 0x63e   :  { %v1788_v38 = vmul.f32 0.5, %v4953_v39 }
 0x63f   :  { %v1790_v57 = vmul.f32 %v1787_v17, %v6229_v40  ;;  %v8083_v40 = vld [vmem:[#allocation14_spill] sm:$0xff]  ;;  %v8111_v17 = vld [vmem:[#allocation9_spill] sm:$0xff] }
 0x640   :  { %v1789_v36 = vadd.f32 0.5, %v1788_v38 }
 0x641   :  { %v6472_v50 = vadd.f32 %v1791_v47, %v1790_v57  ;;  %v8113_v57 = vld [vmem:[#allocation11_spill] sm:$0xff]  ;;  %v8114_v47 = vld [vmem:[#allocation12_spill] sm:$0xff] }
 0x643   :  { %4954 = vtanh.f32 %v6472_v50 }
 0x650   :  { %v4955_v37 = vpop.eup %4954 }
 0x651   :  { %v6475_v49 = vmul.f32 %v4955_v37, %v1789_v36 }
 0x653   :  { %8082 = vst [vmem:[#allocation26_spill] sm:$0xff] %v6475_v49  ;;  %v1795_v42 = vpack.c.bf16 %v6475_v49, %v6475_v49 }
 0x655   :  { %1837 = vmatmul.mubr.bf16.vlgmr.msra.gmra.mxu0 %v1795_v42  ;;  %1878 = vmatmul.mubr.bf16.vlgmr.msra.gmra.mxu1 %v1795_v42  ;;  %v1887_v45 = vrot.slane %v1795_v42, 1 }
 0x656   :  { %1898 = vmatpush1.bf16.msra.mxu0 %v6243_v30  ;;  %1939 = vmatpush1.bf16.msra.mxu1 %v6249_v7 }
 0x657   :  { %1899 = vmatprep.subr.bf16.mxu0 %v6255_v8  ;;  %1940 = vmatprep.subr.bf16.mxu1 %v6261_v20 }
 0x658   :  { %1929 = vmatprep.mubr.bf16.mxu0 %v7947_v53  ;;  %1970 = vmatprep.mubr.bf16.mxu1 %v7947_v53 }
 0x65a   :  { %1900 = vmatpush1.bf16.msra.mxu0 %v6269_v43  ;;  %1941 = vmatpush1.bf16.msra.mxu1 %v6275_v32 }
 0x65b   :  { %1901 = vmatprep.subr.bf16.mxu0 %v6281_v14  ;;  %1942 = vmatprep.subr.bf16.mxu1 %v6287_v24 }
 0x65e   :  { %1902 = vmatpush1.bf16.msra.mxu0 %v6293_v31  ;;  %1943 = vmatpush1.bf16.msra.mxu1 %v6299_v56 }
 0x65f   :  { %1903 = vmatprep.subr.bf16.mxu0 %v6305_v18  ;;  %1944 = vmatprep.subr.bf16.mxu1 %v6311_v29 }
 0x662   :  { %1904 = vmatpush1.bf16.msra.mxu0 %v6317_v44  ;;  %1945 = vmatpush1.bf16.msra.mxu1 %v6323_v27 }
 0x663   :  { %1905 = vmatprep.subr.bf16.mxu0 %v6329_v5  ;;  %1946 = vmatprep.subr.bf16.mxu1 %v8083_v40 }
 0x666   :  { %1906 = vmatpush1.bf16.msra.mxu0 %v8084_v51  ;;  %1947 = vmatpush1.bf16.msra.mxu1 %v8085_v25 }
 0x667   :  { %1907 = vmatprep.subr.bf16.mxu0 %v8086_v28  ;;  %1948 = vmatprep.subr.bf16.mxu1 %v8087_v48 }
 0x66a   :  { %1908 = vmatpush1.bf16.msra.mxu0 %v8088_v46  ;;  %1949 = vmatpush1.bf16.msra.mxu1 %v8089_v3 }
 0x66b   :  { %1909 = vmatprep.subr.bf16.mxu0 %v8090_v33  ;;  %1950 = vmatprep.subr.bf16.mxu1 %v8091_v41 }
 0x66e   :  { %1910 = vmatpush1.bf16.msra.mxu0 %v8092_v63  ;;  %1951 = vmatpush1.bf16.msra.mxu1 %v8093_v35 }
 0x66f   :  { %1911 = vmatprep.subr.bf16.mxu0 %v8094_v1  ;;  %1952 = vmatprep.subr.bf16.mxu1 %v6407_v16 }
 0x672   :  { %1912 = vmatpush1.bf16.msra.mxu0 %v6413_v23  ;;  %1953 = vmatpush1.bf16.msra.mxu1 %v6419_v22 }
 0x673   :  { %2019 = vmatprep.subr.bf16.mxu0 %v6013_v59  ;;  %2060 = vmatprep.subr.bf16.mxu1 %v6019_v12  ;;  %v8095_v59 = vld [vmem:[#allocation55_spill] sm:$0xff]  ;;  %v8096_v12 = vld [vmem:[#allocation56_spill] sm:$0xff] }
 0x675   :  { %1930 = vmatmul.mubr.bf16.vlgmr.msra.gmra.mxu0 %v1887_v45  ;;  %1971 = vmatmul.mubr.bf16.vlgmr.msra.gmra.mxu1 %v1887_v45 }
 0x676   :  { %2020 = vmatpush1.bf16.msra.mxu0 %v6025_v54  ;;  %2061 = vmatpush1.bf16.msra.mxu1 %v6031_v60  ;;  %v8097_v54 = vld [vmem:[#allocation57_spill] sm:$0xff]  ;;  %v8098_v60 = vld [vmem:[#allocation58_spill] sm:$0xff] }
 0x677   :  { %2021 = vmatprep.subr.bf16.mxu0 %v6037_v61  ;;  %2062 = vmatprep.subr.bf16.mxu1 %v6043_v9  ;;  %v8099_v61 = vld [vmem:[#allocation59_spill] sm:$0xff]  ;;  %v8100_v9 = vld [vmem:[#allocation60_spill] sm:$0xff] }
 0x678   :  { %2051 = vmatprep.mubr.bf16.mxu0 %v7947_v53  ;;  %2092 = vmatprep.mubr.bf16.mxu1 %v7947_v53 }
 0x67a   :  { %2022 = vmatpush1.bf16.msra.mxu0 %v6051_v13  ;;  %2063 = vmatpush1.bf16.msra.mxu1 %v6057_v62  ;;  %v8101_v13 = vld [vmem:[#allocation61_spill] sm:$0xff]  ;;  %v8102_v62 = vld [vmem:[#allocation62_spill] sm:$0xff] }
 0x67b   :  { %2023 = vmatprep.subr.bf16.mxu0 %v6063_v6  ;;  %2064 = vmatprep.subr.bf16.mxu1 %v6069_v52  ;;  %v8103_v6 = vld [vmem:[#allocation63_spill] sm:$0xff]  ;;  %v8104_v52 = vld [vmem:[#allocation64_spill] sm:$0xff] }
 0x67e   :  { %2024 = vmatpush1.bf16.msra.mxu0 %v6075_v4  ;;  %2065 = vmatpush1.bf16.msra.mxu1 %v6081_v15  ;;  %v8105_v4 = vld [vmem:[#allocation51_spill] sm:$0xff]  ;;  %v8106_v15 = vld [vmem:[#allocation50_spill] sm:$0xff] }
 0x67f   :  { %2025 = vmatprep.subr.bf16.mxu0 %v6087_v55  ;;  %2066 = vmatprep.subr.bf16.mxu1 %v6093_v58  ;;  %v8107_v55 = vld [vmem:[#allocation5_spill] sm:$0xff]  ;;  %v8108_v58 = vld [vmem:[#allocation6_spill] sm:$0xff] }
 0x682   :  { %2026 = vmatpush1.bf16.msra.mxu0 %v8095_v59  ;;  %2067 = vmatpush1.bf16.msra.mxu1 %v8096_v12 }
 0x683   :  { %2027 = vmatprep.subr.bf16.mxu0 %v8097_v54  ;;  %2068 = vmatprep.subr.bf16.mxu1 %v8098_v60  ;;  %v8115_v54 = vld [vmem:[#allocation42_spill] sm:$0xff] }
 0x684   :  { %v1889_v60 = vrot.slane %v8115_v54, 2 }
 0x686   :  { %2028 = vmatpush1.bf16.msra.mxu0 %v8099_v61  ;;  %2069 = vmatpush1.bf16.msra.mxu1 %v8100_v9  ;;  %v8116_v61 = vld [vmem:[#allocation43_spill] sm:$0xff] }
 0x687   :  { %2029 = vmatprep.subr.bf16.mxu0 %v8101_v13  ;;  %2070 = vmatprep.subr.bf16.mxu1 %v8102_v62  ;;  %v1891_v9 = vrot.slane %v8116_v61, 2 }
 0x68a   :  { %2030 = vmatpush1.bf16.msra.mxu0 %v8103_v6  ;;  %2071 = vmatpush1.bf16.msra.mxu1 %v8104_v52  ;;  %v8117_v6 = vld [vmem:[#allocation38_spill] sm:$0xff] }
 0x68b   :  { %2031 = vmatprep.subr.bf16.mxu0 %v8105_v4  ;;  %2072 = vmatprep.subr.bf16.mxu1 %v8106_v15  ;;  %v1796_v52 = vrot.slane %v8117_v6, 4 }
 0x68e   :  { %2032 = vmatpush1.bf16.msra.mxu0 %v8107_v55  ;;  %2073 = vmatpush1.bf16.msra.mxu1 %v8108_v58  ;;  %v1890_v55 = vrot.slane %v8063_v11, 2 }
 0x68f   :  { %2033 = vmatprep.subr.bf16.mxu0 %v8109_v21  ;;  %2074 = vmatprep.subr.bf16.mxu1 %v8110_v2 }
 0x692   :  { %2034 = vmatpush1.bf16.msra.mxu0 %v8111_v17  ;;  %2075 = vmatpush1.bf16.msra.mxu1 %v8112_v26  ;;  %v1797_v17 = vrot.slane %v8065_v10, 4 }
 0x693   :  { %2104 = vmatprep.subr.bf16.mxu0 %v8113_v57  ;;  %2145 = vmatprep.subr.bf16.mxu1 %v8114_v47  ;;  %v1798_v47 = vrot.slane %v8066_v0, 4 }
 0x715   :  { %v1838_v39 = vpop.f32.mrf.mxu0  ;;  %v1879_v38 = vpop.f32.mrf.mxu1 }
 0x716   :  { %v1839_v2 = vadd.f32 %v1838_v39, %v1796_v52  ;;  %v1892_v52 = vrot.slane %v8067_v34, 2 }
 0x717   :  { %v1840_v36 = vpop.f32.mrf.mxu0  ;;  %v1881_v37 = vpop.f32.mrf.mxu1 }
 0x719   :  { %v1842_v42 = vpop.f32.mrf.mxu0  ;;  %v1883_v45 = vpop.f32.mrf.mxu1 }
 0x71b   :  { %v1843_v59 = vpop.f32.mrf.mxu0  ;;  %v1884_v12 = vpop.f32.mrf.mxu1 }
 0x71c   :  { %v1841_v59 = vadd.f32 %v1840_v36, %v1797_v17 }
 0x735   :  { %v1931_v13 = vpop.f32.mrf.mxu0  ;;  %v1972_v62 = vpop.f32.mrf.mxu1 }
 0x736   :  { %v1932_v4 = vadd.f32 %v1931_v13, %v1889_v60  ;;  %v1973_v15 = vadd.f32 %v1972_v62, %v1891_v9  ;;  %v1880_v13 = vadd.f32 %v1879_v38, %v1798_v47 }
 0x737   :  { %v1933_v58 = vpop.f32.mrf.mxu0  ;;  %v1974_v21 = vpop.f32.mrf.mxu1 }
 0x738   :  { %v1983_v26 = vrot.slane %v1932_v4, 6  ;;  %v1934_v57 = vadd.f32 %v1933_v58, %v1890_v55  ;;  %v1985_v49 = vrot.slane %v1973_v15, 6  ;;  %v1975_v4 = vadd.f32 %v1974_v21, %v1892_v52  ;;  %v2285_v52 = vld [vmem:[%s7726_s5 + $0xe0] sm:$0xff] }
 0x739   :  { %v1935_v42 = vpop.f32.mrf.mxu0  ;;  %v1976_v45 = vpop.f32.mrf.mxu1  ;;  %v1799_v55 = vrot.slane %v8068_v19, 4 }
 0x73a   :  { %v1991_v12 = vsel %vm328_vm1, %v1839_v2, %v1983_v26  ;;  %v1984_v61 = vrot.slane %v1934_v57, 6  ;;  %v1993_v39 = vsel %vm328_vm1, %v1880_v13, %v1985_v49  ;;  %v1986_v36 = vrot.slane %v1975_v4, 6  ;;  %v2282_v4 = vld [vmem:[%s7726_s5 + $0xc8] sm:$0xff] }
 0x73b   :  { %4956 = vtanh.f32 %v1991_v12  ;;  %v1936_v60 = vpop.f32.mrf.mxu0  ;;  %v1977_v9 = vpop.f32.mrf.mxu1  ;;  %v1882_v58 = vadd.f32 %v1881_v37, %v1799_v55 }
 0x73c   :  { %v1992_v62 = vsel %vm328_vm1, %v1841_v59, %v1984_v61 }
 0x73d   :  { %4958 = vtanh.f32 %v1992_v62  ;;  %v1994_v15 = vsel %vm328_vm1, %v1882_v58, %v1986_v36  ;;  %v2286_v36 = vld [vmem:[%s7726_s5 + $0xe8] sm:$0xff] }
 0x73e   :  { %4960 = vtanh.f32 %v1993_v39  ;;  %v2281_v39 = vld [vmem:[%s7726_s5 + $0xc0] sm:$0xff] }
 0x73f   :  { %4962 = vtanh.f32 %v1994_v15  ;;  %v4523_v55 = vcombine.high %v2281_v39, %v2285_v52  ;;  %v4522_v58 = vcombine.low %v2281_v39, %v2285_v52  ;;  %v4525_v15 = vcombine.high %v2282_v4, %v2286_v36 }
 0x748   :  { %v4957_v2 = vpop.eup %4956 }
 0x749   :  { %v1999_v17 = vmul.f32 0.5, %v4957_v2  ;;  %v4524_v2 = vcombine.low %v2282_v4, %v2286_v36  ;;  %v2353_v4 = vld [vmem:[%s7726_s5 + $0x300] sm:$0xff]  ;;  %v2354_v36 = vld [vmem:[%s7726_s5 + $0x308] sm:$0xff] }
 0x74a   :  { %v4959_v26 = vpop.eup %4958 }
 0x74b   :  { %v2000_v57 = vadd.f32 0.5, %v1999_v17  ;;  %v2001_v38 = vmul.f32 0.5, %v4959_v26  ;;  %v4961_v47 = vpop.eup %4960  ;;  %v2273_v17 = vld [vmem:[%s7726_s5 + $0x80] sm:$0xff] }
 0x74c   :  { %v4963_v21 = vpop.eup %4962  ;;  %v2277_v26 = vld [vmem:[%s7726_s5 + $0xa0] sm:$0xff] }
 0x74d   :  { %v2002_v61 = vadd.f32 0.5, %v2001_v38  ;;  %v2006_v42 = vmul.f32 %v4961_v47, %v2000_v57  ;;  %v2003_v59 = vmul.f32 0.5, %v4963_v21  ;;  %v2274_v57 = vld [vmem:[%s7726_s5 + $0x88] sm:$0xff]  ;;  %v4515_v38 = vcombine.high %v2273_v17, %v2277_v26  ;;  %v2265_v21 = vld [vmem:[%s7726_s5 + $0x40] sm:$0xff] }
 0x74e   :  { %v4514_v47 = vcombine.low %v2273_v17, %v2277_v26 }
 0x74f   :  { %v2005_v49 = vmul.f32 %v2002_v61, %v6472_v50  ;;  %v2004_v37 = vadd.f32 0.5, %v2003_v59  ;;  %v2302_v50 = vld [vmem:[%s7726_s5 + $0x168] sm:$0xff]  ;;  %v2269_v59 = vld [vmem:[%s7726_s5 + $0x60] sm:$0xff] }
 0x750   :  { %v2278_v61 = vld [vmem:[%s7726_s5 + $0xa8] sm:$0xff] }
 0x751   :  { %v6560_v45 = vadd.f32 %v2006_v42, %v2005_v49  ;;  %v4516_v49 = vcombine.low %v2274_v57, %v2278_v61  ;;  %v4517_v42 = vcombine.high %v2274_v57, %v2278_v61  ;;  %v2345_v57 = vld [vmem:[%s7726_s5 + $0x2c0] sm:$0xff]  ;;  %v2346_v61 = vld [vmem:[%s7726_s5 + $0x2c8] sm:$0xff] }
 0x753   :  { %4964 = vtanh.f32 %v6560_v45 }
 0x760   :  { %v4965_v12 = vpop.eup %4964 }
 0x761   :  { %v6563_v60 = vmul.f32 %v4965_v12, %v2004_v37  ;;  %v2266_v37 = vld [vmem:[%s7726_s5 + $0x48] sm:$0xff]  ;;  %v4507_v12 = vcombine.high %v2265_v21, %v2269_v59 }
 0x763   :  { %v2010_v9 = vpack.c.bf16 %v6563_v60, %v6563_v60 }
 0x765   :  { %2052 = vmatmul.mubr.bf16.vlgmr.msra.gmra.mxu0 %v2010_v9  ;;  %2093 = vmatmul.mubr.bf16.vlgmr.msra.gmra.mxu1 %v2010_v9 }
 0x766   :  { %2105 = vmatpush1.bf16.msra.mxu0 %v6243_v30  ;;  %2146 = vmatpush1.bf16.msra.mxu1 %v6249_v7  ;;  %v2102_v30 = vrot.slane %v2010_v9, 1  ;;  %v2313_v7 = vld [vmem:[%s7726_s5 + $0x1c0] sm:$0xff]  ;;  %v2270_v9 = vld [vmem:[%s7726_s5 + $0x68] sm:$0xff] }
 0x767   :  { %2106 = vmatprep.subr.bf16.mxu0 %v6255_v8  ;;  %2147 = vmatprep.subr.bf16.mxu1 %v6261_v20  ;;  %v2317_v8 = vld [vmem:[%s7726_s5 + $0x1e0] sm:$0xff]  ;;  %v2314_v20 = vld [vmem:[%s7726_s5 + $0x1c8] sm:$0xff] }
 0x768   :  { %2136 = vmatprep.mubr.bf16.mxu0 %v7947_v53  ;;  %2177 = vmatprep.mubr.bf16.mxu1 %v7947_v53 }
 0x76a   :  { %2107 = vmatpush1.bf16.msra.mxu0 %v6269_v43  ;;  %2148 = vmatpush1.bf16.msra.mxu1 %v6275_v32  ;;  %v4554_v43 = vcombine.low %v2313_v7, %v2317_v8  ;;  %v4555_v32 = vcombine.high %v2313_v7, %v2317_v8  ;;  %v4508_v7 = vcombine.low %v2266_v37, %v2270_v9 }
 0x76b   :  { %2108 = vmatprep.subr.bf16.mxu0 %v6281_v14  ;;  %2149 = vmatprep.subr.bf16.mxu1 %v6287_v24  ;;  %v2318_v14 = vld [vmem:[%s7726_s5 + $0x1e8] sm:$0xff]  ;;  %v2305_v24 = vld [vmem:[%s7726_s5 + $0x180] sm:$0xff]  ;;  %v4509_v8 = vcombine.high %v2266_v37, %v2270_v9 }
 0x76c   :  { %v2337_v37 = vld [vmem:[%s7726_s5 + $0x280] sm:$0xff]  ;;  %v2338_v9 = vld [vmem:[%s7726_s5 + $0x288] sm:$0xff] }
 0x76e   :  { %2109 = vmatpush1.bf16.msra.mxu0 %v6293_v31  ;;  %2150 = vmatpush1.bf16.msra.mxu1 %v6299_v56  ;;  %v2309_v31 = vld [vmem:[%s7726_s5 + $0x1a0] sm:$0xff]  ;;  %v4556_v56 = vcombine.low %v2314_v20, %v2318_v14 }
 0x76f   :  { %2110 = vmatprep.subr.bf16.mxu0 %v6305_v18  ;;  %2151 = vmatprep.subr.bf16.mxu1 %v6311_v29  ;;  %v4557_v18 = vcombine.high %v2314_v20, %v2318_v14  ;;  %v4547_v29 = vcombine.high %v2305_v24, %v2309_v31  ;;  %v2257_v20 = vld [vmem:[%s7726_s5] sm:$0xff] }
 0x772   :  { %2111 = vmatpush1.bf16.msra.mxu0 %v6317_v44  ;;  %2152 = vmatpush1.bf16.msra.mxu1 %v6323_v27  ;;  %v2306_v44 = vld [vmem:[%s7726_s5 + $0x188] sm:$0xff] }
 0x773   :  { %2112 = vmatprep.subr.bf16.mxu0 %v6329_v5  ;;  %2153 = vmatprep.subr.bf16.mxu1 %v8083_v40  ;;  %v2310_v27 = vld [vmem:[%s7726_s5 + $0x1a8] sm:$0xff]  ;;  %v2297_v5 = vld [vmem:[%s7726_s5 + $0x140] sm:$0xff]  ;;  %v4546_v40 = vcombine.low %v2305_v24, %v2309_v31 }
 0x774   :  { %v2262_v24 = vld [vmem:[%s7726_s5 + $0x28] sm:$0xff] }
 0x776   :  { %2113 = vmatpush1.bf16.msra.mxu0 %v8084_v51  ;;  %2154 = vmatpush1.bf16.msra.mxu1 %v8085_v25  ;;  %v4548_v51 = vcombine.low %v2306_v44, %v2310_v27 }
 0x777   :  { %2114 = vmatprep.subr.bf16.mxu0 %v8086_v28  ;;  %2155 = vmatprep.subr.bf16.mxu1 %v8087_v48 }
 0x77a   :  { %2115 = vmatpush1.bf16.msra.mxu0 %v8088_v46  ;;  %2156 = vmatpush1.bf16.msra.mxu1 %v8089_v3  ;;  %v2289_v3 = vld [vmem:[%s7726_s5 + $0x100] sm:$0xff] }
 0x77b   :  { %2116 = vmatprep.subr.bf16.mxu0 %v8090_v33  ;;  %2157 = vmatprep.subr.bf16.mxu1 %v8091_v41  ;;  %v2293_v33 = vld [vmem:[%s7726_s5 + $0x120] sm:$0xff]  ;;  %v2290_v41 = vld [vmem:[%s7726_s5 + $0x108] sm:$0xff] }
 0x77e   :  { %2117 = vmatpush1.bf16.msra.mxu0 %v8092_v63  ;;  %2158 = vmatpush1.bf16.msra.mxu1 %v8093_v35  ;;  %v4531_v63 = vcombine.high %v2289_v3, %v2293_v33  ;;  %v2294_v35 = vld [vmem:[%s7726_s5 + $0x128] sm:$0xff] }
 0x77f   :  { %2118 = vmatprep.subr.bf16.mxu0 %v8094_v1  ;;  %2159 = vmatprep.subr.bf16.mxu1 %v6407_v16  ;;  %v4549_v16 = vcombine.high %v2306_v44, %v2310_v27  ;;  %v4530_v1 = vcombine.low %v2289_v3, %v2293_v33  ;;  %v4532_v13 = vcombine.low %v2290_v41, %v2294_v35  ;;  %v2381_v44 = vld [vmem:[%s7726_s5 + $0x3e0] sm:$0xff]  ;;  %v2378_v27 = vld [vmem:[%s7726_s5 + $0x3c8] sm:$0xff] }
 0x780   :  { %v4533_v62 = vcombine.high %v2290_v41, %v2294_v35  ;;  %v2361_v41 = vld [vmem:[%s7726_s5 + $0x340] sm:$0xff]  ;;  %v2362_v35 = vld [vmem:[%s7726_s5 + $0x348] sm:$0xff] }
 0x782   :  { %2119 = vmatpush1.bf16.msra.mxu0 %v6413_v23  ;;  %2160 = vmatpush1.bf16.msra.mxu1 %v6419_v22  ;;  %v2301_v23 = vld [vmem:[%s7726_s5 + $0x160] sm:$0xff]  ;;  %v2298_v22 = vld [vmem:[%s7726_s5 + $0x148] sm:$0xff] }
 0x783   :  { %3067 = vmatprep.subr.bf16.mxu0 %v4555_v32  ;;  %3110 = vmatprep.subr.bf16.mxu1 %v4557_v18  ;;  %v4539_v25 = vcombine.high %v2297_v5, %v2301_v23  ;;  %v4541_v28 = vcombine.high %v2298_v22, %v2302_v50  ;;  %v4538_v48 = vcombine.low %v2297_v5, %v2301_v23  ;;  %v2258_v32 = vld [vmem:[%s7726_s5 + $0x8] sm:$0xff] }
 0x784   :  { %v4540_v46 = vcombine.low %v2298_v22, %v2302_v50  ;;  %v4501_v18 = vcombine.high %v2258_v32, %v2262_v24 }
 0x785   :  { %2137 = vmatmul.mubr.bf16.vlgmr.msra.gmra.mxu0 %v2102_v30  ;;  %2178 = vmatmul.mubr.bf16.vlgmr.msra.gmra.mxu1 %v2102_v30  ;;  %v4506_v30 = vcombine.low %v2265_v21, %v2269_v59 }
 0x786   :  { %3068 = vmatpush1.bf16.msra.mxu0 %v4554_v43  ;;  %3111 = vmatpush1.bf16.msra.mxu1 %v4556_v56  ;;  %v2261_v43 = vld [vmem:[%s7726_s5 + $0x20] sm:$0xff]  ;;  %v4500_v56 = vcombine.low %v2258_v32, %v2262_v24  ;;  %v2330_v24 = vld [vmem:[%s7726_s5 + $0x248] sm:$0xff] }
 0x787   :  { %3069 = vmatprep.subr.bf16.mxu0 %v4547_v29  ;;  %3112 = vmatprep.subr.bf16.mxu1 %v4549_v16  ;;  %v4499_v14 = vcombine.high %v2257_v20, %v2261_v43  ;;  %v4498_v31 = vcombine.low %v2257_v20, %v2261_v43  ;;  %v2377_v29 = vld [vmem:[%s7726_s5 + $0x3c0] sm:$0xff]  ;;  %v2382_v16 = vld [vmem:[%s7726_s5 + $0x3e8] sm:$0xff] }
 0x788   :  { %v4619_v5 = vcombine.high %v2377_v29, %v2381_v44  ;;  %v4618_v23 = vcombine.low %v2377_v29, %v2381_v44  ;;  %v4620_v22 = vcombine.low %v2378_v27, %v2382_v16  ;;  %v4621_v50 = vcombine.high %v2378_v27, %v2382_v16  ;;  %v2329_v32 = vld [vmem:[%s7726_s5 + $0x240] sm:$0xff]  ;;  %v2322_v16 = vld [vmem:[%s7726_s5 + $0x208] sm:$0xff] }
 0x789   :  { %v2321_v27 = vld [vmem:[%s7726_s5 + $0x200] sm:$0xff] }
 0x78a   :  { %3070 = vmatpush1.bf16.msra.mxu0 %v4546_v40  ;;  %3113 = vmatpush1.bf16.msra.mxu1 %v4548_v51  ;;  %v2369_v40 = vld [vmem:[%s7726_s5 + $0x380] sm:$0xff] }
 0x78b   :  { %3071 = vmatprep.subr.bf16.mxu0 %v4539_v25  ;;  %3114 = vmatprep.subr.bf16.mxu1 %v4541_v28  ;;  %v2373_v51 = vld [vmem:[%s7726_s5 + $0x3a0] sm:$0xff]  ;;  %v2370_v25 = vld [vmem:[%s7726_s5 + $0x388] sm:$0xff] }
 0x78c   :  { %v4611_v28 = vcombine.high %v2369_v40, %v2373_v51 }
 0x78e   :  { %3072 = vmatpush1.bf16.msra.mxu0 %v4538_v48  ;;  %3115 = vmatpush1.bf16.msra.mxu1 %v4540_v46  ;;  %v2374_v48 = vld [vmem:[%s7726_s5 + $0x3a8] sm:$0xff]  ;;  %v4610_v46 = vcombine.low %v2369_v40, %v2373_v51 }
 0x78f   :  { %3073 = vmatprep.subr.bf16.mxu0 %v4531_v63  ;;  %3116 = vmatprep.subr.bf16.mxu1 %v4533_v62  ;;  %v4612_v3 = vcombine.low %v2370_v25, %v2374_v48  ;;  %v4613_v33 = vcombine.high %v2370_v25, %v2374_v48  ;;  %v2365_v63 = vld [vmem:[%s7726_s5 + $0x360] sm:$0xff]  ;;  %v6794_v25 = vld [vmem:[%s7726_s5 + $0x1d0] sm:$0xff]  ;;  %v6804_v48 = vld [vmem:[%s7726_s5 + $0x1d8] sm:$0xff] }
 0x790   :  { %v4602_v62 = vcombine.low %v2361_v41, %v2365_v63 }
 0x792   :  { %3074 = vmatpush1.bf16.msra.mxu0 %v4530_v1  ;;  %3117 = vmatpush1.bf16.msra.mxu1 %v4532_v13  ;;  %v4603_v1 = vcombine.high %v2361_v41, %v2365_v63  ;;  %v2366_v13 = vld [vmem:[%s7726_s5 + $0x368] sm:$0xff] }
 0x793   :  { %3075 = vmatprep.subr.bf16.mxu0 %v4523_v55  ;;  %3118 = vmatprep.subr.bf16.mxu1 %v4525_v15  ;;  %v4604_v39 = vcombine.low %v2362_v35, %v2366_v13  ;;  %v4605_v52 = vcombine.high %v2362_v35, %v2366_v13  ;;  %v2357_v55 = vld [vmem:[%s7726_s5 + $0x320] sm:$0xff] }
 0x794   :  { %v4594_v15 = vcombine.low %v2353_v4, %v2357_v55 }
 0x796   :  { %3076 = vmatpush1.bf16.msra.mxu0 %v4522_v58  ;;  %3119 = vmatpush1.bf16.msra.mxu1 %v4524_v2  ;;  %v4595_v58 = vcombine.high %v2353_v4, %v2357_v55  ;;  %v2358_v2 = vld [vmem:[%s7726_s5 + $0x328] sm:$0xff] }
 0x797   :  { %3077 = vmatprep.subr.bf16.mxu0 %v4515_v38  ;;  %3120 = vmatprep.subr.bf16.mxu1 %v4517_v42  ;;  %v4596_v17 = vcombine.low %v2354_v36, %v2358_v2  ;;  %v4597_v26 = vcombine.high %v2354_v36, %v2358_v2  ;;  %v2349_v38 = vld [vmem:[%s7726_s5 + $0x2e0] sm:$0xff]  ;;  %v2011_v2 = vrot.slane %v8117_v6, 6 }
 0x798   :  { %v4586_v42 = vcombine.low %v2345_v57, %v2349_v38 }
 0x79a   :  { %3078 = vmatpush1.bf16.msra.mxu0 %v4514_v47  ;;  %3121 = vmatpush1.bf16.msra.mxu1 %v4516_v49  ;;  %v4587_v47 = vcombine.high %v2345_v57, %v2349_v38  ;;  %v2350_v49 = vld [vmem:[%s7726_s5 + $0x2e8] sm:$0xff] }
 0x79b   :  { %3079 = vmatprep.subr.bf16.mxu0 %v4507_v12  ;;  %3122 = vmatprep.subr.bf16.mxu1 %v4509_v8  ;;  %v4588_v21 = vcombine.low %v2346_v61, %v2350_v49  ;;  %v4589_v59 = vcombine.high %v2346_v61, %v2350_v49  ;;  %v2341_v12 = vld [vmem:[%s7726_s5 + $0x2a0] sm:$0xff] }
 0x79c   :  { %v4578_v8 = vcombine.low %v2337_v37, %v2341_v12 }
 0x79e   :  { %3080 = vmatpush1.bf16.msra.mxu0 %v4506_v30  ;;  %3123 = vmatpush1.bf16.msra.mxu1 %v4508_v7  ;;  %v4579_v30 = vcombine.high %v2337_v37, %v2341_v12  ;;  %v2342_v7 = vld [vmem:[%s7726_s5 + $0x2a8] sm:$0xff] }
 0x79f   :  { %3081 = vmatprep.subr.bf16.mxu0 %v4499_v14  ;;  %3124 = vmatprep.subr.bf16.mxu1 %v4501_v18  ;;  %v4580_v20 = vcombine.low %v2338_v9, %v2342_v7  ;;  %v4581_v43 = vcombine.high %v2338_v9, %v2342_v7  ;;  %v2333_v14 = vld [vmem:[%s7726_s5 + $0x260] sm:$0xff] }
 0x7a0   :  { %v4570_v18 = vcombine.low %v2329_v32, %v2333_v14 }
 0x7a2   :  { %3082 = vmatpush1.bf16.msra.mxu0 %v4498_v31  ;;  %3125 = vmatpush1.bf16.msra.mxu1 %v4500_v56  ;;  %v4571_v31 = vcombine.high %v2329_v32, %v2333_v14  ;;  %v2334_v56 = vld [vmem:[%s7726_s5 + $0x268] sm:$0xff] }
 0x7a3   :  { %3083 = vmatprep.subr.bf16.mxu0 %v4619_v5  ;;  %3126 = vmatprep.subr.bf16.mxu1 %v4621_v50  ;;  %v4572_v29 = vcombine.low %v2330_v24, %v2334_v56  ;;  %v4573_v44 = vcombine.high %v2330_v24, %v2334_v56  ;;  %v2325_v5 = vld [vmem:[%s7726_s5 + $0x220] sm:$0xff]  ;;  %v2326_v50 = vld [vmem:[%s7726_s5 + $0x228] sm:$0xff] }
 0x7a4   :  { %v4564_v40 = vcombine.low %v2322_v16, %v2326_v50  ;;  %v4565_v51 = vcombine.high %v2322_v16, %v2326_v50 }
 0x7a6   :  { %3084 = vmatpush2.bf16.msra.mxu0 %v4618_v23  ;;  %3127 = vmatpush2.bf16.msra.mxu1 %v4620_v22  ;;  %v4562_v23 = vcombine.low %v2321_v27, %v2325_v5  ;;  %v4563_v22 = vcombine.high %v2321_v27, %v2325_v5 }
 0x7a7   :  { %3085 = vmatprep.subr.bf16.mxu0 %v4611_v28  ;;  %3128 = vmatprep.subr.bf16.mxu1 %v4613_v33  ;;  %v6799_v28 = vld [vmem:[%s7726_s5 + $0x1f0] sm:$0xff] }
 0x7a8   :  { %v4558_v33 = vcombine.low %v6794_v25, %v6799_v28 }
 0x7aa   :  { %3086 = vmatpush2.bf16.msra.mxu0 %v4610_v46  ;;  %3129 = vmatpush2.bf16.msra.mxu1 %v4612_v3  ;;  %v4559_v46 = vcombine.high %v6794_v25, %v6799_v28  ;;  %v6811_v3 = vld [vmem:[%s7726_s5 + $0x1f8] sm:$0xff]  ;;  %v2295_v25 = vld [vmem:[%s7726_s5 + $0x130] sm:$0xff] }
 0x7ab   :  { %3087 = vmatprep.subr.bf16.mxu0 %v4603_v1  ;;  %3130 = vmatprep.subr.bf16.mxu1 %v4605_v52  ;;  %v4560_v41 = vcombine.low %v6804_v48, %v6811_v3  ;;  %v4561_v63 = vcombine.high %v6804_v48, %v6811_v3  ;;  %v2292_v28 = vld [vmem:[%s7726_s5 + $0x118] sm:$0xff] }
 0x7ac   :  { %v2296_v48 = vld [vmem:[%s7726_s5 + $0x138] sm:$0xff] }
 0x7ae   :  { %3088 = vmatpush2.bf16.msra.mxu0 %v4602_v62  ;;  %3131 = vmatpush2.bf16.msra.mxu1 %v4604_v39 }
 0x7af   :  { %3089 = vmatprep.subr.bf16.mxu0 %v4595_v58  ;;  %3132 = vmatprep.subr.bf16.mxu1 %v4597_v26 }
 0x7b2   :  { %3090 = vmatpush2.bf16.msra.mxu0 %v4594_v15  ;;  %3133 = vmatpush2.bf16.msra.mxu1 %v4596_v17  ;;  %v8118_v17 = vld [vmem:[#allocation43_spill] sm:$0xff] }
 0x7b3   :  { %3091 = vmatprep.subr.bf16.mxu0 %v4587_v47  ;;  %3134 = vmatprep.subr.bf16.mxu1 %v4589_v59  ;;  %v2012_v47 = vrot.slane %v8065_v10, 6 }
 0x7b6   :  { %3092 = vmatpush2.bf16.msra.mxu0 %v4586_v42  ;;  %3135 = vmatpush2.bf16.msra.mxu1 %v4588_v21  ;;  %v2013_v21 = vrot.slane %v8066_v0, 6  ;;  %v2014_v0 = vrot.slane %v8068_v19, 6  ;;  %v8119_v19 = vld [vmem:[#allocation26_spill] sm:$0xff] }
 0x7b7   :  { %3093 = vmatprep.subr.bf16.mxu0 %v4579_v30  ;;  %3136 = vmatprep.subr.bf16.mxu1 %v4581_v43  ;;  %v2227_v50 = vrot.slane %v8119_v19, 6  ;;  %v2272_v19 = vld [vmem:[%s7726_s5 + $0x78] sm:$0xff] }
 0x7ba   :  { %3094 = vmatpush2.bf16.msra.mxu0 %v4578_v8  ;;  %3137 = vmatpush2.bf16.msra.mxu1 %v4580_v20 }
 0x7bb   :  { %3095 = vmatprep.subr.bf16.mxu0 %v4571_v31  ;;  %3138 = vmatprep.subr.bf16.mxu1 %v4573_v44 }
 0x7be   :  { %3096 = vmatpush2.bf16.msra.mxu0 %v4570_v18  ;;  %3139 = vmatpush2.bf16.msra.mxu1 %v4572_v29 }
 0x7bf   :  { %3097 = vmatprep.subr.bf16.mxu0 %v4563_v22  ;;  %3140 = vmatprep.subr.bf16.mxu1 %v4565_v51 }
 0x7c2   :  { %3098 = vmatpush2.bf16.msra.mxu0 %v4562_v23  ;;  %3141 = vmatpush2.bf16.msra.mxu1 %v4564_v40 }
 0x7c3   :  { %3153 = vmatprep.subr.bf16.mxu0 %v4559_v46  ;;  %3194 = vmatprep.subr.bf16.mxu1 %v4561_v63  ;;  %v2230_v46 = vrot.slane %v6563_v60, 4 }
 0x825   :  { %v2053_v35 = vpop.f32.mrf.mxu0  ;;  %v2094_v1 = vpop.f32.mrf.mxu1 }
 0x826   :  { %v2054_v61 = vadd.f32 %v2053_v35, %v2011_v2  ;;  %v2095_v8 = vadd.f32 %v2094_v1, %v2013_v21  ;;  %v8120_v1 = vld [vmem:[#allocation13_spill] sm:$0xff] }
 0x827   :  { %v2055_v13 = vpop.f32.mrf.mxu0  ;;  %v2096_v62 = vpop.f32.mrf.mxu1 }
 0x828   :  { %v2056_v12 = vadd.f32 %v2055_v13, %v2012_v47  ;;  %v2097_v32 = vadd.f32 %v2096_v62, %v2014_v0  ;;  %v2240_v13 = vsel %vm328_vm1, %v8120_v1, %v2227_v50  ;;  %v2288_v0 = vld [vmem:[%s7726_s5 + $0xf8] sm:$0xff] }
 0x829   :  { %v2057_v39 = vpop.f32.mrf.mxu0  ;;  %v2098_v52 = vpop.f32.mrf.mxu1  ;;  %v2241_v62 = vsel %vm2236_vm2, %v2240_v13, %v2230_v46  ;;  %v2264_v13 = vld [vmem:[%s7726_s5 + $0x38] sm:$0xff] }
 0x82a   :  { %v8121_v39 = vld [vmem:[#allocation52_spill] sm:$0xff] }
 0x82b   :  { %v2058_v4 = vpop.f32.mrf.mxu0  ;;  %v2099_v55 = vpop.f32.mrf.mxu1  ;;  %v2247_v52 = vrot.slane %v8121_v39, 4 }
 0x845   :  { %v2138_v36 = vpop.f32.mrf.mxu0  ;;  %v2179_v58 = vpop.f32.mrf.mxu1 }
 0x846   :  { %v2139_v15 = vadd.f32 %v2138_v36, %v8115_v54  ;;  %v2180_v26 = vadd.f32 %v2179_v58, %v8118_v17  ;;  %v8122_v58 = vld [vmem:[#allocation53_spill] sm:$0xff] }
 0x847   :  { %v2140_v57 = vpop.f32.mrf.mxu0  ;;  %v2181_v38 = vpop.f32.mrf.mxu1 }
 0x848   :  { %v2190_v49 = vrot.slane %v2139_v15, 6  ;;  %v2141_v42 = vadd.f32 %v2140_v57, %v8063_v11  ;;  %v2192_v6 = vrot.slane %v2180_v26, 6  ;;  %v2182_v11 = vadd.f32 %v2181_v38, %v8067_v34  ;;  %v2307_v15 = vld [vmem:[%s7726_s5 + $0x190] sm:$0xff]  ;;  %v2308_v38 = vld [vmem:[%s7726_s5 + $0x198] sm:$0xff] }
 0x849   :  { %v2142_v59 = vpop.f32.mrf.mxu0  ;;  %v2183_v37 = vpop.f32.mrf.mxu1  ;;  %v8123_v26 = vld [vmem:[#allocation54_spill] sm:$0xff] }
 0x84a   :  { %v2198_v9 = vsel %vm328_vm1, %v2054_v61, %v2190_v49  ;;  %v2191_v30 = vrot.slane %v2141_v42, 6  ;;  %v2200_v10 = vsel %vm328_vm1, %v2095_v8, %v2192_v6  ;;  %v2193_v43 = vrot.slane %v2182_v11, 6  ;;  %v2312_v61 = vld [vmem:[%s7726_s5 + $0x1b8] sm:$0xff]  ;;  %v2299_v49 = vld [vmem:[%s7726_s5 + $0x150] sm:$0xff] }
 0x84b   :  { %4966 = vtanh.f32 %v2198_v9  ;;  %v2143_v54 = vpop.f32.mrf.mxu0  ;;  %v2184_v7 = vpop.f32.mrf.mxu1  ;;  %v2254_v57 = vsel %vm2238_vm3, %v8123_v26, %v2247_v52  ;;  %v4553_v21 = vcombine.high %v2308_v38, %v2312_v61  ;;  %v2303_v59 = vld [vmem:[%s7726_s5 + $0x170] sm:$0xff]  ;;  %v2300_v37 = vld [vmem:[%s7726_s5 + $0x158] sm:$0xff]  ;;  %v4552_v6 = vcombine.low %v2308_v38, %v2312_v61 }
 0x84c   :  { %v2199_v20 = vsel %vm328_vm1, %v2056_v12, %v2191_v30  ;;  %v2201_v24 = vsel %vm328_vm1, %v2097_v32, %v2193_v43  ;;  %v2304_v12 = vld [vmem:[%s7726_s5 + $0x178] sm:$0xff]  ;;  %v4543_v30 = vcombine.high %v2299_v49, %v2303_v59  ;;  %v2291_v7 = vld [vmem:[%s7726_s5 + $0x110] sm:$0xff]  ;;  %v4542_v3 = vcombine.low %v2299_v49, %v2303_v59 }
 0x84d   :  { %4968 = vtanh.f32 %v2199_v20  ;;  %v4545_v54 = vcombine.high %v2300_v37, %v2304_v12  ;;  %v4537_v8 = vcombine.high %v2292_v28, %v2296_v48  ;;  %v2283_v20 = vld [vmem:[%s7726_s5 + $0xd0] sm:$0xff]  ;;  %v2284_v11 = vld [vmem:[%s7726_s5 + $0xd8] sm:$0xff]  ;;  %v4534_v43 = vcombine.low %v2291_v7, %v2295_v25 }
 0x84e   :  { %4970 = vtanh.f32 %v2200_v10  ;;  %v2287_v10 = vld [vmem:[%s7726_s5 + $0xf0] sm:$0xff]  ;;  %v4536_v32 = vcombine.low %v2292_v28, %v2296_v48  ;;  %v2372_v61 = vld [vmem:[%s7726_s5 + $0x398] sm:$0xff] }
 0x84f   :  { %4972 = vtanh.f32 %v2201_v24  ;;  %v4529_v24 = vcombine.high %v2284_v11, %v2288_v0  ;;  %v2375_v38 = vld [vmem:[%s7726_s5 + $0x3b0] sm:$0xff] }
 0x850   :  { %v2355_v28 = vld [vmem:[%s7726_s5 + $0x310] sm:$0xff] }
 0x851   :  { %v2359_v48 = vld [vmem:[%s7726_s5 + $0x330] sm:$0xff] }
 0x858   :  { %v4967_v14 = vpop.eup %4966 }
 0x859   :  { %v2206_v31 = vmul.f32 0.5, %v4967_v14  ;;  %v4527_v14 = vcombine.high %v2283_v20, %v2287_v10 }
 0x85a   :  { %v4969_v56 = vpop.eup %4968 }
 0x85b   :  { %v2207_v18 = vadd.f32 0.5, %v2206_v31  ;;  %v2208_v29 = vmul.f32 0.5, %v4969_v56  ;;  %v4971_v27 = vpop.eup %4970  ;;  %v2275_v31 = vld [vmem:[%s7726_s5 + $0x90] sm:$0xff] }
 0x85c   :  { %v4973_v34 = vpop.eup %4972  ;;  %v2279_v56 = vld [vmem:[%s7726_s5 + $0xb0] sm:$0xff] }
 0x85d   :  { %v2209_v44 = vadd.f32 0.5, %v2208_v29  ;;  %v2213_v16 = vmul.f32 %v4971_v27, %v2207_v18  ;;  %v2210_v22 = vmul.f32 0.5, %v4973_v34  ;;  %v2276_v18 = vld [vmem:[%s7726_s5 + $0x98] sm:$0xff]  ;;  %v4528_v27 = vcombine.low %v2284_v11, %v2288_v0  ;;  %v2271_v34 = vld [vmem:[%s7726_s5 + $0x70] sm:$0xff] }
 0x85e   :  { %v2280_v29 = vld [vmem:[%s7726_s5 + $0xb8] sm:$0xff]  ;;  %v2347_v11 = vld [vmem:[%s7726_s5 + $0x2d0] sm:$0xff] }
 0x85f   :  { %v2212_v5 = vmul.f32 %v2209_v44, %v6560_v45  ;;  %v2211_v40 = vadd.f32 0.5, %v2210_v22  ;;  %v2244_v45 = vrot.slane %v8120_v1, 4  ;;  %v4526_v44 = vcombine.low %v2283_v20, %v2287_v10  ;;  %v2268_v22 = vld [vmem:[%s7726_s5 + $0x58] sm:$0xff]  ;;  %v2351_v0 = vld [vmem:[%s7726_s5 + $0x2f0] sm:$0xff] }
 0x860   :  { %v4513_v46 = vcombine.high %v2268_v22, %v2272_v19  ;;  %v2260_v1 = vld [vmem:[%s7726_s5 + $0x18] sm:$0xff]  ;;  %v4599_v20 = vcombine.high %v2355_v28, %v2359_v48 }
 0x861   :  { %v2214_v23 = vadd.f32 %v2213_v16, %v2212_v5  ;;  %v4519_v5 = vcombine.high %v2275_v31, %v2279_v56  ;;  %v4521_v16 = vcombine.high %v2276_v18, %v2280_v29  ;;  %v4505_v52 = vcombine.high %v2260_v1, %v2264_v13 }
 0x863   :  { %4974 = vtanh.f32 %v2214_v23  ;;  %v2267_v23 = vld [vmem:[%s7726_s5 + $0x50] sm:$0xff] }
 0x870   :  { %v4975_v51 = vpop.eup %4974 }
 0x871   :  { %v2216_v63 = vmul.f32 %v4975_v51, %v2211_v40  ;;  %v4520_v40 = vcombine.low %v2276_v18, %v2280_v29  ;;  %v4511_v51 = vcombine.high %v2267_v23, %v2271_v34  ;;  %v2339_v18 = vld [vmem:[%s7726_s5 + $0x290] sm:$0xff] }
 0x872   :  { %v2343_v29 = vld [vmem:[%s7726_s5 + $0x2b0] sm:$0xff] }
 0x873   :  { %v2233_v35 = vrot.slane %v2216_v63, 2  ;;  %v2259_v63 = vld [vmem:[%s7726_s5 + $0x10] sm:$0xff] }
 0x875   :  { %v2249_v4 = vsel %vm328_vm1, %v2233_v35, %v6563_v60  ;;  %v2242_v55 = vsel %vm2238_vm3, %v2241_v62, %v2233_v35  ;;  %v2311_v60 = vld [vmem:[%s7726_s5 + $0x1b0] sm:$0xff]  ;;  %v4510_v62 = vcombine.low %v2267_v23, %v2271_v34  ;;  %v4583_v23 = vcombine.high %v2339_v18, %v2343_v29 }
 0x876   :  { %v2250_v36 = vsel %vm2236_vm2, %v2249_v4, %v2227_v50  ;;  %v6844_v2 = vpack.c.bf16 %v2242_v55, %v8122_v58  ;;  %v4551_v42 = vcombine.high %v2307_v15, %v2311_v60  ;;  %v4550_v9 = vcombine.low %v2307_v15, %v2311_v60  ;;  %v2263_v35 = vld [vmem:[%s7726_s5 + $0x30] sm:$0xff]  ;;  %v2384_v58 = vld [vmem:[%s7726_s5 + $0x3f8] sm:$0xff] }
 0x877   :  { %v2251_v17 = vsel %vm2238_vm3, %v2250_v36, %v2244_v45  ;;  %v4518_v50 = vcombine.low %v2275_v31, %v2279_v56  ;;  %v4512_v45 = vcombine.low %v2268_v22, %v2272_v19  ;;  %v4503_v39 = vcombine.high %v2259_v63, %v2263_v35  ;;  %v2379_v4 = vld [vmem:[%s7726_s5 + $0x3d0] sm:$0xff]  ;;  %v2380_v36 = vld [vmem:[%s7726_s5 + $0x3d8] sm:$0xff] }
 0x878   :  { %v2256_v47 = vpack.c.bf16 %v2254_v57, %v2251_v17  ;;  %v2383_v55 = vld [vmem:[%s7726_s5 + $0x3f0] sm:$0xff]  ;;  %v4502_v15 = vcombine.low %v2259_v63, %v2263_v35  ;;  %v4504_v17 = vcombine.low %v2260_v1, %v2264_v13  ;;  %v4625_v57 = vcombine.high %v2380_v36, %v2384_v58 }
 0x879   :  { %v4623_v26 = vcombine.high %v2379_v4, %v2383_v55  ;;  %v2371_v60 = vld [vmem:[%s7726_s5 + $0x390] sm:$0xff]  ;;  %v4622_v49 = vcombine.low %v2379_v4, %v2383_v55  ;;  %v4591_v31 = vcombine.high %v2347_v11, %v2351_v0 }
 0x87a   :  { %3099 = vmatprep.mubr.bf16.mxu0 %v2256_v47  ;;  %3142 = vmatprep.mubr.bf16.mxu1 %v2256_v47  ;;  %v2331_v22 = vld [vmem:[%s7726_s5 + $0x250] sm:$0xff] }
 0x87b   :  { %3100 = vmatmul.mubr.bf16.vlgmr.msra.gmra.mxu0 %v6844_v2  ;;  %3143 = vmatmul.mubr.bf16.vlgmr.msra.gmra.mxu1 %v6844_v2  ;;  %v2335_v19 = vld [vmem:[%s7726_s5 + $0x270] sm:$0xff] }
 0x87c   :  { %3154 = vmatpush1.bf16.msra.mxu0 %v4558_v33  ;;  %3195 = vmatpush1.bf16.msra.mxu1 %v4560_v41  ;;  %v4544_v33 = vcombine.low %v2300_v37, %v2304_v12  ;;  %v4535_v41 = vcombine.high %v2291_v7, %v2295_v25  ;;  %v2363_v37 = vld [vmem:[%s7726_s5 + $0x350] sm:$0xff]  ;;  %v4575_v63 = vcombine.high %v2331_v22, %v2335_v19 }
 0x87d   :  { %3185 = vmatprep.mubr.bf16.mxu0 %v2256_v47  ;;  %3226 = vmatprep.mubr.bf16.mxu1 %v2256_v47  ;;  %v2376_v47 = vld [vmem:[%s7726_s5 + $0x3b8] sm:$0xff]  ;;  %v2367_v12 = vld [vmem:[%s7726_s5 + $0x370] sm:$0xff] }
 0x87e   :  { %3155 = vmatprep.subr.bf16.mxu0 %v4551_v42  ;;  %3196 = vmatprep.subr.bf16.mxu1 %v4553_v21  ;;  %v4624_v42 = vcombine.low %v2380_v36, %v2384_v58  ;;  %v4615_v21 = vcombine.high %v2371_v60, %v2375_v38  ;;  %v4617_v59 = vcombine.high %v2372_v61, %v2376_v47  ;;  %v2323_v1 = vld [vmem:[%s7726_s5 + $0x210] sm:$0xff] }
 0x87f   :  { %v4607_v7 = vcombine.high %v2363_v37, %v2367_v12  ;;  %v2327_v13 = vld [vmem:[%s7726_s5 + $0x230] sm:$0xff] }
 0x880   :  { %3156 = vmatpush1.bf16.msra.mxu0 %v4550_v9  ;;  %3197 = vmatpush1.bf16.msra.mxu1 %v4552_v6  ;;  %v2364_v9 = vld [vmem:[%s7726_s5 + $0x358] sm:$0xff]  ;;  %v4567_v4 = vcombine.high %v2323_v1, %v2327_v13  ;;  %v4566_v36 = vcombine.low %v2323_v1, %v2327_v13 }
 0x881   :  { %3157 = vmatprep.subr.bf16.mxu0 %v4543_v30  ;;  %3198 = vmatprep.subr.bf16.mxu1 %v4545_v54  ;;  %v2368_v6 = vld [vmem:[%s7726_s5 + $0x378] sm:$0xff]  ;;  %v4614_v30 = vcombine.low %v2371_v60, %v2375_v38  ;;  %v4616_v54 = vcombine.low %v2372_v61, %v2376_v47  ;;  %v7078_v38 = vld [vmem:[%s7727_s6 + $0xc0] ss:$16 sps:$4 sm:$0xff]   ;;  %v7092_v47 = vld [vmem:[%s7727_s6 + $0xa4] ss:$16 sps:$4 sm:$0xff]  }
 0x882   :  { %v4609_v25 = vcombine.high %v2364_v9, %v2368_v6  ;;  %v7073_v60 = vld [vmem:[%s7727_s6 + $0xcc] ss:$16 sps:$4 sm:$0xff]   ;;  %v7083_v61 = vld [vmem:[%s7727_s6 + $0xc8] ss:$16 sps:$4 sm:$0xff]  }
 0x884   :  { %3158 = vmatpush1.bf16.msra.mxu0 %v4542_v3  ;;  %3199 = vmatpush1.bf16.msra.mxu1 %v4544_v33  ;;  %v2356_v3 = vld [vmem:[%s7726_s5 + $0x318] sm:$0xff] }
 0x885   :  { %3159 = vmatprep.subr.bf16.mxu0 %v4535_v41  ;;  %3200 = vmatprep.subr.bf16.mxu1 %v4537_v8  ;;  %v2360_v33 = vld [vmem:[%s7726_s5 + $0x338] sm:$0xff]  ;;  %v4606_v41 = vcombine.low %v2363_v37, %v2367_v12  ;;  %v4608_v8 = vcombine.low %v2364_v9, %v2368_v6  ;;  %v7126_v12 = vld [vmem:[%s7727_s6 + $0x80] ss:$16 sps:$4 sm:$0xff]   ;;  %v7140_v6 = vld [vmem:[%s7727_s6 + $0x64] ss:$16 sps:$4 sm:$0xff]  }
 0x886   :  { %v4601_v10 = vcombine.high %v2356_v3, %v2360_v33  ;;  %v7121_v37 = vld [vmem:[%s7727_s6 + $0x8c] ss:$16 sps:$4 sm:$0xff]   ;;  %v7131_v9 = vld [vmem:[%s7727_s6 + $0x88] ss:$16 sps:$4 sm:$0xff]  }
 0x888   :  { %3160 = vmatpush1.bf16.msra.mxu0 %v4534_v43  ;;  %3201 = vmatpush1.bf16.msra.mxu1 %v4536_v32  ;;  %v2348_v43 = vld [vmem:[%s7726_s5 + $0x2d8] sm:$0xff] }
 0x889   :  { %3161 = vmatprep.subr.bf16.mxu0 %v4527_v14  ;;  %3202 = vmatprep.subr.bf16.mxu1 %v4529_v24  ;;  %v2352_v32 = vld [vmem:[%s7726_s5 + $0x2f8] sm:$0xff]  ;;  %v4598_v14 = vcombine.low %v2355_v28, %v2359_v48  ;;  %v4600_v24 = vcombine.low %v2356_v3, %v2360_v33  ;;  %v7174_v48 = vld [vmem:[%s7727_s6 + $0x40] ss:$16 sps:$4 sm:$0xff]   ;;  %v7186_v33 = vld [vmem:[%s7727_s6 + $0x24] ss:$16 sps:$4 sm:$0xff]  }
 0x88a   :  { %v4593_v56 = vcombine.high %v2348_v43, %v2352_v32  ;;  %v7165_v28 = vld [vmem:[%s7727_s6 + $0x4c] ss:$16 sps:$4 sm:$0xff]   ;;  %v7179_v3 = vld [vmem:[%s7727_s6 + $0x48] ss:$16 sps:$4 sm:$0xff]  }
 0x88c   :  { %3162 = vmatpush1.bf16.msra.mxu0 %v4526_v44  ;;  %3203 = vmatpush1.bf16.msra.mxu1 %v4528_v27  ;;  %v2340_v44 = vld [vmem:[%s7726_s5 + $0x298] sm:$0xff] }
 0x88d   :  { %3163 = vmatprep.subr.bf16.mxu0 %v4519_v5  ;;  %3204 = vmatprep.subr.bf16.mxu1 %v4521_v16  ;;  %v2344_v27 = vld [vmem:[%s7726_s5 + $0x2b8] sm:$0xff]  ;;  %v4590_v5 = vcombine.low %v2347_v11, %v2351_v0  ;;  %v4592_v16 = vcombine.low %v2348_v43, %v2352_v32  ;;  %v7222_v0 = vld [vmem:[%s7727_s6] ss:$16 sps:$4 sm:$0xff]  }
 0x88e   :  { %v4585_v34 = vcombine.high %v2340_v44, %v2344_v27  ;;  %v7215_v11 = vld [vmem:[%s7727_s6 + $0xc] ss:$16 sps:$4 sm:$0xff]   ;;  %v7227_v43 = vld [vmem:[%s7727_s6 + $0x8] ss:$16 sps:$4 sm:$0xff]   ;;  %v7238_v32 = vld [vmem:[%s7728_s7] sm:$0xff] }
 0x88f   :  { %8124 = vst [vmem:[#allocation27_spill] sm:$0xff] %v7238_v32 }
 0x890   :  { %3164 = vmatpush1.bf16.msra.mxu0 %v4518_v50  ;;  %3205 = vmatpush1.bf16.msra.mxu1 %v4520_v40  ;;  %v2332_v50 = vld [vmem:[%s7726_s5 + $0x258] sm:$0xff] }
 0x891   :  { %3165 = vmatprep.subr.bf16.mxu0 %v4511_v51  ;;  %3206 = vmatprep.subr.bf16.mxu1 %v4513_v46  ;;  %v2336_v40 = vld [vmem:[%s7726_s5 + $0x278] sm:$0xff]  ;;  %v4582_v51 = vcombine.low %v2339_v18, %v2343_v29  ;;  %v4584_v46 = vcombine.low %v2340_v44, %v2344_v27 }
 0x892   :  { %v4577_v35 = vcombine.high %v2332_v50, %v2336_v40 }
 0x894   :  { %3166 = vmatpush1.bf16.msra.mxu0 %v4510_v62  ;;  %3207 = vmatpush1.bf16.msra.mxu1 %v4512_v45  ;;  %v2324_v62 = vld [vmem:[%s7726_s5 + $0x218] sm:$0xff] }
 0x895   :  { %3167 = vmatprep.subr.bf16.mxu0 %v4503_v39  ;;  %3208 = vmatprep.subr.bf16.mxu1 %v4505_v52  ;;  %v2328_v45 = vld [vmem:[%s7726_s5 + $0x238] sm:$0xff]  ;;  %v4574_v39 = vcombine.low %v2331_v22, %v2335_v19  ;;  %v4576_v52 = vcombine.low %v2332_v50, %v2336_v40 }
 0x896   :  { %v4569_v55 = vcombine.high %v2324_v62, %v2328_v45  ;;  %v4568_v58 = vcombine.low %v2324_v62, %v2328_v45 }
 0x898   :  { %3168 = vmatpush1.bf16.msra.mxu0 %v4502_v15  ;;  %3209 = vmatpush1.bf16.msra.mxu1 %v4504_v17  ;;  %v7044_v15 = vld [vmem:[%s7727_s6 + $0xe4] ss:$16 sps:$4 sm:$0xff]   ;;  %v7049_v17 = vld [vmem:[%s7727_s6 + $0xec] ss:$16 sps:$4 sm:$0xff]  }
 0x899   :  { %3169 = vmatprep.subr.bf16.mxu0 %v4623_v26  ;;  %3210 = vmatprep.subr.bf16.mxu1 %v4625_v57  ;;  %v7054_v26 = vld [vmem:[%s7727_s6 + $0xe0] ss:$16 sps:$4 sm:$0xff]   ;;  %v7068_v57 = vld [vmem:[%s7727_s6 + $0xc4] ss:$16 sps:$4 sm:$0xff]  }
 0x89c   :  { %3170 = vmatpush2.bf16.msra.mxu0 %v4622_v49  ;;  %3211 = vmatpush2.bf16.msra.mxu1 %v4624_v42  ;;  %v7097_v49 = vld [vmem:[%s7727_s6 + $0xac] ss:$16 sps:$4 sm:$0xff]   ;;  %v7102_v42 = vld [vmem:[%s7727_s6 + $0xa0] ss:$16 sps:$4 sm:$0xff]  }
 0x89d   :  { %3171 = vmatprep.subr.bf16.mxu0 %v4615_v21  ;;  %3212 = vmatprep.subr.bf16.mxu1 %v4617_v59  ;;  %v7107_v21 = vld [vmem:[%s7727_s6 + $0xa8] ss:$16 sps:$4 sm:$0xff]   ;;  %v7116_v59 = vld [vmem:[%s7727_s6 + $0x84] ss:$16 sps:$4 sm:$0xff]  }
 0x8a0   :  { %3172 = vmatpush2.bf16.msra.mxu0 %v4614_v30  ;;  %3213 = vmatpush2.bf16.msra.mxu1 %v4616_v54  ;;  %v7145_v30 = vld [vmem:[%s7727_s6 + $0x6c] ss:$16 sps:$4 sm:$0xff]   ;;  %v7150_v54 = vld [vmem:[%s7727_s6 + $0x60] ss:$16 sps:$4 sm:$0xff]  }
 0x8a1   :  { %3173 = vmatprep.subr.bf16.mxu0 %v4607_v7  ;;  %3214 = vmatprep.subr.bf16.mxu1 %v4609_v25  ;;  %v7155_v7 = vld [vmem:[%s7727_s6 + $0x68] ss:$16 sps:$4 sm:$0xff]   ;;  %v7160_v25 = vld [vmem:[%s7727_s6 + $0x44] ss:$16 sps:$4 sm:$0xff]  }
 0x8a4   :  { %3174 = vmatpush2.bf16.msra.mxu0 %v4606_v41  ;;  %3215 = vmatpush2.bf16.msra.mxu1 %v4608_v8  ;;  %v7191_v41 = vld [vmem:[%s7727_s6 + $0x2c] ss:$16 sps:$4 sm:$0xff]   ;;  %v7198_v8 = vld [vmem:[%s7727_s6 + $0x20] ss:$16 sps:$4 sm:$0xff]  }
 0x8a5   :  { %3175 = vmatprep.subr.bf16.mxu0 %v4599_v20  ;;  %3216 = vmatprep.subr.bf16.mxu1 %v4601_v10  ;;  %v7203_v20 = vld [vmem:[%s7727_s6 + $0x28] ss:$16 sps:$4 sm:$0xff]   ;;  %v7210_v10 = vld [vmem:[%s7727_s6 + $0x4] ss:$16 sps:$4 sm:$0xff]  }
 0x8a8   :  { %3176 = vmatpush2.bf16.msra.mxu0 %v4598_v14  ;;  %3217 = vmatpush2.bf16.msra.mxu1 %v4600_v24  ;;  %v8125_v14 = vld [vmem:[#allocation37_spill] sm:$0xff] }
 0x8a9   :  { %3177 = vmatprep.subr.bf16.mxu0 %v4591_v31  ;;  %3218 = vmatprep.subr.bf16.mxu1 %v4593_v56  ;;  %v8126_v24 = vsub.s32 0, %v8125_v14  ;;  %v8127_v56 = vsub.s32 1, %v8125_v14  ;;  %v8129_v19 = vsub.s32 3, %v8125_v14 }
 0x8ab   :  { %v2390_v31 = vrot.slane %v7238_v32, %v8126_v24  ;;  %v2394_v18 = vrot.slane %v7238_v32, %v8127_v56  ;;  %v2402_v50 = vrot.slane %v7238_v32, %v8129_v19 }
 0x8ac   :  { %3178 = vmatpush2.bf16.msra.mxu0 %v4590_v5  ;;  %3219 = vmatpush2.bf16.msra.mxu1 %v4592_v16  ;;  %v8128_v5 = vsub.s32 2, %v8125_v14 }
 0x8ad   :  { %3179 = vmatprep.subr.bf16.mxu0 %v4583_v23  ;;  %3220 = vmatprep.subr.bf16.mxu1 %v4585_v34 }
 0x8ae   :  { %v2398_v16 = vrot.slane %v7238_v32, %v8128_v5 }
 0x8b0   :  { %3180 = vmatpush2.bf16.msra.mxu0 %v4582_v51  ;;  %3221 = vmatpush2.bf16.msra.mxu1 %v4584_v46 }
 0x8b1   :  { %3181 = vmatprep.subr.bf16.mxu0 %v4575_v63  ;;  %3222 = vmatprep.subr.bf16.mxu1 %v4577_v35 }
 0x8b4   :  { %3182 = vmatpush2.bf16.msra.mxu0 %v4574_v39  ;;  %3223 = vmatpush2.bf16.msra.mxu1 %v4576_v52 }
 0x8b5   :  { %3183 = vmatprep.subr.bf16.mxu0 %v4567_v4  ;;  %3224 = vmatprep.subr.bf16.mxu1 %v4569_v55 }
 0x8b8   :  { %3184 = vmatpush2.bf16.msra.mxu0 %v4566_v36  ;;  %3225 = vmatpush2.bf16.msra.mxu1 %v4568_v58 }
 0x8b9   :  { %3470 = vmatprep.subr.bf16.mxu0 %v7044_v15  ;;  %3511 = vmatprep.subr.bf16.mxu1 %v7049_v17 }
 0x8bb   :  { %3186 = vmatmul.mubr.bf16.vlgmr.msra.gmra.mxu0 %v6844_v2  ;;  %3227 = vmatmul.mubr.bf16.vlgmr.msra.gmra.mxu1 %v6844_v2  ;;  %v7059_v2 = vld [vmem:[%s7727_s6 + $0xe8] ss:$16 sps:$4 sm:$0xff]  }
 0x8bc   :  { %3502 = vmatprep.mubr.bf16.mxu0 %v7947_v53  ;;  %3543 = vmatprep.mubr.bf16.mxu1 %v7947_v53 }
 0x8bd   :  { %3471 = vmatpush1.bf16.msra.mxu0 %v7054_v26  ;;  %3512 = vmatpush1.bf16.msra.mxu1 %v7059_v2 }
 0x8be   :  { %3472 = vmatprep.subr.bf16.mxu0 %v7068_v57  ;;  %3513 = vmatprep.subr.bf16.mxu1 %v7073_v60 }
 0x8c1   :  { %3473 = vmatpush1.bf16.msra.mxu0 %v7078_v38  ;;  %3514 = vmatpush1.bf16.msra.mxu1 %v7083_v61 }
 0x8c2   :  { %3474 = vmatprep.subr.bf16.mxu0 %v7092_v47  ;;  %3515 = vmatprep.subr.bf16.mxu1 %v7097_v49 }
 0x8c5   :  { %3475 = vmatpush1.bf16.msra.mxu0 %v7102_v42  ;;  %3516 = vmatpush1.bf16.msra.mxu1 %v7107_v21 }
 0x8c6   :  { %3476 = vmatprep.subr.bf16.mxu0 %v7116_v59  ;;  %3517 = vmatprep.subr.bf16.mxu1 %v7121_v37 }
 0x8c9   :  { %3477 = vmatpush1.bf16.msra.mxu0 %v7126_v12  ;;  %3518 = vmatpush1.bf16.msra.mxu1 %v7131_v9 }
 0x8ca   :  { %3478 = vmatprep.subr.bf16.mxu0 %v7140_v6  ;;  %3519 = vmatprep.subr.bf16.mxu1 %v7145_v30 }
 0x8cd   :  { %3479 = vmatpush1.bf16.msra.mxu0 %v7150_v54  ;;  %3520 = vmatpush1.bf16.msra.mxu1 %v7155_v7 }
 0x8ce   :  { %3480 = vmatprep.subr.bf16.mxu0 %v7160_v25  ;;  %3521 = vmatprep.subr.bf16.mxu1 %v7165_v28 }
 0x8d1   :  { %3481 = vmatpush1.bf16.msra.mxu0 %v7174_v48  ;;  %3522 = vmatpush1.bf16.msra.mxu1 %v7179_v3 }
 0x8d2   :  { %3482 = vmatprep.subr.bf16.mxu0 %v7186_v33  ;;  %3523 = vmatprep.subr.bf16.mxu1 %v7191_v41 }
 0x8d5   :  { %3483 = vmatpush1.bf16.msra.mxu0 %v7198_v8  ;;  %3524 = vmatpush1.bf16.msra.mxu1 %v7203_v20 }
 0x8d6   :  { %3484 = vmatprep.subr.bf16.mxu0 %v7210_v10  ;;  %3525 = vmatprep.subr.bf16.mxu1 %v7215_v11 }
 0x8d9   :  { %3485 = vmatpush1.bf16.msra.mxu0 %v7222_v0  ;;  %3526 = vmatpush1.bf16.msra.mxu1 %v7227_v43 }
 0x8da   :  { %3576 = vmatprep.subr.bf16.mxu0 %v7044_v15  ;;  %3617 = vmatprep.subr.bf16.mxu1 %v7049_v17 }
 0x93b   :  { %v3101_v29 = vpop.f32.mrf.mxu0  ;;  %v3144_v44 = vpop.f32.mrf.mxu1 }
 0x93c   :  { %v7246_v27 = vadd.f32 %v3101_v29, %v2390_v31  ;;  %v7257_v46 = vadd.f32 %v3144_v44, %v2398_v16 }
 0x93d   :  { %v3103_v23 = vpop.f32.mrf.mxu0  ;;  %v3146_v34 = vpop.f32.mrf.mxu1 }
 0x93e   :  { %4976 = vtanh.f32 %v7246_v27  ;;  %v7252_v22 = vadd.f32 %v3103_v23, %v2394_v18  ;;  %v7269_v39 = vadd.f32 %v3146_v34, %v2402_v50 }
 0x93f   :  { %v3105_v40 = vpop.f32.mrf.mxu0  ;;  %v3148_v51 = vpop.f32.mrf.mxu1 }
 0x940   :  { %4978 = vtanh.f32 %v7252_v22  ;;  %v7260_v63 = vadd.f32 %v3105_v40, %v2390_v31  ;;  %v7262_v35 = vadd.f32 %v3148_v51, %v2398_v16  ;;  %v8130_v51 = vsub.s32 4, %v8125_v14 }
 0x941   :  { %v3107_v1 = vpop.f32.mrf.mxu0  ;;  %v3150_v13 = vpop.f32.mrf.mxu1  ;;  %4980 = vtanh.f32 %v7257_v46 }
 0x942   :  { %v7264_v62 = vadd.f32 %v3107_v1, %v2394_v18  ;;  %v7266_v45 = vadd.f32 %v3150_v13, %v2402_v50  ;;  %4982 = vtanh.f32 %v7269_v39  ;;  %v2406_v1 = vrot.slane %v7238_v32, %v8130_v51 }
 0x94b   :  { %v4977_v52 = vpop.eup %4976 }
 0x94c   :  { %v3254_v4 = vmul.f32 0.5, %v4977_v52 }
 0x94d   :  { %v4979_v55 = vpop.eup %4978 }
 0x94e   :  { %v3255_v36 = vadd.f32 0.5, %v3254_v4  ;;  %v3256_v58 = vmul.f32 0.5, %v4979_v55  ;;  %v4981_v31 = vpop.eup %4980  ;;  %v8131_v4 = vsub.s32 6, %v8125_v14 }
 0x94f   :  { %v4983_v18 = vpop.eup %4982 }
 0x950   :  { %v3257_v24 = vadd.f32 0.5, %v3256_v58  ;;  %v3261_v29 = vmul.f32 %v4981_v31, %v3255_v36  ;;  %v3258_v5 = vmul.f32 0.5, %v4983_v18  ;;  %v2414_v55 = vrot.slane %v7238_v32, %v8131_v4 }
 0x952   :  { %v3260_v56 = vmul.f32 0.0, %v3257_v24  ;;  %v3259_v16 = vadd.f32 0.5, %v3258_v5 }
 0x954   :  { %v7272_v44 = vadd.f32 %v3261_v29, %v3260_v56 }
 0x956   :  { %4984 = vtanh.f32 %v7272_v44 }
 0x963   :  { %v4985_v23 = vpop.eup %4984 }
 0x964   :  { %v3264_v34 = vmul.f32 %v4985_v23, %v3259_v16 }
 0x966   :  { %v3265_v19 = vpack.c.bf16 %v3264_v34, %v3264_v34 }
 0x968   :  { %3503 = vmatmul.mubr.bf16.vlgmr.msra.gmra.mxu0 %v3265_v19  ;;  %3544 = vmatmul.mubr.bf16.vlgmr.msra.gmra.mxu1 %v3265_v19  ;;  %v3462_v19 = vrot.slane %v7246_v27, 2 }
 0x969   :  { %3577 = vmatpush1.bf16.msra.mxu0 %v7054_v26  ;;  %3618 = vmatpush1.bf16.msra.mxu1 %v7059_v2 }
 0x96a   :  { %3578 = vmatprep.subr.bf16.mxu0 %v7068_v57  ;;  %3619 = vmatprep.subr.bf16.mxu1 %v7073_v60 }
 0x96b   :  { %3608 = vmatprep.mubr.bf16.mxu0 %v7947_v53  ;;  %3649 = vmatprep.mubr.bf16.mxu1 %v7947_v53 }
 0x96d   :  { %3579 = vmatpush1.bf16.msra.mxu0 %v7078_v38  ;;  %3620 = vmatpush1.bf16.msra.mxu1 %v7083_v61 }
 0x96e   :  { %3580 = vmatprep.subr.bf16.mxu0 %v7092_v47  ;;  %3621 = vmatprep.subr.bf16.mxu1 %v7097_v49 }
 0x971   :  { %3581 = vmatpush1.bf16.msra.mxu0 %v7102_v42  ;;  %3622 = vmatpush1.bf16.msra.mxu1 %v7107_v21 }
 0x972   :  { %3582 = vmatprep.subr.bf16.mxu0 %v7116_v59  ;;  %3623 = vmatprep.subr.bf16.mxu1 %v7121_v37 }
 0x975   :  { %3583 = vmatpush1.bf16.msra.mxu0 %v7126_v12  ;;  %3624 = vmatpush1.bf16.msra.mxu1 %v7131_v9 }
 0x976   :  { %3584 = vmatprep.subr.bf16.mxu0 %v7140_v6  ;;  %3625 = vmatprep.subr.bf16.mxu1 %v7145_v30 }
 0x979   :  { %3585 = vmatpush1.bf16.msra.mxu0 %v7150_v54  ;;  %3626 = vmatpush1.bf16.msra.mxu1 %v7155_v7 }
 0x97a   :  { %3586 = vmatprep.subr.bf16.mxu0 %v7160_v25  ;;  %3627 = vmatprep.subr.bf16.mxu1 %v7165_v28 }
 0x97b   :  { %v3187_v50 = vpop.f32.mrf.mxu0  ;;  %v3228_v40 = vpop.f32.mrf.mxu1 }
 0x97d   :  { %v3188_v13 = vpop.f32.mrf.mxu0  ;;  %v3229_v52 = vpop.f32.mrf.mxu1  ;;  %3587 = vmatpush1.bf16.msra.mxu0 %v7174_v48  ;;  %3628 = vmatpush1.bf16.msra.mxu1 %v7179_v3 }
 0x97e   :  { %3588 = vmatprep.subr.bf16.mxu0 %v7186_v33  ;;  %3629 = vmatprep.subr.bf16.mxu1 %v7191_v41  ;;  %v3463_v13 = vrot.slane %v7252_v22, 2 }
 0x97f   :  { %v3189_v36 = vpop.f32.mrf.mxu0  ;;  %v3230_v58 = vpop.f32.mrf.mxu1 }
 0x980   :  { %v3190_v24 = vadd.f32 %v3189_v36, %v2406_v1  ;;  %v3231_v31 = vadd.f32 %v3230_v58, %v2414_v55  ;;  %v3464_v1 = vrot.slane %v7257_v46, 2 }
 0x981   :  { %3589 = vmatpush1.bf16.msra.mxu0 %v7198_v8  ;;  %3630 = vmatpush1.bf16.msra.mxu1 %v7203_v20  ;;  %v7317_v23 = vpop.f32.mrf.mxu0  ;;  %v7319_v34 = vpop.f32.mrf.mxu1 }
 0x982   :  { %4986 = vtanh.f32 %v3190_v24  ;;  %3590 = vmatprep.subr.bf16.mxu0 %v7210_v10  ;;  %3631 = vmatprep.subr.bf16.mxu1 %v7215_v11  ;;  %8133 = vst [vmem:[#allocation29_spill] sm:$0xff] %v7317_v23  ;;  %8134 = vst [vmem:[#allocation30_spill] sm:$0xff] %v7319_v34 }
 0x983   :  { %4988 = vtanh.f32 %v3231_v31 }
 0x985   :  { %3591 = vmatpush1.bf16.msra.mxu0 %v7222_v0  ;;  %3632 = vmatpush1.bf16.msra.mxu1 %v7227_v43 }
 0x986   :  { %3682 = vmatprep.subr.bf16.mxu0 %v7044_v15  ;;  %3723 = vmatprep.subr.bf16.mxu1 %v7049_v17 }
 0x98f   :  { %v4987_v56 = vpop.eup %4986 }
 0x990   :  { %v3239_v29 = vmul.f32 0.5, %v4987_v56  ;;  %v4989_v5 = vpop.eup %4988 }
 0x992   :  { %v3240_v18 = vadd.f32 0.5, %v3239_v29  ;;  %v3465_v29 = vrot.slane %v7269_v39, 2 }
 0x994   :  { %v7315_v16 = vmul.f32 %v4989_v5, %v3240_v18 }
 0x996   :  { %8132 = vst [vmem:[#allocation28_spill] sm:$0xff] %v7315_v16 }
 0xa28   :  { %v3504_v50 = vpop.f32.mrf.mxu0  ;;  %v3545_v40 = vpop.f32.mrf.mxu1 }
 0xa29   :  { %v3505_v51 = vadd.f32 %v3504_v50, %v3462_v19  ;;  %v3546_v55 = vadd.f32 %v3545_v40, %v3464_v1 }
 0xa2a   :  { %v3506_v52 = vpop.f32.mrf.mxu0  ;;  %v3547_v4 = vpop.f32.mrf.mxu1 }
 0xa2b   :  { %4990 = vtanh.f32 %v3505_v51  ;;  %v3507_v36 = vadd.f32 %v3506_v52, %v3463_v13  ;;  %v3548_v18 = vadd.f32 %v3547_v4, %v3465_v29 }
 0xa2c   :  { %v3508_v58 = vpop.f32.mrf.mxu0  ;;  %v3549_v24 = vpop.f32.mrf.mxu1 }
 0xa2d   :  { %4992 = vtanh.f32 %v3507_v36  ;;  %v3569_v24 = vrot.slane %v7252_v22, 4 }
 0xa2e   :  { %v3509_v31 = vpop.f32.mrf.mxu0  ;;  %v3550_v56 = vpop.f32.mrf.mxu1  ;;  %4994 = vtanh.f32 %v3546_v55 }
 0xa2f   :  { %4996 = vtanh.f32 %v3548_v18 }
 0xa38   :  { %v4991_v5 = vpop.eup %4990 }
 0xa39   :  { %v3556_v19 = vmul.f32 0.5, %v4991_v5 }
 0xa3a   :  { %v4993_v50 = vpop.eup %4992 }
 0xa3b   :  { %v3557_v16 = vadd.f32 0.5, %v3556_v19  ;;  %v3558_v34 = vmul.f32 0.5, %v4993_v50  ;;  %v4995_v23 = vpop.eup %4994 }
 0xa3c   :  { %v4997_v13 = vpop.eup %4996 }
 0xa3d   :  { %v3559_v32 = vadd.f32 0.5, %v3558_v34  ;;  %v3563_v51 = vmul.f32 %v4995_v23, %v3557_v16  ;;  %v3560_v52 = vmul.f32 0.5, %v4997_v13  ;;  %v3570_v34 = vrot.slane %v7257_v46, 4 }
 0xa3f   :  { %v3562_v40 = vmul.f32 %v3559_v32, %v7272_v44  ;;  %v3561_v55 = vadd.f32 0.5, %v3560_v52  ;;  %v3568_v32 = vrot.slane %v7246_v27, 4 }
 0xa41   :  { %v7326_v1 = vadd.f32 %v3563_v51, %v3562_v40  ;;  %v3571_v40 = vrot.slane %v7269_v39, 4 }
 0xa43   :  { %4998 = vtanh.f32 %v7326_v1 }
 0xa50   :  { %v4999_v36 = vpop.eup %4998 }
 0xa51   :  { %v3566_v4 = vmul.f32 %v4999_v36, %v3561_v55 }
 0xa53   :  { %v3567_v58 = vpack.c.bf16 %v3566_v4, %v3566_v4 }
 0xa55   :  { %3609 = vmatmul.mubr.bf16.vlgmr.msra.gmra.mxu0 %v3567_v58  ;;  %3650 = vmatmul.mubr.bf16.vlgmr.msra.gmra.mxu1 %v3567_v58 }
 0xa56   :  { %3683 = vmatpush1.bf16.msra.mxu0 %v7054_v26  ;;  %3724 = vmatpush1.bf16.msra.mxu1 %v7059_v2 }
 0xa57   :  { %3684 = vmatprep.subr.bf16.mxu0 %v7068_v57  ;;  %3725 = vmatprep.subr.bf16.mxu1 %v7073_v60 }
 0xa58   :  { %3714 = vmatprep.mubr.bf16.mxu0 %v7947_v53  ;;  %3755 = vmatprep.mubr.bf16.mxu1 %v7947_v53 }
 0xa5a   :  { %3685 = vmatpush1.bf16.msra.mxu0 %v7078_v38  ;;  %3726 = vmatpush1.bf16.msra.mxu1 %v7083_v61 }
 0xa5b   :  { %3686 = vmatprep.subr.bf16.mxu0 %v7092_v47  ;;  %3727 = vmatprep.subr.bf16.mxu1 %v7097_v49 }
 0xa5e   :  { %3687 = vmatpush1.bf16.msra.mxu0 %v7102_v42  ;;  %3728 = vmatpush1.bf16.msra.mxu1 %v7107_v21 }
 0xa5f   :  { %3688 = vmatprep.subr.bf16.mxu0 %v7116_v59  ;;  %3729 = vmatprep.subr.bf16.mxu1 %v7121_v37 }
 0xa62   :  { %3689 = vmatpush1.bf16.msra.mxu0 %v7126_v12  ;;  %3730 = vmatpush1.bf16.msra.mxu1 %v7131_v9 }
 0xa63   :  { %3690 = vmatprep.subr.bf16.mxu0 %v7140_v6  ;;  %3731 = vmatprep.subr.bf16.mxu1 %v7145_v30 }
 0xa66   :  { %3691 = vmatpush1.bf16.msra.mxu0 %v7150_v54  ;;  %3732 = vmatpush1.bf16.msra.mxu1 %v7155_v7 }
 0xa67   :  { %3692 = vmatprep.subr.bf16.mxu0 %v7160_v25  ;;  %3733 = vmatprep.subr.bf16.mxu1 %v7165_v28 }
 0xa6a   :  { %3693 = vmatpush1.bf16.msra.mxu0 %v7174_v48  ;;  %3734 = vmatpush1.bf16.msra.mxu1 %v7179_v3 }
 0xa6b   :  { %3694 = vmatprep.subr.bf16.mxu0 %v7186_v33  ;;  %3735 = vmatprep.subr.bf16.mxu1 %v7191_v41 }
 0xa6e   :  { %3695 = vmatpush1.bf16.msra.mxu0 %v7198_v8  ;;  %3736 = vmatpush1.bf16.msra.mxu1 %v7203_v20 }
 0xa6f   :  { %3696 = vmatprep.subr.bf16.mxu0 %v7210_v10  ;;  %3737 = vmatprep.subr.bf16.mxu1 %v7215_v11 }
 0xa72   :  { %3697 = vmatpush1.bf16.msra.mxu0 %v7222_v0  ;;  %3738 = vmatpush1.bf16.msra.mxu1 %v7227_v43 }
 0xa73   :  { %3780 = vmatprep.subr.bf16.mxu0 %v7044_v15  ;;  %3821 = vmatprep.subr.bf16.mxu1 %v7049_v17 }
 0xb15   :  { %v3610_v44 = vpop.f32.mrf.mxu0  ;;  %v3651_v16 = vpop.f32.mrf.mxu1 }
 0xb16   :  { %v3611_v23 = vadd.f32 %v3610_v44, %v3568_v32  ;;  %v3652_v29 = vadd.f32 %v3651_v16, %v3570_v34 }
 0xb17   :  { %v3612_v31 = vpop.f32.mrf.mxu0  ;;  %v3653_v56 = vpop.f32.mrf.mxu1 }
 0xb18   :  { %5000 = vtanh.f32 %v3611_v23  ;;  %v3613_v18 = vadd.f32 %v3612_v31, %v3569_v24  ;;  %v3654_v13 = vadd.f32 %v3653_v56, %v3571_v40  ;;  %v3676_v40 = vrot.slane %v7257_v46, 6 }
 0xb19   :  { %v3614_v5 = vpop.f32.mrf.mxu0  ;;  %v3655_v19 = vpop.f32.mrf.mxu1 }
 0xb1a   :  { %5002 = vtanh.f32 %v3613_v18 }
 0xb1b   :  { %v3615_v50 = vpop.f32.mrf.mxu0  ;;  %v3656_v51 = vpop.f32.mrf.mxu1  ;;  %5004 = vtanh.f32 %v3652_v29 }
 0xb1c   :  { %5006 = vtanh.f32 %v3654_v13  ;;  %v3675_v13 = vrot.slane %v7252_v22, 6 }
 0xb25   :  { %v5001_v52 = vpop.eup %5000 }
 0xb26   :  { %v3662_v55 = vmul.f32 0.5, %v5001_v52 }
 0xb27   :  { %v5003_v36 = vpop.eup %5002 }
 0xb28   :  { %v3663_v4 = vadd.f32 0.5, %v3662_v55  ;;  %v3664_v58 = vmul.f32 0.5, %v5003_v36  ;;  %v5005_v32 = vpop.eup %5004 }
 0xb29   :  { %v5007_v24 = vpop.eup %5006 }
 0xb2a   :  { %v3665_v44 = vadd.f32 0.5, %v3664_v58  ;;  %v3669_v23 = vmul.f32 %v5005_v32, %v3663_v4  ;;  %v3666_v31 = vmul.f32 0.5, %v5007_v24 }
 0xb2c   :  { %v3668_v16 = vmul.f32 %v3665_v44, %v7326_v1  ;;  %v3667_v29 = vadd.f32 0.5, %v3666_v31  ;;  %v3674_v1 = vrot.slane %v7246_v27, 6  ;;  %v3677_v27 = vrot.slane %v7269_v39, 6 }
 0xb2e   :  { %v7368_v34 = vadd.f32 %v3669_v23, %v3668_v16 }
 0xb30   :  { %5008 = vtanh.f32 %v7368_v34 }
 0xb3d   :  { %v5009_v18 = vpop.eup %5008 }
 0xb3e   :  { %v3672_v56 = vmul.f32 %v5009_v18, %v3667_v29 }
 0xb40   :  { %v3673_v5 = vpack.c.bf16 %v3672_v56, %v3672_v56 }
 0xb42   :  { %3715 = vmatmul.mubr.bf16.vlgmr.msra.gmra.mxu0 %v3673_v5  ;;  %3756 = vmatmul.mubr.bf16.vlgmr.msra.gmra.mxu1 %v3673_v5 }
 0xb43   :  { %3781 = vmatpush1.bf16.msra.mxu0 %v7054_v26  ;;  %3822 = vmatpush1.bf16.msra.mxu1 %v7059_v2 }
 0xb44   :  { %3782 = vmatprep.subr.bf16.mxu0 %v7068_v57  ;;  %3823 = vmatprep.subr.bf16.mxu1 %v7073_v60 }
 0xb45   :  { %3812 = vmatprep.mubr.bf16.mxu0 %v7947_v53  ;;  %3853 = vmatprep.mubr.bf16.mxu1 %v7947_v53 }
 0xb47   :  { %3783 = vmatpush1.bf16.msra.mxu0 %v7078_v38  ;;  %3824 = vmatpush1.bf16.msra.mxu1 %v7083_v61 }
 0xb48   :  { %3784 = vmatprep.subr.bf16.mxu0 %v7092_v47  ;;  %3825 = vmatprep.subr.bf16.mxu1 %v7097_v49 }
 0xb4b   :  { %3785 = vmatpush1.bf16.msra.mxu0 %v7102_v42  ;;  %3826 = vmatpush1.bf16.msra.mxu1 %v7107_v21 }
 0xb4c   :  { %3786 = vmatprep.subr.bf16.mxu0 %v7116_v59  ;;  %3827 = vmatprep.subr.bf16.mxu1 %v7121_v37 }
 0xb4f   :  { %3787 = vmatpush1.bf16.msra.mxu0 %v7126_v12  ;;  %3828 = vmatpush1.bf16.msra.mxu1 %v7131_v9 }
 0xb50   :  { %3788 = vmatprep.subr.bf16.mxu0 %v7140_v6  ;;  %3829 = vmatprep.subr.bf16.mxu1 %v7145_v30 }
 0xb53   :  { %3789 = vmatpush1.bf16.msra.mxu0 %v7150_v54  ;;  %3830 = vmatpush1.bf16.msra.mxu1 %v7155_v7 }
 0xb54   :  { %3790 = vmatprep.subr.bf16.mxu0 %v7160_v25  ;;  %3831 = vmatprep.subr.bf16.mxu1 %v7165_v28 }
 0xb57   :  { %3791 = vmatpush1.bf16.msra.mxu0 %v7174_v48  ;;  %3832 = vmatpush1.bf16.msra.mxu1 %v7179_v3 }
 0xb58   :  { %3792 = vmatprep.subr.bf16.mxu0 %v7186_v33  ;;  %3833 = vmatprep.subr.bf16.mxu1 %v7191_v41 }
 0xb5b   :  { %3793 = vmatpush1.bf16.msra.mxu0 %v7198_v8  ;;  %3834 = vmatpush1.bf16.msra.mxu1 %v7203_v20 }
 0xb5c   :  { %3794 = vmatprep.subr.bf16.mxu0 %v7210_v10  ;;  %3835 = vmatprep.subr.bf16.mxu1 %v7215_v11 }
 0xb5f   :  { %3795 = vmatpush1.bf16.msra.mxu0 %v7222_v0  ;;  %3836 = vmatpush1.bf16.msra.mxu1 %v7227_v43 }
 0xb60   :  { %3890 = vmatprep.subr.bf16.mxu0 %v7044_v15  ;;  %3931 = vmatprep.subr.bf16.mxu1 %v7049_v17 }
 0xc02   :  { %v3716_v19 = vpop.f32.mrf.mxu0  ;;  %v3757_v50 = vpop.f32.mrf.mxu1 }
 0xc03   :  { %v3717_v51 = vadd.f32 %v3716_v19, %v3674_v1  ;;  %v3758_v36 = vadd.f32 %v3757_v50, %v3676_v40 }
 0xc04   :  { %v3718_v52 = vpop.f32.mrf.mxu0  ;;  %v3759_v55 = vpop.f32.mrf.mxu1 }
 0xc05   :  { %5010 = vtanh.f32 %v3717_v51  ;;  %v3719_v4 = vadd.f32 %v3718_v52, %v3675_v13  ;;  %v3760_v16 = vadd.f32 %v3759_v55, %v3677_v27 }
 0xc06   :  { %v3720_v58 = vpop.f32.mrf.mxu0  ;;  %v3761_v32 = vpop.f32.mrf.mxu1 }
 0xc07   :  { %5012 = vtanh.f32 %v3719_v4 }
 0xc08   :  { %v3721_v44 = vpop.f32.mrf.mxu0  ;;  %v3762_v23 = vpop.f32.mrf.mxu1  ;;  %5014 = vtanh.f32 %v3758_v36 }
 0xc09   :  { %5016 = vtanh.f32 %v3760_v16 }
 0xc12   :  { %v5011_v24 = vpop.eup %5010 }
 0xc13   :  { %v3768_v31 = vmul.f32 0.5, %v5011_v24 }
 0xc14   :  { %v5013_v29 = vpop.eup %5012 }
 0xc15   :  { %v3769_v46 = vadd.f32 0.5, %v3768_v31  ;;  %v3770_v18 = vmul.f32 0.5, %v5013_v29  ;;  %v5015_v22 = vpop.eup %5014 }
 0xc16   :  { %v5017_v50 = vpop.eup %5016 }
 0xc17   :  { %v3771_v56 = vadd.f32 0.5, %v3770_v18  ;;  %v3775_v5 = vmul.f32 %v5015_v22, %v3769_v46  ;;  %v3772_v51 = vmul.f32 0.5, %v5017_v50 }
 0xc19   :  { %v3774_v1 = vmul.f32 %v3771_v56, %v7368_v34  ;;  %v3773_v40 = vadd.f32 0.5, %v3772_v51 }
 0xc1b   :  { %v7410_v19 = vadd.f32 %v3775_v5, %v3774_v1 }
 0xc1d   :  { %5018 = vtanh.f32 %v7410_v19 }
 0xc2a   :  { %v5019_v39 = vpop.eup %5018 }
 0xc2b   :  { %v3778_v13 = vmul.f32 %v5019_v39, %v3773_v40 }
 0xc2d   :  { %v3779_v52 = vpack.c.bf16 %v3778_v13, %v3778_v13 }
 0xc2f   :  { %3813 = vmatmul.mubr.bf16.vlgmr.msra.gmra.mxu0 %v3779_v52  ;;  %3854 = vmatmul.mubr.bf16.vlgmr.msra.gmra.mxu1 %v3779_v52 }
 0xc30   :  { %3891 = vmatpush1.bf16.msra.mxu0 %v7054_v26  ;;  %3932 = vmatpush1.bf16.msra.mxu1 %v7059_v2 }
 0xc31   :  { %3892 = vmatprep.subr.bf16.mxu0 %v7068_v57  ;;  %3933 = vmatprep.subr.bf16.mxu1 %v7073_v60 }
 0xc32   :  { %3922 = vmatprep.mubr.bf16.mxu0 %v7947_v53  ;;  %3963 = vmatprep.mubr.bf16.mxu1 %v7947_v53 }
 0xc34   :  { %3893 = vmatpush1.bf16.msra.mxu0 %v7078_v38  ;;  %3934 = vmatpush1.bf16.msra.mxu1 %v7083_v61 }
 0xc35   :  { %3894 = vmatprep.subr.bf16.mxu0 %v7092_v47  ;;  %3935 = vmatprep.subr.bf16.mxu1 %v7097_v49 }
 0xc38   :  { %3895 = vmatpush1.bf16.msra.mxu0 %v7102_v42  ;;  %3936 = vmatpush1.bf16.msra.mxu1 %v7107_v21 }
 0xc39   :  { %3896 = vmatprep.subr.bf16.mxu0 %v7116_v59  ;;  %3937 = vmatprep.subr.bf16.mxu1 %v7121_v37 }
 0xc3c   :  { %3897 = vmatpush1.bf16.msra.mxu0 %v7126_v12  ;;  %3938 = vmatpush1.bf16.msra.mxu1 %v7131_v9 }
 0xc3d   :  { %3898 = vmatprep.subr.bf16.mxu0 %v7140_v6  ;;  %3939 = vmatprep.subr.bf16.mxu1 %v7145_v30 }
 0xc40   :  { %3899 = vmatpush1.bf16.msra.mxu0 %v7150_v54  ;;  %3940 = vmatpush1.bf16.msra.mxu1 %v7155_v7 }
 0xc41   :  { %3900 = vmatprep.subr.bf16.mxu0 %v7160_v25  ;;  %3941 = vmatprep.subr.bf16.mxu1 %v7165_v28 }
 0xc44   :  { %3901 = vmatpush1.bf16.msra.mxu0 %v7174_v48  ;;  %3942 = vmatpush1.bf16.msra.mxu1 %v7179_v3 }
 0xc45   :  { %3902 = vmatprep.subr.bf16.mxu0 %v7186_v33  ;;  %3943 = vmatprep.subr.bf16.mxu1 %v7191_v41 }
 0xc48   :  { %3903 = vmatpush1.bf16.msra.mxu0 %v7198_v8  ;;  %3944 = vmatpush1.bf16.msra.mxu1 %v7203_v20 }
 0xc49   :  { %3904 = vmatprep.subr.bf16.mxu0 %v7210_v10  ;;  %3945 = vmatprep.subr.bf16.mxu1 %v7215_v11 }
 0xc4c   :  { %3905 = vmatpush1.bf16.msra.mxu0 %v7222_v0  ;;  %3946 = vmatpush1.bf16.msra.mxu1 %v7227_v43 }
 0xc4d   :  { %3996 = vmatprep.subr.bf16.mxu0 %v7044_v15  ;;  %4037 = vmatprep.subr.bf16.mxu1 %v7049_v17 }
 0xcef   :  { %v3814_v34 = vpop.f32.mrf.mxu0  ;;  %v3855_v55 = vpop.f32.mrf.mxu1 }
 0xcf0   :  { %v3815_v36 = vadd.f32 %v3814_v34, %v7260_v63  ;;  %v3856_v27 = vadd.f32 %v3855_v55, %v7262_v35 }
 0xcf1   :  { %v3816_v4 = vpop.f32.mrf.mxu0  ;;  %v3857_v58 = vpop.f32.mrf.mxu1 }
 0xcf2   :  { %5020 = vtanh.f32 %v3815_v36  ;;  %v3817_v32 = vadd.f32 %v3816_v4, %v7264_v62  ;;  %v3858_v31 = vadd.f32 %v3857_v58, %v7266_v45 }
 0xcf3   :  { %v3818_v44 = vpop.f32.mrf.mxu0  ;;  %v3859_v23 = vpop.f32.mrf.mxu1 }
 0xcf4   :  { %5022 = vtanh.f32 %v3817_v32  ;;  %v3883_v44 = vrot.slane %v7264_v62, 2 }
 0xcf5   :  { %v3819_v16 = vpop.f32.mrf.mxu0  ;;  %v3860_v24 = vpop.f32.mrf.mxu1  ;;  %5024 = vtanh.f32 %v3856_v27 }
 0xcf6   :  { %5026 = vtanh.f32 %v3858_v31  ;;  %v3884_v16 = vrot.slane %v7262_v35, 2 }
 0xcff   :  { %v5021_v29 = vpop.eup %5020 }
 0xd00   :  { %v3866_v46 = vmul.f32 0.5, %v5021_v29 }
 0xd01   :  { %v5023_v18 = vpop.eup %5022 }
 0xd02   :  { %v3867_v22 = vadd.f32 0.5, %v3866_v46  ;;  %v3868_v56 = vmul.f32 0.5, %v5023_v18  ;;  %v5025_v1 = vpop.eup %5024 }
 0xd03   :  { %v5027_v39 = vpop.eup %5026 }
 0xd04   :  { %v3869_v5 = vadd.f32 0.5, %v3868_v56  ;;  %v3873_v51 = vmul.f32 %v5025_v1, %v3867_v22  ;;  %v3870_v13 = vmul.f32 0.5, %v5027_v39 }
 0xd06   :  { %v3872_v50 = vmul.f32 %v3869_v5, %v7410_v19  ;;  %v3871_v52 = vadd.f32 0.5, %v3870_v13  ;;  %v3882_v19 = vrot.slane %v7260_v63, 2 }
 0xd08   :  { %v7452_v40 = vadd.f32 %v3873_v51, %v3872_v50 }
 0xd0a   :  { %5028 = vtanh.f32 %v7452_v40 }
 0xd17   :  { %v5029_v34 = vpop.eup %5028 }
 0xd18   :  { %v3876_v55 = vmul.f32 %v5029_v34, %v3871_v52 }
 0xd1a   :  { %v3877_v36 = vpack.c.bf16 %v3876_v55, %v3876_v55 }
 0xd1c   :  { %3923 = vmatmul.mubr.bf16.vlgmr.msra.gmra.mxu0 %v3877_v36  ;;  %3964 = vmatmul.mubr.bf16.vlgmr.msra.gmra.mxu1 %v3877_v36 }
 0xd1d   :  { %3997 = vmatpush1.bf16.msra.mxu0 %v7054_v26  ;;  %4038 = vmatpush1.bf16.msra.mxu1 %v7059_v2 }
 0xd1e   :  { %3998 = vmatprep.subr.bf16.mxu0 %v7068_v57  ;;  %4039 = vmatprep.subr.bf16.mxu1 %v7073_v60 }
 0xd1f   :  { %4028 = vmatprep.mubr.bf16.mxu0 %v7947_v53  ;;  %4069 = vmatprep.mubr.bf16.mxu1 %v7947_v53 }
 0xd21   :  { %3999 = vmatpush1.bf16.msra.mxu0 %v7078_v38  ;;  %4040 = vmatpush1.bf16.msra.mxu1 %v7083_v61 }
 0xd22   :  { %4000 = vmatprep.subr.bf16.mxu0 %v7092_v47  ;;  %4041 = vmatprep.subr.bf16.mxu1 %v7097_v49 }
 0xd25   :  { %4001 = vmatpush1.bf16.msra.mxu0 %v7102_v42  ;;  %4042 = vmatpush1.bf16.msra.mxu1 %v7107_v21 }
 0xd26   :  { %4002 = vmatprep.subr.bf16.mxu0 %v7116_v59  ;;  %4043 = vmatprep.subr.bf16.mxu1 %v7121_v37 }
 0xd29   :  { %4003 = vmatpush1.bf16.msra.mxu0 %v7126_v12  ;;  %4044 = vmatpush1.bf16.msra.mxu1 %v7131_v9 }
 0xd2a   :  { %4004 = vmatprep.subr.bf16.mxu0 %v7140_v6  ;;  %4045 = vmatprep.subr.bf16.mxu1 %v7145_v30 }
 0xd2d   :  { %4005 = vmatpush1.bf16.msra.mxu0 %v7150_v54  ;;  %4046 = vmatpush1.bf16.msra.mxu1 %v7155_v7 }
 0xd2e   :  { %4006 = vmatprep.subr.bf16.mxu0 %v7160_v25  ;;  %4047 = vmatprep.subr.bf16.mxu1 %v7165_v28 }
 0xd31   :  { %4007 = vmatpush1.bf16.msra.mxu0 %v7174_v48  ;;  %4048 = vmatpush1.bf16.msra.mxu1 %v7179_v3 }
 0xd32   :  { %4008 = vmatprep.subr.bf16.mxu0 %v7186_v33  ;;  %4049 = vmatprep.subr.bf16.mxu1 %v7191_v41 }
 0xd35   :  { %4009 = vmatpush1.bf16.msra.mxu0 %v7198_v8  ;;  %4050 = vmatpush1.bf16.msra.mxu1 %v7203_v20 }
 0xd36   :  { %4010 = vmatprep.subr.bf16.mxu0 %v7210_v10  ;;  %4051 = vmatprep.subr.bf16.mxu1 %v7215_v11 }
 0xd39   :  { %4011 = vmatpush1.bf16.msra.mxu0 %v7222_v0  ;;  %4052 = vmatpush1.bf16.msra.mxu1 %v7227_v43 }
 0xd3a   :  { %4102 = vmatprep.subr.bf16.mxu0 %v7044_v15  ;;  %4143 = vmatprep.subr.bf16.mxu1 %v7049_v17  ;;  %v3885_v17 = vrot.slane %v7266_v45, 2 }
 0xddc   :  { %v3924_v4 = vpop.f32.mrf.mxu0  ;;  %v3965_v58 = vpop.f32.mrf.mxu1 }
 0xddd   :  { %v3925_v32 = vadd.f32 %v3924_v4, %v3882_v19  ;;  %v3966_v46 = vadd.f32 %v3965_v58, %v3884_v16  ;;  %v8140_v16 = vld [vmem:[#allocation28_spill] sm:$0xff] }
 0xdde   :  { %v3926_v23 = vpop.f32.mrf.mxu0  ;;  %v3967_v27 = vpop.f32.mrf.mxu1 }
 0xddf   :  { %5030 = vtanh.f32 %v3925_v32  ;;  %v3927_v24 = vadd.f32 %v3926_v23, %v3883_v44  ;;  %v3968_v22 = vadd.f32 %v3967_v27, %v3885_v17 }
 0xde0   :  { %v3928_v31 = vpop.f32.mrf.mxu0  ;;  %v3969_v29 = vpop.f32.mrf.mxu1 }
 0xde1   :  { %5032 = vtanh.f32 %v3927_v24 }
 0xde2   :  { %v3929_v15 = vpop.f32.mrf.mxu0  ;;  %v3970_v18 = vpop.f32.mrf.mxu1  ;;  %5034 = vtanh.f32 %v3966_v46 }
 0xde3   :  { %5036 = vtanh.f32 %v3968_v22 }
 0xdec   :  { %v5031_v56 = vpop.eup %5030 }
 0xded   :  { %v3976_v5 = vmul.f32 0.5, %v5031_v56 }
 0xdee   :  { %v5033_v1 = vpop.eup %5032 }
 0xdef   :  { %v3977_v50 = vadd.f32 0.5, %v3976_v5  ;;  %v3978_v51 = vmul.f32 0.5, %v5033_v1  ;;  %v5035_v13 = vpop.eup %5034 }
 0xdf0   :  { %v5037_v36 = vpop.eup %5036 }
 0xdf1   :  { %v3979_v39 = vadd.f32 0.5, %v3978_v51  ;;  %v3983_v34 = vmul.f32 %v5035_v13, %v3977_v50  ;;  %v3980_v19 = vmul.f32 0.5, %v5037_v36  ;;  %v4217_v36 = vld [vmem:[%s7729_s8 + $0x78] sm:$0xff] }
 0xdf3   :  { %v3982_v52 = vmul.f32 %v3979_v39, %v7452_v40  ;;  %v3981_v4 = vadd.f32 0.5, %v3980_v19  ;;  %v4232_v19 = vld [vmem:[%s7729_s8 + $0xf0] sm:$0xff] }
 0xdf5   :  { %v7494_v55 = vadd.f32 %v3983_v34, %v3982_v52 }
 0xdf7   :  { %5038 = vtanh.f32 %v7494_v55 }
 0xe04   :  { %v5039_v58 = vpop.eup %5038 }
 0xe05   :  { %v3986_v32 = vmul.f32 %v5039_v58, %v3981_v4  ;;  %v4216_v4 = vld [vmem:[%s7729_s8 + $0x70] sm:$0xff]  ;;  %v4231_v58 = vld [vmem:[%s7729_s8 + $0xe8] sm:$0xff] }
 0xe07   :  { %v3987_v44 = vpack.c.bf16 %v3986_v32, %v3986_v32  ;;  %v4215_v32 = vld [vmem:[%s7729_s8 + $0x68] sm:$0xff] }
 0xe09   :  { %4029 = vmatmul.mubr.bf16.vlgmr.msra.gmra.mxu0 %v3987_v44  ;;  %4070 = vmatmul.mubr.bf16.vlgmr.msra.gmra.mxu1 %v3987_v44  ;;  %v4230_v44 = vld [vmem:[%s7729_s8 + $0xe0] sm:$0xff] }
 0xe0a   :  { %4103 = vmatpush1.bf16.msra.mxu0 %v7054_v26  ;;  %4144 = vmatpush1.bf16.msra.mxu1 %v7059_v2  ;;  %v8136_v26 = vld [vmem:[#allocation27_spill] sm:$0xff] }
 0xe0b   :  { %4104 = vmatprep.subr.bf16.mxu0 %v7068_v57  ;;  %4145 = vmatprep.subr.bf16.mxu1 %v7073_v60  ;;  %v8137_v57 = vld [vmem:[#allocation29_spill] sm:$0xff] }
 0xe0c   :  { %4134 = vmatprep.mubr.bf16.mxu0 %v7947_v53  ;;  %4175 = vmatprep.mubr.bf16.mxu1 %v7947_v53  ;;  %v8135_v53 = vsub.s32 5, %v8125_v14 }
 0xe0e   :  { %4105 = vmatpush1.bf16.msra.mxu0 %v7078_v38  ;;  %4146 = vmatpush1.bf16.msra.mxu1 %v7083_v61  ;;  %v2410_v2 = vrot.slane %v8136_v26, %v8135_v53  ;;  %v3988_v38 = vrot.slane %v7260_v63, 4  ;;  %v4214_v53 = vld [vmem:[%s7729_s8 + $0x60] sm:$0xff] }
 0xe0f   :  { %4106 = vmatprep.subr.bf16.mxu0 %v7092_v47  ;;  %4147 = vmatprep.subr.bf16.mxu1 %v7097_v49 }
 0xe10   :  { %v3192_v60 = vadd.f32 %v8137_v57, %v2410_v2  ;;  %v4213_v2 = vld [vmem:[%s7729_s8 + $0x58] sm:$0xff]  ;;  %v4228_v57 = vld [vmem:[%s7729_s8 + $0xd0] sm:$0xff] }
 0xe12   :  { %4107 = vmatpush1.bf16.msra.mxu0 %v7102_v42  ;;  %4148 = vmatpush1.bf16.msra.mxu1 %v7107_v21  ;;  %5040 = vtanh.f32 %v3192_v60  ;;  %v3989_v42 = vrot.slane %v7264_v62, 4  ;;  %v4212_v60 = vld [vmem:[%s7729_s8 + $0x50] sm:$0xff] }
 0xe13   :  { %4108 = vmatprep.subr.bf16.mxu0 %v7116_v59  ;;  %4149 = vmatprep.subr.bf16.mxu1 %v7121_v37  ;;  %v3990_v37 = vrot.slane %v7262_v35, 4 }
 0xe16   :  { %4109 = vmatpush1.bf16.msra.mxu0 %v7126_v12  ;;  %4150 = vmatpush1.bf16.msra.mxu1 %v7131_v9 }
 0xe17   :  { %4110 = vmatprep.subr.bf16.mxu0 %v7140_v6  ;;  %4151 = vmatprep.subr.bf16.mxu1 %v7145_v30 }
 0xe1a   :  { %4111 = vmatpush1.bf16.msra.mxu0 %v7150_v54  ;;  %4152 = vmatpush1.bf16.msra.mxu1 %v7155_v7 }
 0xe1b   :  { %4112 = vmatprep.subr.bf16.mxu0 %v7160_v25  ;;  %4153 = vmatprep.subr.bf16.mxu1 %v7165_v28 }
 0xe1e   :  { %4113 = vmatpush1.bf16.msra.mxu0 %v7174_v48  ;;  %4154 = vmatpush1.bf16.msra.mxu1 %v7179_v3  ;;  %v8138_v48 = vsub.s32 7, %v8125_v14 }
 0xe1f   :  { %4114 = vmatprep.subr.bf16.mxu0 %v7186_v33  ;;  %4155 = vmatprep.subr.bf16.mxu1 %v7191_v41  ;;  %v5041_v30 = vpop.eup %5040  ;;  %v3991_v41 = vrot.slane %v7266_v45, 4 }
 0xe20   :  { %v3241_v28 = vmul.f32 0.5, %v5041_v30  ;;  %v2418_v3 = vrot.slane %v8136_v26, %v8138_v48  ;;  %v4229_v26 = vld [vmem:[%s7729_s8 + $0xd8] sm:$0xff]  ;;  %v4206_v30 = vld [vmem:[%s7729_s8 + $0x20] sm:$0xff]  ;;  %v4219_v48 = vld [vmem:[%s7729_s8 + $0x88] sm:$0xff] }
 0xe22   :  { %4115 = vmatpush1.bf16.msra.mxu0 %v7198_v8  ;;  %4156 = vmatpush1.bf16.msra.mxu1 %v7203_v20  ;;  %v3242_v33 = vadd.f32 0.5, %v3241_v28  ;;  %v8139_v8 = vld [vmem:[#allocation30_spill] sm:$0xff] }
 0xe23   :  { %4116 = vmatprep.subr.bf16.mxu0 %v7210_v10  ;;  %4157 = vmatprep.subr.bf16.mxu1 %v7215_v11  ;;  %v3233_v20 = vadd.f32 %v8139_v8, %v2418_v3  ;;  %v4204_v28 = vld [vmem:[%s7729_s8 + $0x10] sm:$0xff]  ;;  %v4203_v3 = vld [vmem:[%s7729_s8 + $0x8] sm:$0xff]  ;;  %v4327_v8 = vld [vmem:[%s7731_s10 + $0x78] sm:$0xff] }
 0xe26   :  { %4117 = vmatpush1.bf16.msra.mxu0 %v7222_v0  ;;  %4158 = vmatpush1.bf16.msra.mxu1 %v7227_v43  ;;  %v3245_v0 = vmul.f32 0.0, %v3242_v33  ;;  %v4218_v33 = vld [vmem:[%s7729_s8 + $0x80] sm:$0xff] }
 0xe28   :  { %v3247_v24 = vadd.f32 %v8140_v16, %v3245_v0  ;;  %v4324_v0 = vld [vmem:[%s7731_s10 + $0x60] sm:$0xff]  ;;  %v4319_v16 = vld [vmem:[%s7731_s10 + $0x38] sm:$0xff] }
 0xec9   :  { %v4030_v61 = vpop.f32.mrf.mxu0  ;;  %v4071_v47 = vpop.f32.mrf.mxu1 }
 0xeca   :  { %v4031_v49 = vadd.f32 %v4030_v61, %v3988_v38  ;;  %v4072_v54 = vadd.f32 %v4071_v47, %v3990_v37  ;;  %v4227_v38 = vld [vmem:[%s7729_s8 + $0xc8] sm:$0xff]  ;;  %v4226_v47 = vld [vmem:[%s7729_s8 + $0xc0] sm:$0xff]  ;;  %v4208_v37 = vld [vmem:[%s7729_s8 + $0x30] sm:$0xff] }
 0xecb   :  { %v4032_v21 = vpop.f32.mrf.mxu0  ;;  %v4073_v59 = vpop.f32.mrf.mxu1  ;;  %v4211_v61 = vld [vmem:[%s7729_s8 + $0x48] sm:$0xff] }
 0xecc   :  { %5042 = vtanh.f32 %v4031_v49  ;;  %v4033_v12 = vadd.f32 %v4032_v21, %v3989_v42  ;;  %v4074_v10 = vadd.f32 %v4073_v59, %v3991_v41  ;;  %v4210_v49 = vld [vmem:[%s7729_s8 + $0x40] sm:$0xff]  ;;  %v4225_v42 = vld [vmem:[%s7729_s8 + $0xb8] sm:$0xff]  ;;  %v4224_v59 = vld [vmem:[%s7729_s8 + $0xb0] sm:$0xff] }
 0xecd   :  { %v4034_v9 = vpop.f32.mrf.mxu0  ;;  %v4075_v6 = vpop.f32.mrf.mxu1  ;;  %v4209_v21 = vld [vmem:[%s7729_s8 + $0x38] sm:$0xff]  ;;  %v4202_v41 = vld [vmem:[%s7729_s8] sm:$0xff] }
 0xece   :  { %5044 = vtanh.f32 %v4033_v12  ;;  %v4223_v12 = vld [vmem:[%s7729_s8 + $0xa8] sm:$0xff]  ;;  %v4222_v6 = vld [vmem:[%s7729_s8 + $0xa0] sm:$0xff] }
 0xecf   :  { %v4035_v7 = vpop.f32.mrf.mxu0  ;;  %v4076_v25 = vpop.f32.mrf.mxu1  ;;  %5046 = vtanh.f32 %v4072_v54  ;;  %v4207_v9 = vld [vmem:[%s7729_s8 + $0x28] sm:$0xff]  ;;  %v4221_v54 = vld [vmem:[%s7729_s8 + $0x98] sm:$0xff] }
 0xed0   :  { %5048 = vtanh.f32 %v3233_v20  ;;  %v4205_v7 = vld [vmem:[%s7729_s8 + $0x18] sm:$0xff]  ;;  %v4220_v25 = vld [vmem:[%s7729_s8 + $0x90] sm:$0xff]  ;;  %v5153_v20 = vmov 0.0  }
 0xed1   :  { %5050 = vtanh.f32 %v4074_v10  ;;  %4712 = vmatprep.subr.mxu1 %v5153_v20  ;;  %v4326_v10 = vld [vmem:[%s7731_s10 + $0x70] sm:$0xff] }
 0xed2   :  { %5052 = vtanh.f32 %v3247_v24  ;;  %v4318_v24 = vld [vmem:[%s7731_s10 + $0x30] sm:$0xff] }
 0xed9   :  { %v5043_v11 = vpop.eup %5042 }
 0xeda   :  { %v4082_v43 = vmul.f32 0.5, %v5043_v11  ;;  %v4325_v11 = vld [vmem:[%s7731_s10 + $0x68] sm:$0xff] }
 0xedb   :  { %v5045_v40 = vpop.eup %5044 }
 0xedc   :  { %v4083_v23 = vadd.f32 0.5, %v4082_v43  ;;  %v4084_v27 = vmul.f32 0.5, %v5045_v40  ;;  %v5047_v14 = vpop.eup %5046  ;;  %v4323_v43 = vld [vmem:[%s7731_s10 + $0x58] sm:$0xff]  ;;  %v4322_v40 = vld [vmem:[%s7731_s10 + $0x50] sm:$0xff] }
 0xedd   :  { %v5049_v18 = vpop.eup %5048 }
 0xede   :  { %v4085_v31 = vadd.f32 0.5, %v4084_v27  ;;  %v4089_v46 = vmul.f32 %v5047_v14, %v4083_v23  ;;  %v5051_v17 = vpop.eup %5050  ;;  %v3243_v22 = vmul.f32 0.5, %v5049_v18  ;;  %v4321_v23 = vld [vmem:[%s7731_s10 + $0x48] sm:$0xff]  ;;  %v4320_v27 = vld [vmem:[%s7731_s10 + $0x40] sm:$0xff]  ;;  %v4094_v14 = vrot.slane %v7260_v63, 6 }
 0xedf   :  { %v4086_v56 = vmul.f32 0.5, %v5051_v17  ;;  %v5053_v5 = vpop.eup %5052  ;;  %v4095_v17 = vrot.slane %v7264_v62, 6  ;;  %v4097_v63 = vrot.slane %v7266_v45, 6  ;;  %v4316_v45 = vld [vmem:[%s7731_s10 + $0x20] sm:$0xff] }
 0xee0   :  { %v4088_v29 = vmul.f32 %v4085_v31, %v7494_v55  ;;  %v3244_v1 = vadd.f32 0.5, %v3243_v22  ;;  %v4233_v55 = vld [vmem:[%s7729_s8 + $0xf8] sm:$0xff]  ;;  %v4317_v31 = vld [vmem:[%s7731_s10 + $0x28] sm:$0xff] }
 0xee1   :  { %v4087_v50 = vadd.f32 0.5, %v4086_v56  ;;  %4660 = vmatprep.subr.mxu0 %v4233_v55 }
 0xee2   :  { %v7543_v15 = vadd.f32 %v4089_v46, %v4088_v29  ;;  %v3249_v39 = vmul.f32 %v5053_v5, %v3244_v1  ;;  %v4096_v5 = vrot.slane %v7262_v35, 6 }
 0xee4   :  { %5054 = vtanh.f32 %v7543_v15  ;;  %v4200_v34 = vrot.slane %v3249_v39, 6 }
 0xef1   :  { %v5055_v51 = vpop.eup %5054 }
 0xef2   :  { %v4092_v13 = vmul.f32 %v5055_v51, %v4087_v50 }
 0xef4   :  { %v4093_v52 = vpack.c.bf16 %v4092_v13, %v4092_v13 }
 0xef6   :  { %4135 = vmatmul.mubr.bf16.vlgmr.msra.gmra.mxu0 %v4093_v52  ;;  %4176 = vmatmul.mubr.bf16.vlgmr.msra.gmra.mxu1 %v4093_v52 }
 0xef7   :  { %4305 = vmatprep.mubr.f32.mxu0 %v4200_v34  ;;  %4661 = vmatpush3.msra.mxu0 %v4217_v36 }
 0xef8   :  { %4662 = vmatprep.subr.mxu0 %v4232_v19  ;;  %4713 = vmatpush3.msra.mxu1 %v4327_v8 }
 0xef9   :  { %4663 = vmatpush3.msra.mxu0 %v4216_v4  ;;  %4714 = vmatprep.subr.mxu1 %v5153_v20 }
 0xefa   :  { %4664 = vmatprep.subr.mxu0 %v4231_v58  ;;  %4715 = vmatpush3.msra.mxu1 %v4326_v10 }
 0xefb   :  { %4665 = vmatpush3.msra.mxu0 %v4215_v32  ;;  %4716 = vmatprep.subr.mxu1 %v5153_v20 }
 0xefc   :  { %4666 = vmatprep.subr.mxu0 %v4230_v44  ;;  %4717 = vmatpush3.msra.mxu1 %v4325_v11 }
 0xefd   :  { %4667 = vmatpush3.msra.mxu0 %v4214_v53  ;;  %4718 = vmatprep.subr.mxu1 %v5153_v20 }
 0xefe   :  { %4668 = vmatprep.subr.mxu0 %v4229_v26  ;;  %4719 = vmatpush3.msra.mxu1 %v4324_v0 }
 0xeff   :  { %4669 = vmatpush3.msra.mxu0 %v4213_v2  ;;  %4720 = vmatprep.subr.mxu1 %v5153_v20 }
 0xf00   :  { %4670 = vmatprep.subr.mxu0 %v4228_v57  ;;  %4721 = vmatpush3.msra.mxu1 %v4323_v43 }
 0xf01   :  { %4671 = vmatpush3.msra.mxu0 %v4212_v60  ;;  %4722 = vmatprep.subr.mxu1 %v5153_v20 }
 0xf02   :  { %4672 = vmatprep.subr.mxu0 %v4227_v38  ;;  %4723 = vmatpush3.msra.mxu1 %v4322_v40 }
 0xf03   :  { %4673 = vmatpush3.msra.mxu0 %v4211_v61  ;;  %4724 = vmatprep.subr.mxu1 %v5153_v20  ;;  %v4314_v61 = vld [vmem:[%s7731_s10 + $0x10] sm:$0xff] }
 0xf04   :  { %4674 = vmatprep.subr.mxu0 %v4226_v47  ;;  %4725 = vmatpush3.msra.mxu1 %v4321_v23  ;;  %v4313_v47 = vld [vmem:[%s7731_s10 + $0x8] sm:$0xff] }
 0xf05   :  { %4675 = vmatpush3.msra.mxu0 %v4210_v49  ;;  %4726 = vmatprep.subr.mxu1 %v5153_v20  ;;  %v4312_v49 = vld [vmem:[%s7731_s10] sm:$0xff] }
 0xf06   :  { %4676 = vmatprep.subr.mxu0 %v4225_v42  ;;  %4727 = vmatpush3.msra.mxu1 %v4320_v27 }
 0xf07   :  { %4677 = vmatpush3.msra.mxu0 %v4209_v21  ;;  %4728 = vmatprep.subr.mxu1 %v5153_v20  ;;  %v4658_v21 = vld [vmem:[%s7730_s9] ss:$0 sm:$0xff] }
 0xf08   :  { %4678 = vmatprep.subr.mxu0 %v4224_v59  ;;  %4729 = vmatpush3.msra.mxu1 %v4319_v16 }
 0xf09   :  { %4679 = vmatpush3.msra.mxu0 %v4208_v37  ;;  %4730 = vmatprep.subr.mxu1 %v5153_v20 }
 0xf0a   :  { %4680 = vmatprep.subr.mxu0 %v4223_v12  ;;  %4731 = vmatpush3.msra.mxu1 %v4318_v24 }
 0xf0b   :  { %4681 = vmatpush3.msra.mxu0 %v4207_v9  ;;  %4732 = vmatprep.subr.mxu1 %v5153_v20 }
 0xf0c   :  { %4682 = vmatprep.subr.mxu0 %v4222_v6  ;;  %4733 = vmatpush3.msra.mxu1 %v4317_v31  ;;  %v4659_v6 = vld [vmem:[%s7732_s11] ss:$0 sm:$0xff] }
 0xf0d   :  { %4683 = vmatpush3.msra.mxu0 %v4206_v30  ;;  %4734 = vmatprep.subr.mxu1 %v5153_v20 }
 0xf0e   :  { %4684 = vmatprep.subr.mxu0 %v4221_v54  ;;  %4735 = vmatpush3.msra.mxu1 %v4316_v45 }
 0xf0f   :  { %4685 = vmatpush3.msra.mxu0 %v4205_v7  ;;  %4736 = vmatprep.subr.mxu1 %v5153_v20 }
 0xf10   :  { %4686 = vmatprep.subr.mxu0 %v4220_v25  ;;  %4744 = vmatprep.mubr.msk.f32.mxu1 %vm5154_vm4, %v5153_v20 }
 0xf11   :  { %4687 = vmatpush3.msra.mxu0 %v4204_v28 }
 0xf12   :  { %4688 = vmatprep.subr.mxu0 %v4219_v48 }
 0xf13   :  { %4689 = vmatpush3.msra.mxu0 %v4203_v3 }
 0xf14   :  { %4690 = vmatprep.subr.mxu0 %v4218_v33 }
 0xf15   :  { %4691 = vmatpush3.msra.mxu0 %v4202_v41 }
 0xfb6   :  { %v4136_v29 = vpop.f32.mrf.mxu0  ;;  %v4177_v46 = vpop.f32.mrf.mxu1 }
 0xfb7   :  { %v4137_v18 = vadd.f32 %v4136_v29, %v4094_v14  ;;  %v4178_v39 = vadd.f32 %v4177_v46, %v4096_v5 }
 0xfb8   :  { %v4138_v22 = vpop.f32.mrf.mxu0  ;;  %v4179_v56 = vpop.f32.mrf.mxu1 }
 0xfb9   :  { %5056 = vtanh.f32 %v4137_v18  ;;  %v4139_v1 = vadd.f32 %v4138_v22, %v4095_v17  ;;  %v4180_v34 = vadd.f32 %v4179_v56, %v4097_v63 }
 0xfba   :  { %v4140_v50 = vpop.f32.mrf.mxu0  ;;  %v4181_v51 = vpop.f32.mrf.mxu1 }
 0xfbb   :  { %5058 = vtanh.f32 %v4139_v1 }
 0xfbc   :  { %v4141_v13 = vpop.f32.mrf.mxu0  ;;  %v4182_v52 = vpop.f32.mrf.mxu1  ;;  %5060 = vtanh.f32 %v4178_v39 }
 0xfbd   :  { %5062 = vtanh.f32 %v4180_v34 }
 0xfc6   :  { %v5057_v55 = vpop.eup %5056 }
 0xfc7   :  { %v4188_v36 = vmul.f32 0.5, %v5057_v55 }
 0xfc8   :  { %v5059_v19 = vpop.eup %5058 }
 0xfc9   :  { %v4189_v62 = vadd.f32 0.5, %v4188_v36  ;;  %v4190_v4 = vmul.f32 0.5, %v5059_v19  ;;  %v5061_v32 = vpop.eup %5060 }
 0xfca   :  { %v5063_v26 = vpop.eup %5062 }
 0xfcb   :  { %v4191_v58 = vadd.f32 0.5, %v4190_v4  ;;  %v4195_v44 = vmul.f32 %v5061_v32, %v4189_v62  ;;  %v4192_v2 = vmul.f32 0.5, %v5063_v26 }
 0xfcd   :  { %v4194_v35 = vmul.f32 %v4191_v58, %v7543_v15  ;;  %v4193_v57 = vadd.f32 0.5, %v4192_v2  ;;  %v4315_v15 = vld [vmem:[%s7731_s10 + $0x18] sm:$0xff]  ;;  %s4413_s10 = sshll.u32 %s5155_s18, 4  ;;  %s4414_s10 = int_to_ptr.vmem [resolvable:$true] %s4413_s10 }
 0xfce   :  { %4737 = vmatpush3.msra.mxu1 %v4315_v15  ;;  %s5130_s19 = scalar_lea.vmem %s4414_s10, 32  ;;  %p5135_p1 = scmp.lt.s32.totalorder %s4414_s10, %s4414_s10 }
 0xfcf   :  { %v4196_v53 = vadd.f32 %v4195_v44, %v4194_v35  ;;  %4738 = vmatprep.subr.mxu1 %v5153_v20  ;;  %p5131_p0 = scmp.ne.s32.totalorder %s4414_s10, %s5130_s19  ;;  %p5136_p2 = scmp.lt.s32.totalorder %s5130_s19, %s5130_s19 }
 0xfd0   :  { %4739 = vmatpush3.msra.mxu1 %v4314_v61 }
 0xfd1   :  { %5064 = vtanh.f32 %v4196_v53  ;;  %4740 = vmatprep.subr.mxu1 %v5153_v20  ;;  %p5137_p3 = por %p5136_p2, %p5135_p1 }
 0xfd2   :  { %4741 = vmatpush3.msra.mxu1 %v4313_v47 }
 0xfd3   :  { %4742 = vmatprep.subr.mxu1 %v5153_v20  ;;  %p5138_p4 = pnand %p5137_p3, %p5131_p0 }
 0xfd4   :  { %4743 = vmatpush3.msra.mxu1 %v4312_v49 }
 0xfde   :  { %v5065_v60 = vpop.eup %5064 }
 0xfdf   :  { %v4198_v38 = vmul.f32 %v5065_v60, %v4193_v57 }
 0xfe1   :  { %4306 = vmatmul.mubr.f32.vlgmr.msra.gmra.mxu0 %v4198_v38 }
0x10a1   :  { %v4692_v42 = vpop.f32.mrf.mxu0 }
0x10a3   :  { %v4693_v59 = vpop.f32.mrf.mxu0 }
0x10a4   :  { %v4694_v37 = vadd.f32 %v4693_v59, %v4692_v42 }
0x10a6   :  { %v4308_v12 = vadd.f32 %v4694_v37, %v4658_v21 }
0x10a8   :  { %v4311_v9 = vmax.f32 %v4308_v12, 0.0 }
0x10aa   :  { %4745 = vmatmul.mubr.f32.vlgmr.msra.gmra.mxu1 %v4311_v9 }
0x116a   :  { %v4401_v30 = vpop.f32.mrf.mxu1 }
0x116b   :  { %v4402_v54 = vadd.f32 %v4659_v6, %v4401_v30 }
0x116c   :  { %v4746_v7 = vpop.f32.mrf.mxu1 }
0x116d   :  { %4406 = vst.msk [vmem:[#allocation2] sm:$0x3] %vm4405_vm5, %v4402_v54 }
0x116e   :  { %5141 = shalt.err (!%p5138_p4)
}
0x116f   :  { %4416 = dma.vmem_to_hbm [thread:$0]  %s4414_s10, 32, %s7733_s12, [#allocation3]  }
0x1170   :  { %5150 = dma.done.wait [#allocation3], 32  }
0x1171   :  { %5151 = vsyncadd [#allocation3], 4294967264 }
0x1172   :  { %4420 = vsyncpa [#allocation3], 1 }

</bundles_post_ra>
